<compile_context>
chip_gen: v5e
topology: v5e:2x2
jax: 0.10.0
libtpu: 0.0.40
codegen_flags: <defaults>
</compile_context>

<pallas_src>
import functools

import jax
import jax.numpy as jnp
from jax.experimental import pallas as pl
from jax.experimental.pallas import tpu as pltpu


# ----------------------------------------------------------------------------
# Quantization (mirrors Conv2dAffine8bit.__init__, done once at "module init")
# ----------------------------------------------------------------------------
def quantize_weight_affine8(w: jax.Array):
    """Returns (weight_u8, scale, zero_point) exactly matching the torch code."""
    min_val = jnp.min(w)
    max_val = jnp.max(w)
    scale = ((max_val - min_val) / 255.0).astype(w.dtype)
    # NOTE: like the PyTorch module, a constant weight (max == min) gives scale == 0
    # and NaN/inf downstream; behavior intentionally matches the reference module.
    zp = 255.0 - max_val / scale
    zp = jnp.round(jnp.clip(zp, 0.0, 255.0))                      # clip then round_()
    wq = jnp.round(jnp.clip(zp + w / scale, 0.0, 255.0)).astype(jnp.uint8)
    return wq, scale, zp


# ----------------------------------------------------------------------------
# Pallas kernel: implicit-GEMM conv, per-tap bf16 MXU dots, f32 accumulate
# ----------------------------------------------------------------------------
def _qconv_implicit_gemm_kernel(scale_ref, x_ref, w_ref, b_ref, o_ref, acc_ref,
                                *, stride, dilation):
    # scale_ref: SMEM (1,)              f32   dequant scale
    # x_ref    : VMEM (1, Hp, Wp, C)    bf16  zero-padded NHWC image of batch elem n
    # w_ref    : VMEM (KH, KW, C, TN)   bf16  centered weight slab (wq - zp, exact)
    # b_ref    : VMEM (1, TN)           f32   bias slice (zero padded)
    # o_ref    : VMEM (1, TOH, OW, TN)  f32   output tile (written once, last tap)
    # acc_ref  : VMEM (TOH*OW, TN)      f32   accumulator scratch
    kh, kw, _, _ = w_ref.shape
    _, toh, ow, tn = o_ref.shape
    tm = toh * ow
    ntaps = kh * kw
    row0 = pl.program_id(2) * (toh * stride)   # first padded-input row of this tile

    t = 0
    for i in range(kh):
        for j in range(kw):
            if stride == 1:
                win = x_ref[0,
                            pl.ds(row0 + i * dilation, toh),
                            pl.ds(j * dilation, ow), :]
            else:
                # TODO(synk): strided pl.ds is the documented path for stride > 1;
                # not exercised by the test below (stride == 1).
                win = x_ref[0,
                            pl.ds(row0 + i * dilation, toh, stride=stride),
                            pl.ds(j * dilation, ow, stride=stride), :]
            lhs = win.reshape(tm, win.shape[-1])            # (TM, C) bf16
            part = jnp.dot(lhs, w_ref[i, j],                # (C, TN) bf16 -> f32 acc
                           preferred_element_type=jnp.float32)
            if t == 0 and ntaps > 1:
                acc_ref[...] = part                         # no init sweep needed
            elif t < ntaps - 1:
                acc_ref[...] += part
            else:
                # Fused last-tap accumulate + dequant epilogue (single pass).
                total = part if ntaps == 1 else acc_ref[...] + part
                out2d = scale_ref[0] * total + b_ref[...]
                o_ref[0] = out2d.reshape(toh, ow, tn).astype(o_ref.dtype)
            t += 1


# ----------------------------------------------------------------------------
# Wrapper
# ----------------------------------------------------------------------------
def _round_up(x, m):
    return (x + m - 1) // m * m


def _largest_divisor_leq(n, cap):
    best = 1
    for d in range(1, n + 1):
        if n % d == 0 and d <= cap:
            best = d
    return best


@functools.partial(jax.jit, static_argnames=("stride", "padding", "dilation", "groups"))
def conv2d_affine8bit_forward(
    x, weight_u8, scale, zero_point, bias, *, stride=1, padding=0, dilation=1, groups=1
):
    """x: NCHW float32, weight_u8: OIHW uint8. Returns NCHW float32."""
    # TODO(synk): groups != 1 and string paddings ('same'/'valid') are not implemented.
    assert groups == 1, "grouped conv not implemented"
    n, c, h, w = x.shape
    oc, _, kh, kw = weight_u8.shape
    s, p, d = stride, padding, dilation

    oh = (h + 2 * p - d * (kh - 1) - 1) // s + 1
    ow = (w + 2 * p - d * (kw - 1) - 1) // s + 1
    hp, wp = h + 2 * p, w + 2 * p

    # ---- activations: zero-padded NHWC bf16 (no im2col / no KH*KW HBM blow-up) ----
    x_nhwc = jnp.transpose(x, (0, 2, 3, 1))
    x_nhwc = jnp.pad(x_nhwc, ((0, 0), (p, p), (p, p), (0, 0))).astype(jnp.bfloat16)

    # ---- weight: pre-centered (wq - zp); exact in bf16; padded AFTER centering so
    #      the OC zero padding dequantizes to exactly 0.  Layout (KH, KW, C, OCp).
    ocp = _round_up(oc, 128)
    w_centered = (weight_u8.astype(jnp.float32) - zero_point).astype(jnp.bfloat16)
    w_taps = jnp.transpose(w_centered, (2, 3, 1, 0))               # (KH, KW, C, OC)
    w_taps = jnp.pad(w_taps, ((0, 0), (0, 0), (0, 0), (0, ocp - oc)))

    if bias is None:
        bias = jnp.zeros((oc,), jnp.float32)
    bias2d = jnp.pad(bias.astype(jnp.float32), (0, ocp - oc)).reshape(1, ocp)
    scale1 = jnp.reshape(scale, (1,)).astype(jnp.float32)          # SMEM scalar

    # ---- tiling ----
    # OC tile: 256 keeps the 256-wide MXU N busy (v6e/v7x) while bounding resident
    # weight VMEM; small OC -> one full lane-dense tile (multiple of 128).
    tn = 256 if (ocp > 256 and ocp % 256 == 0) else ocp
    n_ocb = ocp // tn
    # M tile: toh output rows x OW columns, ~1024 rows target to amortise the
    # ~0.35us/grid-step overhead.  toh divides OH so no tile reads past the image.
    toh = _largest_divisor_leq(oh, max(1, 1024 // max(ow, 1)))
    n_oht = oh // toh
    tm = toh * ow

    # Grid order: OC tile outermost (weight fetched once per OC tile), batch next
    # (image fetched once per batch element), oh tiles innermost.
    grid = (n_ocb, n, n_oht)

    kernel = functools.partial(_qconv_implicit_gemm_kernel, stride=s, dilation=d)

    cost = pl.CostEstimate(                      # un-padded work (advisory)
        flops=2 * n * oh * ow * kh * kw * c * oc,
        transcendentals=0,
        bytes_accessed=(n * hp * wp * c * 2      # bf16 padded image
                        + kh * kw * c * oc * 2   # bf16 centered weight
                        + oc * 4                 # bias
                        + n * oh * ow * oc * 4), # f32 output
    )

    out_nhwc = pl.pallas_call(
        kernel,
        out_shape=jax.ShapeDtypeStruct((n, oh, ow, ocp), jnp.float32),
        grid=grid,
        in_specs=[
            pl.BlockSpec(memory_space=pltpu.MemorySpace.SMEM),                # scale
            pl.BlockSpec((1, hp, wp, c), lambda ob, nb, tb: (nb, 0, 0, 0)),   # image
            pl.BlockSpec((kh, kw, c, tn), lambda ob, nb, tb: (0, 0, 0, ob)),  # weight
            pl.BlockSpec((1, tn), lambda ob, nb, tb: (0, ob)),                # bias
        ],
        out_specs=pl.BlockSpec((1, toh, ow, tn), lambda ob, nb, tb: (nb, tb, 0, ob)),
        scratch_shapes=[pltpu.VMEM((tm, tn), jnp.float32)],
        compiler_params=pltpu.CompilerParams(
            dimension_semantics=("parallel", "parallel", "parallel"),
            vmem_limit_bytes=32 * 1024 * 1024,   # safe on v5e/v6e/v7x
        ),
        cost_estimate=cost,
    )(scale1, x_nhwc, w_taps, bias2d)

    # Module API is NCHW f32; slice away the OC lane padding.
    return jnp.transpose(out_nhwc[..., :oc], (0, 3, 1, 2))


# ----------------------------------------------------------------------------
# Reference (pure JAX, exact f32) for validation
# ----------------------------------------------------------------------------
def _reference(x, weight_u8, scale, zero_point, bias, stride, padding, dilation,
               *, round_lhs_to_bf16=False):
    if round_lhs_to_bf16:
        x = x.astype(jnp.bfloat16).astype(jnp.float32)
    w_deq = scale * (weight_u8.astype(jnp.float32) - zero_point)
    out = jax.lax.conv_general_dilated(
        x,
        w_deq,
        window_strides=(stride, stride),
        padding=((padding, padding), (padding, padding)),
        rhs_dilation=(dilation, dilation),
        dimension_numbers=("NCHW", "OIHW", "NCHW"),
        precision=jax.lax.Precision.HIGHEST,
    )
    return out + bias[None, :, None, None]


if __name__ == "__main__":
    key = jax.random.PRNGKey(0)
    k_x, k_w, k_b = jax.random.split(key, 3)

    # Small shapes consistent with the module: N=2, C_in=4, H=W=16, C_out=8, 3x3 kernel.
    N, C_IN, H, W = 2, 4, 16, 16
    C_OUT, KH, KW = 8, 3, 3
    STRIDE, PADDING, DILATION, GROUPS = 1, 1, 1, 1

    x = jax.random.normal(k_x, (N, C_IN, H, W), dtype=jnp.float32)
    weight_fp = jax.random.normal(k_w, (C_OUT, C_IN, KH, KW), dtype=jnp.float32)
    bias = jax.random.normal(k_b, (C_OUT,), dtype=jnp.float32)

    # "__init__": quantize weight to affine uint8.
    weight_u8, scale, zero_point = quantize_weight_affine8(weight_fp)

    # "forward": Pallas implicit-GEMM kernel.
    out = conv2d_affine8bit_forward(
        x, weight_u8, scale, zero_point, bias,
        stride=STRIDE, padding=PADDING, dilation=DILATION, groups=GROUPS,
    )
    out = jax.block_until_ready(out)

    ref_exact = _reference(x, weight_u8, scale, zero_point, bias, STRIDE, PADDING, DILATION)
    assert out.shape == ref_exact.shape == (N, C_OUT, H, W)

    # Tight check: the kernel computes (up to f32 accumulation order) the conv of the
    # bf16-rounded activations with the exactly-dequantized weight (centered weight is
    # exact in bf16, scale applied in f32).
    ref_bf16lhs = _reference(x, weight_u8, scale, zero_point, bias, STRIDE, PADDING,
                             DILATION, round_lhs_to_bf16=True)
    err_tight = float(jnp.max(jnp.abs(out - ref_bf16lhs)))
    assert err_tight < 1e-3, f"mismatch vs bf16-LHS reference: {err_tight}"

    # Loose check vs the exact f32 reference: only difference is the bf16 rounding of
    # the activations (rel eps ~ 2^-9).
    err_loose = float(jnp.max(jnp.abs(out - ref_exact)))
    assert err_loose < 1e-1, f"mismatch vs f32 reference: {err_loose}"

    print("KERNEL_OK")
</pallas_src>

<mosaic_0001>
module attributes {stable_mosaic.version = 11 : i64} {
  func.func @_qconv_implicit_gemm_kernel(%arg0: i32, %arg1: i32, %arg2: i32, %arg3: memref<1xf32, #tpu.memory_space<smem>>, %arg4: memref<1x18x18x4xbf16, #tpu.memory_space<vmem>>, %arg5: memref<3x3x4x128xbf16, #tpu.memory_space<vmem>>, %arg6: memref<1x128xf32, #tpu.memory_space<vmem>>, %arg7: memref<1x16x16x128xf32, #tpu.memory_space<vmem>>, %arg8: memref<256x128xf32, #tpu.memory_space<vmem>>) attributes {dimension_semantics = [#tpu.dimension_semantics<parallel>, #tpu.dimension_semantics<parallel>, #tpu.dimension_semantics<parallel>], iteration_bounds = array<i64: 1, 2, 1>, scalar_prefetch = 0 : i64, scratch_operands = 1 : i64, tpu.core_type = #tpu.core_type<tc>, window_params = [{transform_indices = @transform_0, window_bounds = array<i64: 1>}, {transform_indices = @transform_1, window_bounds = array<i64: 1, 18, 18, 4>}, {transform_indices = @transform_2, window_bounds = array<i64: 3, 3, 4, 128>}, {transform_indices = @transform_3, window_bounds = array<i64: 1, 128>}, {transform_indices = @transform_4, window_bounds = array<i64: 1, 16, 16, 128>}]} {
    %c16_i32 = arith.constant 16 : i32
    %0 = arith.muli %arg2, %c16_i32 : i32
    %c0_i32 = arith.constant 0 : i32
    %1 = arith.addi %0, %c0_i32 : i32
    %c0 = arith.constant 0 : index
    %2 = arith.index_cast %1 : i32 to index
    %c0_0 = arith.constant 0 : index
    %c0_1 = arith.constant 0 : index
    %3 = vector.load %arg4[%c0, %2, %c0_0, %c0_1] : memref<1x18x18x4xbf16, #tpu.memory_space<vmem>>, vector<1x16x16x4xbf16>
    %4 = vector.shape_cast %3 : vector<1x16x16x4xbf16> to vector<16x16x4xbf16>
    %5 = vector.shape_cast %4 : vector<16x16x4xbf16> to vector<256x4xbf16>
    %c0_2 = arith.constant 0 : index
    %c0_3 = arith.constant 0 : index
    %c0_4 = arith.constant 0 : index
    %c0_5 = arith.constant 0 : index
    %6 = vector.load %arg5[%c0_2, %c0_3, %c0_4, %c0_5] : memref<3x3x4x128xbf16, #tpu.memory_space<vmem>>, vector<1x1x4x128xbf16>
    %7 = vector.shape_cast %6 : vector<1x1x4x128xbf16> to vector<4x128xbf16>
    %cst = arith.constant dense<0.000000e+00> : vector<256x128xf32>
    %8 = tpu.matmul %5, %7, %cst {dimension_numbers = #tpu.dot_dimension_numbers<[1], [0], [0], [1], [0, 0, 1, 1], [], []>} : vector<256x4xbf16>, vector<4x128xbf16>, vector<256x128xf32> -> vector<256x128xf32>
    %c0_6 = arith.constant 0 : index
    %c0_7 = arith.constant 0 : index
    %9 = vector.load %arg8[%c0_6, %c0_7] : memref<256x128xf32, #tpu.memory_space<vmem>>, vector<256x128xf32>
    tpu.vector_store %arg8[%c0_6, %c0_7], %8 {strides = array<i32>} : memref<256x128xf32, #tpu.memory_space<vmem>>, vector<256x128xf32>,
    %c0_i32_8 = arith.constant 0 : i32
    %10 = arith.addi %0, %c0_i32_8 : i32
    %c0_9 = arith.constant 0 : index
    %11 = arith.index_cast %10 : i32 to index
    %c1 = arith.constant 1 : index
    %c0_10 = arith.constant 0 : index
    %12 = vector.load %arg4[%c0_9, %11, %c1, %c0_10] : memref<1x18x18x4xbf16, #tpu.memory_space<vmem>>, vector<1x16x16x4xbf16>
    %13 = vector.shape_cast %12 : vector<1x16x16x4xbf16> to vector<16x16x4xbf16>
    %14 = vector.shape_cast %13 : vector<16x16x4xbf16> to vector<256x4xbf16>
    %c0_11 = arith.constant 0 : index
    %c1_12 = arith.constant 1 : index
    %c0_13 = arith.constant 0 : index
    %c0_14 = arith.constant 0 : index
    %15 = vector.load %arg5[%c0_11, %c1_12, %c0_13, %c0_14] : memref<3x3x4x128xbf16, #tpu.memory_space<vmem>>, vector<1x1x4x128xbf16>
    %16 = vector.shape_cast %15 : vector<1x1x4x128xbf16> to vector<4x128xbf16>
    %cst_15 = arith.constant dense<0.000000e+00> : vector<256x128xf32>
    %17 = tpu.matmul %14, %16, %cst_15 {dimension_numbers = #tpu.dot_dimension_numbers<[1], [0], [0], [1], [0, 0, 1, 1], [], []>} : vector<256x4xbf16>, vector<4x128xbf16>, vector<256x128xf32> -> vector<256x128xf32>
    %c0_16 = arith.constant 0 : index
    %c0_17 = arith.constant 0 : index
    %18 = vector.load %arg8[%c0_16, %c0_17] : memref<256x128xf32, #tpu.memory_space<vmem>>, vector<256x128xf32>
    %19 = arith.addf %18, %17 : vector<256x128xf32>
    %c0_18 = arith.constant 0 : index
    %c0_19 = arith.constant 0 : index
    %20 = vector.load %arg8[%c0_18, %c0_19] : memref<256x128xf32, #tpu.memory_space<vmem>>, vector<256x128xf32>
    tpu.vector_store %arg8[%c0_18, %c0_19], %19 {strides = array<i32>} : memref<256x128xf32, #tpu.memory_space<vmem>>, vector<256x128xf32>,
    %c0_i32_20 = arith.constant 0 : i32
    %21 = arith.addi %0, %c0_i32_20 : i32
    %c0_21 = arith.constant 0 : index
    %22 = arith.index_cast %21 : i32 to index
    %c2 = arith.constant 2 : index
    %c0_22 = arith.constant 0 : index
    %23 = vector.load %arg4[%c0_21, %22, %c2, %c0_22] : memref<1x18x18x4xbf16, #tpu.memory_space<vmem>>, vector<1x16x16x4xbf16>
    %24 = vector.shape_cast %23 : vector<1x16x16x4xbf16> to vector<16x16x4xbf16>
    %25 = vector.shape_cast %24 : vector<16x16x4xbf16> to vector<256x4xbf16>
    %c0_23 = arith.constant 0 : index
    %c2_24 = arith.constant 2 : index
    %c0_25 = arith.constant 0 : index
    %c0_26 = arith.constant 0 : index
    %26 = vector.load %arg5[%c0_23, %c2_24, %c0_25, %c0_26] : memref<3x3x4x128xbf16, #tpu.memory_space<vmem>>, vector<1x1x4x128xbf16>
    %27 = vector.shape_cast %26 : vector<1x1x4x128xbf16> to vector<4x128xbf16>
    %cst_27 = arith.constant dense<0.000000e+00> : vector<256x128xf32>
    %28 = tpu.matmul %25, %27, %cst_27 {dimension_numbers = #tpu.dot_dimension_numbers<[1], [0], [0], [1], [0, 0, 1, 1], [], []>} : vector<256x4xbf16>, vector<4x128xbf16>, vector<256x128xf32> -> vector<256x128xf32>
    %c0_28 = arith.constant 0 : index
    %c0_29 = arith.constant 0 : index
    %29 = vector.load %arg8[%c0_28, %c0_29] : memref<256x128xf32, #tpu.memory_space<vmem>>, vector<256x128xf32>
    %30 = arith.addf %29, %28 : vector<256x128xf32>
    %c0_30 = arith.constant 0 : index
    %c0_31 = arith.constant 0 : index
    %31 = vector.load %arg8[%c0_30, %c0_31] : memref<256x128xf32, #tpu.memory_space<vmem>>, vector<256x128xf32>
    tpu.vector_store %arg8[%c0_30, %c0_31], %30 {strides = array<i32>} : memref<256x128xf32, #tpu.memory_space<vmem>>, vector<256x128xf32>,
    %c1_i32 = arith.constant 1 : i32
    %32 = arith.addi %0, %c1_i32 : i32
    %c0_32 = arith.constant 0 : index
    %33 = arith.index_cast %32 : i32 to index
    %c0_33 = arith.constant 0 : index
    %c0_34 = arith.constant 0 : index
    %34 = vector.load %arg4[%c0_32, %33, %c0_33, %c0_34] : memref<1x18x18x4xbf16, #tpu.memory_space<vmem>>, vector<1x16x16x4xbf16>
    %35 = vector.shape_cast %34 : vector<1x16x16x4xbf16> to vector<16x16x4xbf16>
    %36 = vector.shape_cast %35 : vector<16x16x4xbf16> to vector<256x4xbf16>
    %c1_35 = arith.constant 1 : index
    %c0_36 = arith.constant 0 : index
    %c0_37 = arith.constant 0 : index
    %c0_38 = arith.constant 0 : index
    %37 = vector.load %arg5[%c1_35, %c0_36, %c0_37, %c0_38] : memref<3x3x4x128xbf16, #tpu.memory_space<vmem>>, vector<1x1x4x128xbf16>
    %38 = vector.shape_cast %37 : vector<1x1x4x128xbf16> to vector<4x128xbf16>
    %cst_39 = arith.constant dense<0.000000e+00> : vector<256x128xf32>
    %39 = tpu.matmul %36, %38, %cst_39 {dimension_numbers = #tpu.dot_dimension_numbers<[1], [0], [0], [1], [0, 0, 1, 1], [], []>} : vector<256x4xbf16>, vector<4x128xbf16>, vector<256x128xf32> -> vector<256x128xf32>
    %c0_40 = arith.constant 0 : index
    %c0_41 = arith.constant 0 : index
    %40 = vector.load %arg8[%c0_40, %c0_41] : memref<256x128xf32, #tpu.memory_space<vmem>>, vector<256x128xf32>
    %41 = arith.addf %40, %39 : vector<256x128xf32>
    %c0_42 = arith.constant 0 : index
    %c0_43 = arith.constant 0 : index
    %42 = vector.load %arg8[%c0_42, %c0_43] : memref<256x128xf32, #tpu.memory_space<vmem>>, vector<256x128xf32>
    tpu.vector_store %arg8[%c0_42, %c0_43], %41 {strides = array<i32>} : memref<256x128xf32, #tpu.memory_space<vmem>>, vector<256x128xf32>,
    %c1_i32_44 = arith.constant 1 : i32
    %43 = arith.addi %0, %c1_i32_44 : i32
    %c0_45 = arith.constant 0 : index
    %44 = arith.index_cast %43 : i32 to index
    %c1_46 = arith.constant 1 : index
    %c0_47 = arith.constant 0 : index
    %45 = vector.load %arg4[%c0_45, %44, %c1_46, %c0_47] : memref<1x18x18x4xbf16, #tpu.memory_space<vmem>>, vector<1x16x16x4xbf16>
    %46 = vector.shape_cast %45 : vector<1x16x16x4xbf16> to vector<16x16x4xbf16>
    %47 = vector.shape_cast %46 : vector<16x16x4xbf16> to vector<256x4xbf16>
    %c1_48 = arith.constant 1 : index
    %c1_49 = arith.constant 1 : index
    %c0_50 = arith.constant 0 : index
    %c0_51 = arith.constant 0 : index
    %48 = vector.load %arg5[%c1_48, %c1_49, %c0_50, %c0_51] : memref<3x3x4x128xbf16, #tpu.memory_space<vmem>>, vector<1x1x4x128xbf16>
    %49 = vector.shape_cast %48 : vector<1x1x4x128xbf16> to vector<4x128xbf16>
    %cst_52 = arith.constant dense<0.000000e+00> : vector<256x128xf32>
    %50 = tpu.matmul %47, %49, %cst_52 {dimension_numbers = #tpu.dot_dimension_numbers<[1], [0], [0], [1], [0, 0, 1, 1], [], []>} : vector<256x4xbf16>, vector<4x128xbf16>, vector<256x128xf32> -> vector<256x128xf32>
    %c0_53 = arith.constant 0 : index
    %c0_54 = arith.constant 0 : index
    %51 = vector.load %arg8[%c0_53, %c0_54] : memref<256x128xf32, #tpu.memory_space<vmem>>, vector<256x128xf32>
    %52 = arith.addf %51, %50 : vector<256x128xf32>
    %c0_55 = arith.constant 0 : index
    %c0_56 = arith.constant 0 : index
    %53 = vector.load %arg8[%c0_55, %c0_56] : memref<256x128xf32, #tpu.memory_space<vmem>>, vector<256x128xf32>
    tpu.vector_store %arg8[%c0_55, %c0_56], %52 {strides = array<i32>} : memref<256x128xf32, #tpu.memory_space<vmem>>, vector<256x128xf32>,
    %c1_i32_57 = arith.constant 1 : i32
    %54 = arith.addi %0, %c1_i32_57 : i32
    %c0_58 = arith.constant 0 : index
    %55 = arith.index_cast %54 : i32 to index
    %c2_59 = arith.constant 2 : index
    %c0_60 = arith.constant 0 : index
    %56 = vector.load %arg4[%c0_58, %55, %c2_59, %c0_60] : memref<1x18x18x4xbf16, #tpu.memory_space<vmem>>, vector<1x16x16x4xbf16>
    %57 = vector.shape_cast %56 : vector<1x16x16x4xbf16> to vector<16x16x4xbf16>
    %58 = vector.shape_cast %57 : vector<16x16x4xbf16> to vector<256x4xbf16>
    %c1_61 = arith.constant 1 : index
    %c2_62 = arith.constant 2 : index
    %c0_63 = arith.constant 0 : index
    %c0_64 = arith.constant 0 : index
    %59 = vector.load %arg5[%c1_61, %c2_62, %c0_63, %c0_64] : memref<3x3x4x128xbf16, #tpu.memory_space<vmem>>, vector<1x1x4x128xbf16>
    %60 = vector.shape_cast %59 : vector<1x1x4x128xbf16> to vector<4x128xbf16>
    %cst_65 = arith.constant dense<0.000000e+00> : vector<256x128xf32>
    %61 = tpu.matmul %58, %60, %cst_65 {dimension_numbers = #tpu.dot_dimension_numbers<[1], [0], [0], [1], [0, 0, 1, 1], [], []>} : vector<256x4xbf16>, vector<4x128xbf16>, vector<256x128xf32> -> vector<256x128xf32>
    %c0_66 = arith.constant 0 : index
    %c0_67 = arith.constant 0 : index
    %62 = vector.load %arg8[%c0_66, %c0_67] : memref<256x128xf32, #tpu.memory_space<vmem>>, vector<256x128xf32>
    %63 = arith.addf %62, %61 : vector<256x128xf32>
    %c0_68 = arith.constant 0 : index
    %c0_69 = arith.constant 0 : index
    %64 = vector.load %arg8[%c0_68, %c0_69] : memref<256x128xf32, #tpu.memory_space<vmem>>, vector<256x128xf32>
    tpu.vector_store %arg8[%c0_68, %c0_69], %63 {strides = array<i32>} : memref<256x128xf32, #tpu.memory_space<vmem>>, vector<256x128xf32>,
    %c2_i32 = arith.constant 2 : i32
    %65 = arith.addi %0, %c2_i32 : i32
    %c0_70 = arith.constant 0 : index
    %66 = arith.index_cast %65 : i32 to index
    %c0_71 = arith.constant 0 : index
    %c0_72 = arith.constant 0 : index
    %67 = vector.load %arg4[%c0_70, %66, %c0_71, %c0_72] : memref<1x18x18x4xbf16, #tpu.memory_space<vmem>>, vector<1x16x16x4xbf16>
    %68 = vector.shape_cast %67 : vector<1x16x16x4xbf16> to vector<16x16x4xbf16>
    %69 = vector.shape_cast %68 : vector<16x16x4xbf16> to vector<256x4xbf16>
    %c2_73 = arith.constant 2 : index
    %c0_74 = arith.constant 0 : index
    %c0_75 = arith.constant 0 : index
    %c0_76 = arith.constant 0 : index
    %70 = vector.load %arg5[%c2_73, %c0_74, %c0_75, %c0_76] : memref<3x3x4x128xbf16, #tpu.memory_space<vmem>>, vector<1x1x4x128xbf16>
    %71 = vector.shape_cast %70 : vector<1x1x4x128xbf16> to vector<4x128xbf16>
    %cst_77 = arith.constant dense<0.000000e+00> : vector<256x128xf32>
    %72 = tpu.matmul %69, %71, %cst_77 {dimension_numbers = #tpu.dot_dimension_numbers<[1], [0], [0], [1], [0, 0, 1, 1], [], []>} : vector<256x4xbf16>, vector<4x128xbf16>, vector<256x128xf32> -> vector<256x128xf32>
    %c0_78 = arith.constant 0 : index
    %c0_79 = arith.constant 0 : index
    %73 = vector.load %arg8[%c0_78, %c0_79] : memref<256x128xf32, #tpu.memory_space<vmem>>, vector<256x128xf32>
    %74 = arith.addf %73, %72 : vector<256x128xf32>
    %c0_80 = arith.constant 0 : index
    %c0_81 = arith.constant 0 : index
    %75 = vector.load %arg8[%c0_80, %c0_81] : memref<256x128xf32, #tpu.memory_space<vmem>>, vector<256x128xf32>
    tpu.vector_store %arg8[%c0_80, %c0_81], %74 {strides = array<i32>} : memref<256x128xf32, #tpu.memory_space<vmem>>, vector<256x128xf32>,
    %c2_i32_82 = arith.constant 2 : i32
    %76 = arith.addi %0, %c2_i32_82 : i32
    %c0_83 = arith.constant 0 : index
    %77 = arith.index_cast %76 : i32 to index
    %c1_84 = arith.constant 1 : index
    %c0_85 = arith.constant 0 : index
    %78 = vector.load %arg4[%c0_83, %77, %c1_84, %c0_85] : memref<1x18x18x4xbf16, #tpu.memory_space<vmem>>, vector<1x16x16x4xbf16>
    %79 = vector.shape_cast %78 : vector<1x16x16x4xbf16> to vector<16x16x4xbf16>
    %80 = vector.shape_cast %79 : vector<16x16x4xbf16> to vector<256x4xbf16>
    %c2_86 = arith.constant 2 : index
    %c1_87 = arith.constant 1 : index
    %c0_88 = arith.constant 0 : index
    %c0_89 = arith.constant 0 : index
    %81 = vector.load %arg5[%c2_86, %c1_87, %c0_88, %c0_89] : memref<3x3x4x128xbf16, #tpu.memory_space<vmem>>, vector<1x1x4x128xbf16>
    %82 = vector.shape_cast %81 : vector<1x1x4x128xbf16> to vector<4x128xbf16>
    %cst_90 = arith.constant dense<0.000000e+00> : vector<256x128xf32>
    %83 = tpu.matmul %80, %82, %cst_90 {dimension_numbers = #tpu.dot_dimension_numbers<[1], [0], [0], [1], [0, 0, 1, 1], [], []>} : vector<256x4xbf16>, vector<4x128xbf16>, vector<256x128xf32> -> vector<256x128xf32>
    %c0_91 = arith.constant 0 : index
    %c0_92 = arith.constant 0 : index
    %84 = vector.load %arg8[%c0_91, %c0_92] : memref<256x128xf32, #tpu.memory_space<vmem>>, vector<256x128xf32>
    %85 = arith.addf %84, %83 : vector<256x128xf32>
    %c0_93 = arith.constant 0 : index
    %c0_94 = arith.constant 0 : index
    %86 = vector.load %arg8[%c0_93, %c0_94] : memref<256x128xf32, #tpu.memory_space<vmem>>, vector<256x128xf32>
    tpu.vector_store %arg8[%c0_93, %c0_94], %85 {strides = array<i32>} : memref<256x128xf32, #tpu.memory_space<vmem>>, vector<256x128xf32>,
    %c2_i32_95 = arith.constant 2 : i32
    %87 = arith.addi %0, %c2_i32_95 : i32
    %c0_96 = arith.constant 0 : index
    %88 = arith.index_cast %87 : i32 to index
    %c2_97 = arith.constant 2 : index
    %c0_98 = arith.constant 0 : index
    %89 = vector.load %arg4[%c0_96, %88, %c2_97, %c0_98] : memref<1x18x18x4xbf16, #tpu.memory_space<vmem>>, vector<1x16x16x4xbf16>
    %90 = vector.shape_cast %89 : vector<1x16x16x4xbf16> to vector<16x16x4xbf16>
    %91 = vector.shape_cast %90 : vector<16x16x4xbf16> to vector<256x4xbf16>
    %c2_99 = arith.constant 2 : index
    %c2_100 = arith.constant 2 : index
    %c0_101 = arith.constant 0 : index
    %c0_102 = arith.constant 0 : index
    %92 = vector.load %arg5[%c2_99, %c2_100, %c0_101, %c0_102] : memref<3x3x4x128xbf16, #tpu.memory_space<vmem>>, vector<1x1x4x128xbf16>
    %93 = vector.shape_cast %92 : vector<1x1x4x128xbf16> to vector<4x128xbf16>
    %cst_103 = arith.constant dense<0.000000e+00> : vector<256x128xf32>
    %94 = tpu.matmul %91, %93, %cst_103 {dimension_numbers = #tpu.dot_dimension_numbers<[1], [0], [0], [1], [0, 0, 1, 1], [], []>} : vector<256x4xbf16>, vector<4x128xbf16>, vector<256x128xf32> -> vector<256x128xf32>
    %c0_104 = arith.constant 0 : index
    %c0_105 = arith.constant 0 : index
    %95 = vector.load %arg8[%c0_104, %c0_105] : memref<256x128xf32, #tpu.memory_space<vmem>>, vector<256x128xf32>
    %96 = arith.addf %95, %94 : vector<256x128xf32>
    %c0_106 = arith.constant 0 : index
    %97 = memref.load %arg3[%c0_106] : memref<1xf32, #tpu.memory_space<smem>>
    %98 = vector.broadcast %97 : f32 to vector<256x128xf32>
    %99 = arith.mulf %98, %96 : vector<256x128xf32>
    %c0_107 = arith.constant 0 : index
    %c0_108 = arith.constant 0 : index
    %100 = vector.load %arg6[%c0_107, %c0_108] : memref<1x128xf32, #tpu.memory_space<vmem>>, vector<1x128xf32>
    %101 = vector.broadcast %100 : vector<1x128xf32> to vector<256x128xf32>
    %102 = arith.addf %99, %101 : vector<256x128xf32>
    %103 = vector.shape_cast %102 : vector<256x128xf32> to vector<16x16x128xf32>
    %c0_109 = arith.constant 0 : index
    %c0_110 = arith.constant 0 : index
    %c0_111 = arith.constant 0 : index
    %c0_112 = arith.constant 0 : index
    %104 = vector.load %arg7[%c0_109, %c0_110, %c0_111, %c0_112] : memref<1x16x16x128xf32, #tpu.memory_space<vmem>>, vector<1x16x16x128xf32>
    %105 = vector.shape_cast %104 : vector<1x16x16x128xf32> to vector<16x16x128xf32>
    %106 = vector.shape_cast %103 : vector<16x16x128xf32> to vector<1x16x16x128xf32>
    tpu.vector_store %arg7[%c0_109, %c0_110, %c0_111, %c0_112], %106 {strides = array<i32>} : memref<1x16x16x128xf32, #tpu.memory_space<vmem>>, vector<1x16x16x128xf32>,
    return
  }
  func.func @transform_0(%arg0: i32, %arg1: i32, %arg2: i32) -> i32 {
    %c0_i32 = arith.constant 0 : i32
    %c0_i32_0 = arith.constant 0 : i32
    return %c0_i32 : i32
  }
  func.func @transform_1(%arg0: i32, %arg1: i32, %arg2: i32) -> (i32, i32, i32, i32) {
    %c0_i32 = arith.constant 0 : i32
    %c0_i32_0 = arith.constant 0 : i32
    %c0_i32_1 = arith.constant 0 : i32
    %c0_i32_2 = arith.constant 0 : i32
    return %arg1, %c0_i32, %c0_i32_0, %c0_i32_1 : i32, i32, i32, i32
  }
  func.func @transform_2(%arg0: i32, %arg1: i32, %arg2: i32) -> (i32, i32, i32, i32) {
    %c0_i32 = arith.constant 0 : i32
    %c0_i32_0 = arith.constant 0 : i32
    %c0_i32_1 = arith.constant 0 : i32
    %c0_i32_2 = arith.constant 0 : i32
    return %c0_i32, %c0_i32_0, %c0_i32_1, %arg0 : i32, i32, i32, i32
  }
  func.func @transform_3(%arg0: i32, %arg1: i32, %arg2: i32) -> (i32, i32) {
    %c0_i32 = arith.constant 0 : i32
    %c0_i32_0 = arith.constant 0 : i32
    return %c0_i32, %arg0 : i32, i32
  }
  func.func @transform_4(%arg0: i32, %arg1: i32, %arg2: i32) -> (i32, i32, i32, i32) {
    %c0_i32 = arith.constant 0 : i32
    %c0_i32_0 = arith.constant 0 : i32
    return %arg1, %arg2, %c0_i32, %arg0 : i32, i32, i32, i32
  }
}

</mosaic_0001>

<bundles_post_ra>
// kernel: conv2d_affine8bit_forward.1
= control target key start
LH: loop header
LB: loop body
LE: loop exit
PB: predicated region body
PF: predicated region fallthrough
CT: control target
= control target key end

     0   :  { %s5910_s17 = smov 0   ;;  %s5912_s18 = smov 0   ;;  %s7319_s0 = inlined_call_operand.<no memory space> [shape: f32[1], index: 0, kind: input, shape index: {}]   ;;  %s7320_s1 = inlined_call_operand.vmem [shape: bf16[2,18,18,4], index: 1, kind: input, shape index: {}]   ;;  %s7321_s2 = inlined_call_operand.vmem [shape: bf16[3,3,4,128], index: 2, kind: input, shape index: {}]   ;;  %s7322_s3 = inlined_call_operand.vmem [shape: f32[1,128], index: 3, kind: input, shape index: {}]   ;;  %s7323_s4 = inlined_call_operand.vmem [shape: f32[2,16,16,128], index: 4, kind: output, shape index: {}]  }
   0x1   :  { %9 = sst [smem:[#allocation3]] %s7319_s0  ;;  %s5914_s19 = smov 0  }
   0x2 LB: > { %s30_s0 = sadd.s32 1, %s5876_s18  ;;  %p5125_p0 = scmp.ge.s32.totalorder %s5880_s19, 1  ;;  %s5880_s19 = sphi %s5914_s19, %s15_s19   ;;  %s5876_s18 = sphi %s5912_s18, %s7353_s18   ;;  %s5872_s17 = sphi %s5910_s17, %s7352_s17  }
   0x3   : > { %p32_p1 = scmp.ge.s32.totalorder %s30_s0, 2  ;;  %p203_p2 = scmp.lt.s32.totalorder %s5880_s19, 3 }
   0x5   : > { %s7355_s0 = smov (%p32_p1, %s30_s0), 0  ;;  %p204_p3 = pnand %p5125_p0, %p203_p2 }
   0x7   : > { %207 = sbr.rel (%p204_p3) target bundleno = 731 (0x2db), region = 36 }
   0xc   : > { %v307_v0 = vld [vmem:[%s7321_s2] sm:$0x3]  ;;  %vm437_vm0 = vcmask 1041408   ;;  %p244_p4 = scmp.lt.s32.totalorder %s5872_s17, 1  ;;  %v5242_v2 = vld [vmem:[%s7321_s2 + $0x4] sm:$0x3] }
   0xd   : > { %v439_v1 = vsel %vm437_vm0, %v307_v0, 0  ;;  %v5291_v3 = vld [vmem:[%s7321_s2 + $0x6] sm:$0x3]  ;;  %v1593_v4 = vsel %vm437_vm0, %v5242_v2, 0  ;;  %v5209_v6 = vld [vmem:[%s7321_s2 + $0x2] sm:$0x3] }
   0xe   : > { %5828 = vmatpush.bf16.msra.mxu1 %v439_v1  ;;  %5829 = vmatpush.bf16.msra.mxu2 %v439_v1  ;;  %s7357_s17 = smov (!%p244_p4, %s5872_s17), 1  ;;  %v1947_v5 = vsel %vm437_vm0, %v5291_v3, 0  ;;  %v1096_v7 = vsel %vm437_vm0, %v5209_v6, 0  ;;  %v5420_v8 = vld [vmem:[%s7321_s2 + $0x8] sm:$0x3]  ;;  %vm388_vm1 = vcmask 31744  }
   0xf   : > { %5830 = vmatpush.bf16.msra.mxu3 %v439_v1  ;;  %448 = vmatpush.bf16.msra.mxu0 %v439_v1  ;;  %s5831_s30 = smul.u32 216, %s7357_s17  ;;  %v2665_v9 = vsel %vm437_vm0, %v5420_v8, 0  ;;  %v5550_v28 = vld [vmem:[%s7321_s2 + $0xc] sm:$0x3]  ;;  %v5679_v29 = vld [vmem:[%s7321_s2 + $0xe] sm:$0x3] }
  0x10   : > { %v3513_v30 = vsel %vm437_vm0, %v5550_v28, 0  ;;  %v4231_v31 = vsel %vm437_vm0, %v5679_v29, 0  ;;  %v5501_v32 = vld [vmem:[%s7321_s2 + $0xa] sm:$0x3]  ;;  %v5760_v33 = vld [vmem:[%s7321_s2 + $0x10] sm:$0x3] }
  0x11   : > { %s5954_s7 = scalar_lea.vmem %s7320_s1, %s5831_s30  ;;  %v3159_v36 = vsel %vm437_vm0, %v5501_v32, 0  ;;  %v4725_v37 = vsel %vm437_vm0, %v5760_v33, 0  ;;  %vm610_vm2 = vsmask.f32 3328  ;;  %vm611_vm3 = vsmask.f32 7440 }
  0x12   : > { %1602 = vmatpush.bf16.msrb.mxu2 %v1593_v4  ;;  %1105 = vmatpush.bf16.msrb.mxu1 %v1096_v7  ;;  %v5784_v10 = vld [vmem:[%s5954_s7 + $0x30] sm:$0xff]  ;;  %v5788_v11 = vld [vmem:[%s5954_s7 + $0x60] sm:$0xff]  ;;  %v5786_v18 = vld [vmem:[%s5954_s7 + $0x48] sm:$0xff]  ;;  %vm1379_vm4 = vcmask 1042432   ;;  %vm1380_vm5 = vcmask 1046532   ;;  %s6956_s16 = sld [smem:[#allocation3]] }
  0x13   : > { %1956 = vmatpush.bf16.msrb.mxu3 %v1947_v5  ;;  %2674 = vmatpush.bf16.msrb.mxu0 %v2665_v9  ;;  %v5792_v12 = vld [vmem:[%s5954_s7 + $0x90] sm:$0xff]  ;;  %v5780_v13 = vld [vmem:[%s5954_s7] sm:$0xff]  ;;  %v5790_v19 = vld [vmem:[%s5954_s7 + $0x78] sm:$0xff]  ;;  %s5779_s20 = sshll.u32 %s7357_s17, 8 }
  0x14   : > { %5197 = vmatmul.msk.bf16.vlgmr.msra.gmra.mxu1 %vm388_vm1, %v5784_v10  ;;  %5201 = vmatmul.msk.bf16.vlgmr.msra.gmra.mxu2 %vm388_vm1, %v5788_v11  ;;  %v5785_v14 = vld [vmem:[%s5954_s7 + $0x3c] sm:$0xff]  ;;  %v5789_v15 = vld [vmem:[%s5954_s7 + $0x6c] sm:$0xff]  ;;  %v563_v23 = vld [vmem:[%s5954_s7 + $0x4] sm:$0xf]  ;;  %s7004_s24 = scalar_lea.vmem %s7323_s4, %s5779_s20 }
  0x15   : > { %5205 = vmatmul.msk.bf16.vlgmr.msra.gmra.mxu3 %vm388_vm1, %v5792_v12  ;;  %5193 = vmatmul.msk.bf16.vlgmr.msra.gmra.mxu0 %vm388_vm1, %v5780_v13  ;;  %v5793_v16 = vld [vmem:[%s5954_s7 + $0x9c] sm:$0xff]  ;;  %v5781_v17 = vld [vmem:[%s5954_s7 + $0xc] sm:$0xff]  ;;  %v623_v26 = vshll.u32 %v563_v23, 16  ;;  %v627_v27 = vshrl.u32 %v563_v23, 16  ;;  %v564_v38 = vld [vmem:[%s5954_s7 + $0x8] sm:$0x1] }
  0x16   : > { %v5794_v20 = vld [vmem:[%s5954_s7 + $0xa8] sm:$0xff]  ;;  %v5782_v21 = vld [vmem:[%s5954_s7 + $0x18] sm:$0xff]  ;;  %v562_v22 = vld [vmem:[%s5954_s7] sm:$0xf]  ;;  %3522 = vmatpush.bf16.msra.mxu2 %v3513_v30  ;;  %3168 = vmatpush.bf16.msra.mxu1 %v3159_v36  ;;  %v633_v48 = vshll.u32 %v564_v38, 16 }
  0x17   : > { %v614_v24 = vshrl.u32 %v562_v22, 16  ;;  %v617_v25 = vshll.u32 %v562_v22, 16  ;;  %v5372_v34 = vld [vmem:[%s5954_s7 + $0xc] sm:$0xf]  ;;  %v5373_v35 = vld [vmem:[%s5954_s7 + $0x10] sm:$0xf]  ;;  %4240 = vmatpush.bf16.msra.mxu3 %v4231_v31  ;;  %4734 = vmatpush.bf16.msra.mxu0 %v4725_v37  ;;  %vm6011_vm6 = vmor %vm610_vm2, %vm611_vm3 }
  0x18   : > { %v625_v41 = vrot.slane %v623_v26, 5  ;;  %v629_v42 = vrot.slane %v627_v27, 4  ;;  %v1284_v43 = vld [vmem:[%s5954_s7 + $0x4] sm:$0xf]  ;;  %v2183_v44 = vshrl.u32 %v5372_v34, 16  ;;  %v2186_v45 = vshll.u32 %v5372_v34, 16  ;;  %vm6015_vm7 = vmor %vm1379_vm4, %vm1380_vm5 }
  0x19   : > { %v616_v39 = vrot.slane %v614_v24, 4  ;;  %v619_v40 = vrot.slane %v617_v25, 5  ;;  %v2192_v46 = vshll.u32 %v5373_v35, 16  ;;  %v2196_v47 = vshrl.u32 %v5373_v35, 16  ;;  %v1283_v52 = vld [vmem:[%s5954_s7] sm:$0xe] }
  0x1a   : > { %v630_v50 = vor.u32 %v629_v42, %v625_v41  ;;  %v1384_v51 = vrot.slane %v1284_v43, 5  ;;  %v2185_v53 = vrot.slane %v2183_v44, 4  ;;  %v2188_v54 = vrot.slane %v2186_v45, 5  ;;  %v1285_v57 = vld [vmem:[%s5954_s7 + $0x8] sm:$0x1]  ;;  %v5787_v59 = vld [vmem:[%s5954_s7 + $0x54] sm:$0xff] }
  0x1b   : > { %v620_v49 = vor.u32 %v619_v40, %v616_v39  ;;  %v2194_v55 = vrot.slane %v2192_v46, 5  ;;  %v2198_v56 = vrot.slane %v2196_v47, 4  ;;  %v5374_v58 = vld [vmem:[%s5954_s7 + $0x14] sm:$0x1]  ;;  %v5791_v60 = vld [vmem:[%s5954_s7 + $0x84] sm:$0xff]  ;;  %v635_v61 = vrot.slane %v633_v48, 5 }
  0x1c   : > { %v5795_v62 = vld [vmem:[%s5954_s7 + $0xb4] sm:$0xff]  ;;  %v5783_v63 = vld [vmem:[%s5954_s7 + $0x24] sm:$0xff]  ;;  %v631_v2 = vrot.slane %v630_v50, 4  ;;  %v5226_v3 = vrot.slane %v1283_v52, 9  ;;  %v1386_v4 = vrot.slane %v1384_v51, 4  ;;  %v1387_v6 = vrot.slane %v1285_v57, 5 }
  0x1d   : > { %v621_v1 = vrot.slane %v620_v49, 4  ;;  %v2189_v7 = vor.u32 %v2188_v54, %v2185_v53  ;;  %v2199_v8 = vor.u32 %v2198_v56, %v2194_v55  ;;  %v2202_v9 = vshll.u32 %v5374_v58, 16  ;;  %v565_v10 = vld [vmem:[%s5954_s7 + $0xc] sm:$0xf]  ;;  %v566_v11 = vld [vmem:[%s5954_s7 + $0x10] sm:$0xf] }
  0x1e   : > { %v636_v13 = vsel %vm6011_vm6, %v631_v2, %v635_v61  ;;  %v641_v22 = vshll.u32 %v565_v10, 16  ;;  %v647_v23 = vshll.u32 %v566_v11, 16  ;;  %v651_v24 = vshrl.u32 %v566_v11, 16  ;;  %v567_v35 = vld [vmem:[%s5954_s7 + $0x14] sm:$0x1] }
  0x1f   : > { %v626_v12 = vsel %vm6011_vm6, %v621_v1, %v625_v41  ;;  %v1000_v30 = vunpack.c.l.b16 %v636_v13  ;;  %v1287_v40 = vld [vmem:[%s5954_s7 + $0x10] sm:$0xf]  ;;  %v5377_v47 = vld [vmem:[%s5954_s7 + $0x20] sm:$0x1]  ;;  %v657_v48 = vshll.u32 %v567_v35, 16 }
  0x20   : > { %v999_v29 = vunpack.c.l.b16 %v626_v12  ;;  %v643_v37 = vrot.slane %v641_v22, 5  ;;  %v649_v38 = vrot.slane %v647_v23, 5  ;;  %v653_v39 = vrot.slane %v651_v24, 4  ;;  %v1286_v54 = vld [vmem:[%s5954_s7 + $0xc] sm:$0xe] }
  0x21   : > { %v1391_v52 = vrot.slane %v1287_v40, 5  ;;  %v2226_v58 = vshll.u32 %v5377_v47, 16  ;;  %v659_v61 = vrot.slane %v657_v48, 5  ;;  %v5227_v2 = vrot.slane %v1286_v54, 9  ;;  %v1290_v40 = vld [vmem:[%s5954_s7 + $0x1c] sm:$0xf] }
  0x22   : > { %v1031_v49 = vpack.c.b16 %v1000_v30, %v999_v29  ;;  %v654_v53 = vor.u32 %v653_v39, %v649_v38  ;;  %v5797_v48 = vld [vmem:[%s5954_s7 + $0x18] sm:$0xff] }
  0x23   : > { %v1289_v54 = vld [vmem:[%s5954_s7 + $0x18] sm:$0xe] }
  0x24   : > { %5198 = vmatmul.msk.bf16.gmra.mxu1 %vm388_vm1, %v5785_v14  ;;  %5202 = vmatmul.msk.bf16.gmra.mxu2 %vm388_vm1, %v5789_v15  ;;  %v1385_v14 = vsel %vm6015_vm7, %v5226_v3, %v1384_v51  ;;  %v5375_v15 = vld [vmem:[%s5954_s7 + $0x18] sm:$0xf]  ;;  %v1393_v3 = vrot.slane %v1391_v52, 4 }
  0x25   : > { %5206 = vmatmul.msk.bf16.gmra.mxu3 %vm388_vm1, %v5793_v16  ;;  %5194 = vmatmul.msk.bf16.gmra.mxu0 %vm388_vm1, %v5781_v17  ;;  %v5376_v16 = vld [vmem:[%s5954_s7 + $0x1c] sm:$0xf]  ;;  %v1388_v17 = vsel %vm6015_vm7, %v1386_v4, %v1387_v6  ;;  %v2207_v25 = vshrl.u32 %v5375_v15, 16  ;;  %v2210_v26 = vshll.u32 %v5375_v15, 16  ;;  %v1496_v31 = vunpack.c.l.b16 %v1385_v14 }
  0x26   : > { %v2216_v27 = vshll.u32 %v5376_v16, 16  ;;  %v2220_v28 = vshrl.u32 %v5376_v16, 16  ;;  %v1497_v32 = vunpack.c.l.b16 %v1388_v17  ;;  %v655_v6 = vrot.slane %v654_v53, 4  ;;  %v5378_v16 = vld [vmem:[%s5954_s7 + $0x24] sm:$0xf] }
  0x27   : > { %v2209_v41 = vrot.slane %v2207_v25, 4  ;;  %v2212_v42 = vrot.slane %v2210_v26, 5  ;;  %v1392_v15 = vsel %vm6015_vm7, %v5227_v2, %v1391_v52  ;;  %v5379_v17 = vld [vmem:[%s5954_s7 + $0x28] sm:$0xf]  ;;  %v570_v26 = vld [vmem:[%s5954_s7 + $0x20] sm:$0x1] }
  0x28   : > { %v2218_v43 = vrot.slane %v2216_v27, 5  ;;  %v2222_v44 = vrot.slane %v2220_v28, 4  ;;  %v1528_v50 = vpack.c.b16 %v1497_v32, %v1496_v31  ;;  %v2231_v27 = vshrl.u32 %v5378_v16, 16  ;;  %v5381_v2 = vld [vmem:[%s5954_s7 + $0x30] sm:$0xf] }
  0x29   : > { %v2213_v56 = vor.u32 %v2212_v42, %v2209_v41  ;;  %v2234_v28 = vshll.u32 %v5378_v16, 16  ;;  %v2240_v29 = vshll.u32 %v5379_v17, 16  ;;  %v2244_v30 = vshrl.u32 %v5379_v17, 16 }
  0x2a   : > { %v2223_v57 = vor.u32 %v2222_v44, %v2218_v43  ;;  %v681_v39 = vshll.u32 %v570_v26, 16  ;;  %v2233_v41 = vrot.slane %v2231_v27, 4  ;;  %v1398_v52 = vrot.slane %v1290_v40, 5 }
  0x2b   : > { %v2236_v42 = vrot.slane %v2234_v28, 5  ;;  %v2246_v44 = vrot.slane %v2244_v30, 4 }
  0x34   : > { %5199 = vmatmul.msk.bf16.gmra.mxu1 %vm388_vm1, %v5786_v18  ;;  %5203 = vmatmul.msk.bf16.gmra.mxu2 %vm388_vm1, %v5790_v19  ;;  %v2190_v18 = vrot.slane %v2189_v7, 4  ;;  %v2200_v19 = vrot.slane %v2199_v8, 4  ;;  %v2214_v7 = vrot.slane %v2213_v56, 4  ;;  %v2224_v8 = vrot.slane %v2223_v57, 4 }
  0x35   : > { %5207 = vmatmul.msk.bf16.gmra.mxu3 %vm388_vm1, %v5794_v20  ;;  %5195 = vmatmul.msk.bf16.gmra.mxu0 %vm388_vm1, %v5782_v21  ;;  %v2204_v20 = vrot.slane %v2202_v9, 5  ;;  %v638_v21 = vshrl.u32 %v565_v10, 16  ;;  %v2228_v9 = vrot.slane %v2226_v58, 5  ;;  %v2237_v56 = vor.u32 %v2236_v42, %v2233_v41 }
  0x36   : > { %v2195_v33 = vsel %vm6011_vm6, %v2190_v18, %v2194_v55  ;;  %v1288_v55 = vld [vmem:[%s5954_s7 + $0x14] sm:$0x1]  ;;  %v660_v18 = vsel %vm6011_vm6, %v655_v6, %v659_v61 }
  0x37   : > { %v2205_v34 = vsel %vm6011_vm6, %v2200_v19, %v2204_v20  ;;  %v640_v36 = vrot.slane %v638_v21, 4  ;;  %v2568_v45 = vunpack.c.l.b16 %v2195_v33  ;;  %v1394_v4 = vrot.slane %v1288_v55, 5  ;;  %v1291_v55 = vld [vmem:[%s5954_s7 + $0x20] sm:$0x1] }
  0x38   : > { %v2569_v46 = vunpack.c.l.b16 %v2205_v34  ;;  %v2219_v20 = vsel %vm6011_vm6, %v2214_v7, %v2218_v43  ;;  %v2229_v21 = vsel %vm6011_vm6, %v2224_v8, %v2228_v9  ;;  %v1002_v32 = vunpack.c.l.b16 %v660_v18  ;;  %v5382_v8 = vld [vmem:[%s5954_s7 + $0x34] sm:$0xf] }
  0x39   : > { %v644_v51 = vor.u32 %v643_v37, %v640_v36  ;;  %v1395_v19 = vsel %vm6015_vm7, %v1393_v3, %v1394_v4  ;;  %v1498_v33 = vunpack.c.l.b16 %v1392_v15  ;;  %v2570_v35 = vunpack.c.l.b16 %v2219_v20 }
  0x3a   : > { %v1499_v34 = vunpack.c.l.b16 %v1395_v19  ;;  %v2571_v36 = vunpack.c.l.b16 %v2229_v21  ;;  %v2242_v43 = vrot.slane %v2240_v29, 5  ;;  %v2238_v4 = vrot.slane %v2237_v56, 4  ;;  %v573_v29 = vld [vmem:[%s5954_s7 + $0x2c] sm:$0x1] }
  0x3b   : > { %v645_v1 = vrot.slane %v644_v51, 4  ;;  %v683_v51 = vrot.slane %v681_v39, 5  ;;  %v2264_v17 = vshll.u32 %v5382_v8, 16  ;;  %v2268_v18 = vshrl.u32 %v5382_v8, 16 }
  0x3c   : > { %v1529_v47 = vpack.c.b16 %v1499_v34, %v1498_v33  ;;  %v2247_v57 = vor.u32 %v2246_v44, %v2242_v43  ;;  %v2243_v21 = vsel %vm6011_vm6, %v2238_v4, %v2242_v43  ;;  %v1293_v34 = vld [vmem:[%s5954_s7 + $0x28] sm:$0xf]  ;;  %v705_v40 = vshll.u32 %v573_v29, 16  ;;  %v5385_v4 = vld [vmem:[%s5954_s7 + $0x40] sm:$0xf] }
  0x3d   : > { %v650_v14 = vsel %vm6011_vm6, %v645_v1, %v649_v38  ;;  %v1401_v1 = vrot.slane %v1291_v55, 5  ;;  %v1405_v43 = vrot.slane %v1293_v34, 5  ;;  %v1295_v29 = vld [vmem:[%s5954_s7 + $0x30] sm:$0xe] }
  0x3e   : > { %v1001_v31 = vunpack.c.l.b16 %v650_v14  ;;  %v2248_v6 = vrot.slane %v2247_v57, 4  ;;  %v2258_v14 = vshll.u32 %v5381_v2, 16 }
  0x3f   : > { %v1407_v56 = vrot.slane %v1405_v43, 4 }
  0x44   : > { %5200 = vmatmul.msk.bf16.gmra.mxu1 %vm388_vm1, %v5787_v59  ;;  %5204 = vmatmul.msk.bf16.gmra.mxu2 %vm388_vm1, %v5791_v60  ;;  %v5796_v59 = vld [vmem:[%s5954_s7 + $0xc] sm:$0xff]  ;;  %v2600_v60 = vpack.c.b16 %v2569_v46, %v2568_v45  ;;  %v1032_v46 = vpack.c.b16 %v1002_v32, %v1001_v31  ;;  %v2260_v31 = vrot.slane %v2258_v14, 5  ;;  %v2572_v32 = vunpack.c.l.b16 %v2243_v21 }
  0x45   : > { %5208 = vmatmul.msk.bf16.gmra.mxu3 %vm388_vm1, %v5795_v62  ;;  %5196 = vmatmul.msk.bf16.gmra.mxu0 %vm388_vm1, %v5783_v63  ;;  %v568_v62 = vld [vmem:[%s5954_s7 + $0x18] sm:$0xf]  ;;  %v569_v63 = vld [vmem:[%s5954_s7 + $0x1c] sm:$0xf]  ;;  %v5380_v45 = vld [vmem:[%s5954_s7 + $0x2c] sm:$0x1] }
  0x46   : > { %v662_v10 = vshrl.u32 %v568_v62, 16  ;;  %v665_v11 = vshll.u32 %v568_v62, 16  ;;  %v671_v12 = vshll.u32 %v569_v63, 16  ;;  %v675_v13 = vshrl.u32 %v569_v63, 16 }
  0x47   : > { %v2250_v58 = vshll.u32 %v5380_v45, 16  ;;  %v5228_v62 = vrot.slane %v1289_v54, 9  ;;  %v1400_v63 = vrot.slane %v1398_v52, 4  ;;  %v5798_v45 = vld [vmem:[%s5954_s7 + $0x24] sm:$0xff]  ;;  %v707_v54 = vrot.slane %v705_v40, 5 }
  0x48   : > { %v664_v22 = vrot.slane %v662_v10, 4  ;;  %v667_v23 = vrot.slane %v665_v11, 5  ;;  %v673_v24 = vrot.slane %v671_v12, 5  ;;  %v677_v25 = vrot.slane %v675_v13, 4  ;;  %v1297_v40 = vld [vmem:[%s5954_s7 + $0x38] sm:$0x1] }
  0x49   : > { %v2252_v7 = vrot.slane %v2250_v58, 5  ;;  %v2255_v13 = vshrl.u32 %v5381_v2, 16  ;;  %v1399_v15 = vsel %vm6015_vm7, %v5228_v62, %v1398_v52  ;;  %v1402_v16 = vsel %vm6015_vm7, %v1400_v63, %v1401_v1 }
  0x4a   : > { %v668_v37 = vor.u32 %v667_v23, %v664_v22  ;;  %v678_v38 = vor.u32 %v677_v25, %v673_v24  ;;  %v1500_v27 = vunpack.c.l.b16 %v1399_v15  ;;  %v1501_v28 = vunpack.c.l.b16 %v1402_v16 }
  0x4b   : > { %v2253_v22 = vsel %vm6011_vm6, %v2248_v6, %v2252_v7  ;;  %v2257_v30 = vrot.slane %v2255_v13, 4  ;;  %v2288_v16 = vshll.u32 %v5385_v4, 16 }
  0x4c   : > { %v679_v53 = vrot.slane %v678_v38, 4  ;;  %v2573_v33 = vunpack.c.l.b16 %v2253_v22  ;;  %v1530_v42 = vpack.c.b16 %v1501_v28, %v1500_v27 }
  0x4d   : > { %v2261_v44 = vor.u32 %v2260_v31, %v2257_v30  ;;  %v5386_v30 = vld [vmem:[%s5954_s7 + $0x44] sm:$0x1] }
  0x4e   : > { %v684_v3 = vsel %vm6011_vm6, %v679_v53, %v683_v51  ;;  %v574_v51 = vld [vmem:[%s5954_s7 + $0x30] sm:$0xf] }
  0x4f   : > { %v1004_v20 = vunpack.c.l.b16 %v684_v3  ;;  %v2262_v58 = vrot.slane %v2261_v44, 4  ;;  %v710_v62 = vshrl.u32 %v574_v51, 16  ;;  %v713_v63 = vshll.u32 %v574_v51, 16  ;;  %v5384_v3 = vld [vmem:[%s5954_s7 + $0x3c] sm:$0xf] }
  0x50   : > { %v2279_v14 = vshrl.u32 %v5384_v3, 16  ;;  %v2282_v15 = vshll.u32 %v5384_v3, 16  ;;  %v5230_v44 = vrot.slane %v1295_v29, 9  ;;  %v1415_v51 = vrot.slane %v1297_v40, 5  ;;  %v5800_v40 = vld [vmem:[%s5954_s7 + $0x3c] sm:$0xff] }
  0x51   : > { %v715_v13 = vrot.slane %v713_v63, 5 }
  0x52   : > { %v2281_v31 = vrot.slane %v2279_v14, 4 }
  0x54   : > { %5210 = vmatmul.msk.bf16.vlgmr.msrb.gmra.mxu1 %vm388_vm1, %v1031_v49  ;;  %5243 = vmatmul.msk.bf16.vlgmr.msrb.gmra.mxu2 %vm388_vm1, %v1528_v50  ;;  %v2601_v49 = vpack.c.b16 %v2571_v36, %v2570_v35  ;;  %v669_v50 = vrot.slane %v668_v37, 4  ;;  %v2266_v35 = vrot.slane %v2264_v17, 5  ;;  %v2270_v36 = vrot.slane %v2268_v18, 4  ;;  %v5383_v37 = vld [vmem:[%s5954_s7 + $0x38] sm:$0x1] }
  0x55   : > { %5356 = vmatmul.msk.bf16.vlgmr.msrb.gmra.mxu3 %vm388_vm1, %v5796_v59  ;;  %5421 = vmatmul.msk.bf16.vlgmr.msrb.gmra.mxu0 %vm388_vm1, %v2600_v60  ;;  %v571_v59 = vld [vmem:[%s5954_s7 + $0x24] sm:$0xf]  ;;  %v572_v60 = vld [vmem:[%s5954_s7 + $0x28] sm:$0xf]  ;;  %v2292_v17 = vshrl.u32 %v5385_v4, 16 }
  0x56   : > { %v674_v61 = vsel %vm6011_vm6, %v669_v50, %v673_v24  ;;  %v686_v9 = vshrl.u32 %v571_v59, 16  ;;  %v689_v10 = vshll.u32 %v571_v59, 16  ;;  %v695_v11 = vshll.u32 %v572_v60, 16  ;;  %v575_v59 = vld [vmem:[%s5954_s7 + $0x34] sm:$0xf] }
  0x57   : > { %v699_v12 = vshrl.u32 %v572_v60, 16  ;;  %v1003_v19 = vunpack.c.l.b16 %v674_v61  ;;  %v2274_v50 = vshll.u32 %v5383_v37, 16  ;;  %v719_v1 = vshll.u32 %v575_v59, 16 }
  0x58   : > { %v688_v23 = vrot.slane %v686_v9, 4  ;;  %v691_v24 = vrot.slane %v689_v10, 5  ;;  %v697_v25 = vrot.slane %v695_v11, 5  ;;  %v723_v2 = vshrl.u32 %v575_v59, 16 }
  0x59   : > { %v701_v26 = vrot.slane %v699_v12, 4  ;;  %v1033_v41 = vpack.c.b16 %v1004_v20, %v1003_v19  ;;  %v2276_v61 = vrot.slane %v2274_v50, 5  ;;  %v2267_v10 = vsel %vm6011_vm6, %v2262_v58, %v2266_v35  ;;  %v5388_v58 = vld [vmem:[%s5954_s7 + $0x4c] sm:$0xf] }
  0x5a   : > { %v692_v38 = vor.u32 %v691_v24, %v688_v23  ;;  %v712_v12 = vrot.slane %v710_v62, 4  ;;  %v721_v18 = vrot.slane %v719_v1, 5  ;;  %v725_v19 = vrot.slane %v723_v2, 4  ;;  %v576_v24 = vld [vmem:[%s5954_s7 + $0x38] sm:$0x1] }
  0x5b   : > { %v702_v39 = vor.u32 %v701_v26, %v697_v25  ;;  %v2574_v26 = vunpack.c.l.b16 %v2267_v10  ;;  %v2294_v34 = vrot.slane %v2292_v17, 4  ;;  %v579_v17 = vld [vmem:[%s5954_s7 + $0x44] sm:$0x1] }
  0x5c   : > { %v693_v52 = vrot.slane %v692_v38, 4  ;;  %v716_v28 = vor.u32 %v715_v13, %v712_v12 }
  0x5d   : > { %v703_v53 = vrot.slane %v702_v39, 4 }
  0x5e   : > { %v698_v6 = vsel %vm6011_vm6, %v693_v52, %v697_v25  ;;  %v1296_v25 = vld [vmem:[%s5954_s7 + $0x34] sm:$0xf]  ;;  %v577_v52 = vld [vmem:[%s5954_s7 + $0x3c] sm:$0xf] }
  0x5f   : > { %v708_v7 = vsel %vm6011_vm6, %v703_v53, %v707_v54  ;;  %v1005_v20 = vunpack.c.l.b16 %v698_v6  ;;  %v1412_v37 = vrot.slane %v1296_v25, 5  ;;  %v578_v53 = vld [vmem:[%s5954_s7 + $0x40] sm:$0xf]  ;;  %v737_v62 = vshll.u32 %v577_v52, 16 }
  0x60   : > { %v1006_v21 = vunpack.c.l.b16 %v708_v7  ;;  %v743_v2 = vshll.u32 %v578_v53, 16  ;;  %v747_v3 = vshrl.u32 %v578_v53, 16  ;;  %v2312_v7 = vshll.u32 %v5388_v58, 16  ;;  %v581_v53 = vld [vmem:[%s5954_s7 + $0x4c] sm:$0xf] }
  0x61   : > { %v1414_v50 = vrot.slane %v1412_v37, 4  ;;  %v739_v14 = vrot.slane %v737_v62, 5 }
  0x62   : > { %v1034_v38 = vpack.c.b16 %v1006_v21, %v1005_v20  ;;  %v1299_v20 = vld [vmem:[%s5954_s7 + $0x40] sm:$0xf] }
  0x63   : > { %v1416_v1 = vsel %vm6015_vm7, %v1414_v50, %v1415_v51 }
  0x64   : > { %5211 = vmatmul.msk.bf16.gmra.mxu1 %vm388_vm1, %v1032_v46  ;;  %5244 = vmatmul.msk.bf16.gmra.mxu2 %vm388_vm1, %v1529_v47  ;;  %v2602_v46 = vpack.c.b16 %v2573_v33, %v2572_v32  ;;  %v1292_v47 = vld [vmem:[%s5954_s7 + $0x24] sm:$0xe]  ;;  %v2284_v32 = vrot.slane %v2282_v15, 5  ;;  %v2290_v33 = vrot.slane %v2288_v16, 5  ;;  %v1505_v16 = vunpack.c.l.b16 %v1416_v1 }
  0x65   : > { %5357 = vmatmul.msk.bf16.gmra.mxu3 %vm388_vm1, %v5797_v48  ;;  %5422 = vmatmul.msk.bf16.gmra.mxu0 %vm388_vm1, %v2601_v49  ;;  %v1294_v48 = vld [vmem:[%s5954_s7 + $0x2c] sm:$0x1]  ;;  %v2271_v49 = vor.u32 %v2270_v36, %v2266_v35  ;;  %v5229_v55 = vrot.slane %v1292_v47, 9  ;;  %v726_v35 = vor.u32 %v725_v19, %v721_v18  ;;  %v729_v36 = vshll.u32 %v576_v24, 16 }
  0x66   : > { %v1408_v57 = vrot.slane %v1294_v48, 5  ;;  %v2295_v47 = vor.u32 %v2294_v34, %v2290_v33  ;;  %v749_v19 = vrot.slane %v747_v3, 4  ;;  %v767_v3 = vshll.u32 %v581_v53, 16 }
  0x67   : > { %v2272_v60 = vrot.slane %v2271_v49, 4  ;;  %v1406_v8 = vsel %vm6015_vm7, %v5229_v55, %v1405_v43  ;;  %v717_v43 = vrot.slane %v716_v28, 4  ;;  %v727_v48 = vrot.slane %v726_v35, 4  ;;  %v1300_v35 = vld [vmem:[%s5954_s7 + $0x44] sm:$0x1] }
  0x68   : > { %v1409_v9 = vsel %vm6015_vm7, %v1407_v56, %v1408_v57  ;;  %v1502_v22 = vunpack.c.l.b16 %v1406_v8  ;;  %v731_v49 = vrot.slane %v729_v36, 5  ;;  %v1413_v55 = vsel %vm6015_vm7, %v5230_v44, %v1412_v37  ;;  %v5387_v57 = vld [vmem:[%s5954_s7 + $0x48] sm:$0xf] }
  0x69   : > { %v2277_v11 = vsel %vm6011_vm6, %v2272_v60, %v2276_v61  ;;  %v1503_v23 = vunpack.c.l.b16 %v1409_v9  ;;  %v722_v54 = vsel %vm6011_vm6, %v717_v43, %v721_v18  ;;  %v2296_v60 = vrot.slane %v2295_v47, 4 }
  0x6a   : > { %v2575_v27 = vunpack.c.l.b16 %v2277_v11  ;;  %v734_v61 = vshrl.u32 %v577_v52, 16  ;;  %v732_v63 = vsel %vm6011_vm6, %v727_v48, %v731_v49  ;;  %v2303_v4 = vshrl.u32 %v5387_v57, 16  ;;  %v580_v52 = vld [vmem:[%s5954_s7 + $0x48] sm:$0xf] }
  0x6b   : > { %v1531_v39 = vpack.c.b16 %v1503_v23, %v1502_v22  ;;  %v2306_v6 = vshll.u32 %v5387_v57, 16  ;;  %v2316_v8 = vshrl.u32 %v5388_v58, 16  ;;  %v1007_v9 = vunpack.c.l.b16 %v722_v54  ;;  %v5391_v57 = vld [vmem:[%s5954_s7 + $0x58] sm:$0xf] }
  0x6c   : > { %v1504_v10 = vunpack.c.l.b16 %v1413_v55  ;;  %v736_v13 = vrot.slane %v734_v61, 4  ;;  %v1008_v15 = vunpack.c.l.b16 %v732_v63  ;;  %v745_v18 = vrot.slane %v743_v2, 5 }
  0x6d   : > { %v2305_v21 = vrot.slane %v2303_v4, 4  ;;  %v2308_v22 = vrot.slane %v2306_v6, 5  ;;  %v2314_v23 = vrot.slane %v2312_v7, 5  ;;  %v2318_v24 = vrot.slane %v2316_v8, 4 }
  0x6e   : > { %v740_v28 = vor.u32 %v739_v14, %v736_v13  ;;  %v1035_v29 = vpack.c.b16 %v1008_v15, %v1007_v9  ;;  %v1532_v34 = vpack.c.b16 %v1505_v16, %v1504_v10  ;;  %v1422_v48 = vrot.slane %v1300_v35, 5 }
  0x6f   : > { %v2309_v36 = vor.u32 %v2308_v22, %v2305_v21  ;;  %v2319_v37 = vor.u32 %v2318_v24, %v2314_v23  ;;  %v758_v61 = vshrl.u32 %v580_v52, 16  ;;  %v761_v62 = vshll.u32 %v580_v52, 16  ;;  %v5392_v24 = vld [vmem:[%s5954_s7 + $0x5c] sm:$0x1] }
  0x70   : > { %v741_v43 = vrot.slane %v740_v28, 4  ;;  %v771_v4 = vshrl.u32 %v581_v53, 16  ;;  %v2336_v9 = vshll.u32 %v5391_v57, 16  ;;  %v2340_v10 = vshrl.u32 %v5391_v57, 16 }
  0x71   : > { %v2310_v49 = vrot.slane %v2309_v36, 4  ;;  %v2320_v50 = vrot.slane %v2319_v37, 4  ;;  %v760_v16 = vrot.slane %v758_v61, 4  ;;  %v6182_v21 = vrot.slane %v767_v3, 5  ;;  %v1301_v36 = vld [vmem:[%s5954_s7 + $0x48] sm:$0xe] }
  0x72   : > { %v746_v54 = vsel %vm6011_vm6, %v741_v43, %v745_v18  ;;  %v773_v22 = vrot.slane %v771_v4, 4  ;;  %v2342_v28 = vrot.slane %v2340_v10, 4  ;;  %v5393_v3 = vld [vmem:[%s5954_s7 + $0x60] sm:$0xf]  ;;  %v5394_v4 = vld [vmem:[%s5954_s7 + $0x64] sm:$0xf] }
  0x73   : > { %v2315_v1 = vsel %vm6011_vm6, %v2310_v49, %v2314_v23  ;;  %v1302_v23 = vld [vmem:[%s5954_s7 + $0x4c] sm:$0xf] }
  0x74   : > { %5212 = vmatmul.msk.bf16.gmra.mxu1 %vm388_vm1, %v1033_v41  ;;  %5245 = vmatmul.msk.bf16.gmra.mxu2 %vm388_vm1, %v1530_v42  ;;  %v5799_v41 = vld [vmem:[%s5954_s7 + $0x30] sm:$0xff]  ;;  %v2603_v42 = vpack.c.b16 %v2575_v27, %v2574_v26  ;;  %v774_v35 = vor.u32 %v773_v22, %v6182_v21  ;;  %v1426_v37 = vrot.slane %v1302_v23, 5  ;;  %v2364_v22 = vshrl.u32 %v5394_v4, 16 }
  0x75   : > { %5358 = vmatmul.msk.bf16.gmra.mxu3 %vm388_vm1, %v5798_v45  ;;  %5423 = vmatmul.msk.bf16.gmra.mxu0 %vm388_vm1, %v2602_v46  ;;  %v2298_v45 = vshll.u32 %v5386_v30, 16  ;;  %v2285_v46 = vor.u32 %v2284_v32, %v2281_v31  ;;  %v5389_v27 = vld [vmem:[%s5954_s7 + $0x50] sm:$0x1]  ;;  %v750_v30 = vor.u32 %v749_v19, %v745_v18  ;;  %v753_v31 = vshll.u32 %v579_v17, 16  ;;  %v1298_v32 = vld [vmem:[%s5954_s7 + $0x3c] sm:$0xe] }
  0x76   : > { %v5231_v44 = vrot.slane %v1298_v32, 9  ;;  %v763_v17 = vrot.slane %v761_v62, 5  ;;  %v2578_v18 = vunpack.c.l.b16 %v2315_v1  ;;  %v775_v52 = vrot.slane %v774_v35, 4 }
  0x77   : > { %v2300_v56 = vrot.slane %v2298_v45, 5  ;;  %v2286_v59 = vrot.slane %v2285_v46, 4  ;;  %v751_v45 = vrot.slane %v750_v30, 4  ;;  %v755_v46 = vrot.slane %v753_v31, 5 }
  0x78   : > { %v764_v31 = vor.u32 %v763_v17, %v760_v16  ;;  %v1428_v53 = vrot.slane %v1426_v37, 4 }
  0x79   : > { %v2291_v11 = vsel %vm6011_vm6, %v2286_v59, %v2290_v33  ;;  %v2301_v12 = vsel %vm6011_vm6, %v2296_v60, %v2300_v56  ;;  %v1419_v33 = vrot.slane %v1299_v20, 5  ;;  %v5390_v56 = vld [vmem:[%s5954_s7 + $0x54] sm:$0xf]  ;;  %v756_v59 = vsel %vm6011_vm6, %v751_v45, %v755_v46  ;;  %v582_v20 = vld [vmem:[%s5954_s7 + $0x50] sm:$0x1] }
  0x7a   : > { %v2576_v25 = vunpack.c.l.b16 %v2291_v11  ;;  %v2577_v26 = vunpack.c.l.b16 %v2301_v12  ;;  %v2327_v7 = vshrl.u32 %v5390_v56, 16  ;;  %v2330_v8 = vshll.u32 %v5390_v56, 16  ;;  %v584_v56 = vld [vmem:[%s5954_s7 + $0x58] sm:$0xf] }
  0x7b   : > { %v1421_v47 = vrot.slane %v1419_v33, 4  ;;  %v1420_v55 = vsel %vm6015_vm7, %v5231_v44, %v1419_v33  ;;  %v1009_v12 = vunpack.c.l.b16 %v746_v54  ;;  %v1010_v14 = vunpack.c.l.b16 %v756_v59  ;;  %v1303_v44 = vld [vmem:[%s5954_s7 + $0x50] sm:$0x1] }
  0x7c   : > { %v1506_v13 = vunpack.c.l.b16 %v1420_v55  ;;  %v777_v32 = vshll.u32 %v582_v20, 16  ;;  %v765_v49 = vrot.slane %v764_v31, 4  ;;  %v1429_v54 = vrot.slane %v1303_v44, 5  ;;  %v1305_v31 = vld [vmem:[%s5954_s7 + $0x58] sm:$0xf] }
  0x7d   : > { %v1423_v60 = vsel %vm6015_vm7, %v1421_v47, %v1422_v48  ;;  %v1036_v30 = vpack.c.b16 %v1010_v14, %v1009_v12  ;;  %v583_v48 = vld [vmem:[%s5954_s7 + $0x54] sm:$0xf]  ;;  %v791_v1 = vshll.u32 %v584_v56, 16  ;;  %v2354_v20 = vshll.u32 %v5393_v3, 16 }
  0x7e   : > { %v1507_v15 = vunpack.c.l.b16 %v1423_v60  ;;  %v782_v60 = vshrl.u32 %v583_v48, 16  ;;  %v785_v61 = vshll.u32 %v583_v48, 16  ;;  %v1430_v12 = vsel %vm6015_vm7, %v1428_v53, %v1429_v54  ;;  %v1306_v53 = vld [vmem:[%s5954_s7 + $0x5c] sm:$0x1] }
  0x7f   : > { %v6231_v23 = vrot.slane %v791_v1, 5  ;;  %v2366_v44 = vrot.slane %v2364_v22, 4 }
  0x80   : > { %v784_v16 = vrot.slane %v782_v60, 4  ;;  %v787_v17 = vrot.slane %v785_v61, 5 }
  0x82   : > { %v788_v35 = vor.u32 %v787_v17, %v784_v16  ;;  %v5396_v17 = vld [vmem:[%s5954_s7 + $0x6c] sm:$0xf] }
  0x84   : > { %5213 = vmatmul.msk.bf16.gmra.mxu1 %vm388_vm1, %v1034_v38  ;;  %5246 = vmatmul.msk.bf16.gmra.mxu2 %vm388_vm1, %v1531_v39  ;;  %v2322_v38 = vshll.u32 %v5389_v27, 16  ;;  %v6186_v27 = vrot.slane %v2336_v9, 5 }
  0x85   : > { %5359 = vmatmul.msk.bf16.gmra.mxu3 %vm388_vm1, %v5799_v41  ;;  %5424 = vmatmul.msk.bf16.gmra.mxu0 %vm388_vm1, %v2603_v42  ;;  %v2604_v41 = vpack.c.b16 %v2577_v26, %v2576_v25  ;;  %v2329_v25 = vrot.slane %v2327_v7, 4  ;;  %v2332_v26 = vrot.slane %v2330_v8, 5  ;;  %v770_v8 = vsel %vm6011_vm6, %v765_v49, %v6182_v21 }
  0x86   : > { %v2324_v51 = vrot.slane %v2322_v38, 5  ;;  %v2346_v38 = vshll.u32 %v5392_v24, 16  ;;  %v2343_v46 = vor.u32 %v2342_v28, %v6186_v27  ;;  %v2360_v21 = vshll.u32 %v5394_v4, 16 }
  0x87   : > { %v2333_v45 = vor.u32 %v2332_v26, %v2329_v25  ;;  %v1011_v25 = vunpack.c.l.b16 %v770_v8  ;;  %v1509_v28 = vunpack.c.l.b16 %v1430_v12  ;;  %v1433_v49 = vrot.slane %v1305_v31, 5  ;;  %v587_v12 = vld [vmem:[%s5954_s7 + $0x64] sm:$0xf] }
  0x88   : > { %v2325_v2 = vsel %vm6011_vm6, %v2320_v50, %v2324_v51  ;;  %v779_v50 = vrot.slane %v777_v32, 5  ;;  %v5232_v51 = vrot.slane %v1301_v36, 9  ;;  %v2348_v55 = vrot.slane %v2346_v38, 5  ;;  %v1304_v36 = vld [vmem:[%s5954_s7 + $0x54] sm:$0xe] }
  0x89   : > { %v2579_v19 = vunpack.c.l.b16 %v2325_v2  ;;  %v2334_v57 = vrot.slane %v2333_v45, 4  ;;  %v2344_v59 = vrot.slane %v2343_v46, 4  ;;  %v795_v2 = vshrl.u32 %v584_v56, 16 }
  0x8a   : > { %v780_v9 = vsel %vm6011_vm6, %v775_v52, %v779_v50  ;;  %v1427_v10 = vsel %vm6015_vm7, %v5232_v51, %v1426_v37  ;;  %v5395_v37 = vld [vmem:[%s5954_s7 + $0x68] sm:$0x1]  ;;  %v1435_v8 = vrot.slane %v1433_v49, 4  ;;  %v2375_v31 = vshrl.u32 %v5396_v17, 16 }
  0x8b   : > { %v2605_v43 = vpack.c.b16 %v2579_v19, %v2578_v18  ;;  %v2339_v14 = vsel %vm6011_vm6, %v2334_v57, %v6186_v27  ;;  %v2351_v19 = vshrl.u32 %v5393_v3, 16  ;;  %v797_v24 = vrot.slane %v795_v2, 4 }
  0x8c   : > { %v1012_v26 = vunpack.c.l.b16 %v780_v9  ;;  %v1508_v27 = vunpack.c.l.b16 %v1427_v10  ;;  %v2580_v32 = vunpack.c.l.b16 %v2339_v14  ;;  %v789_v57 = vrot.slane %v788_v35, 4  ;;  %v586_v10 = vld [vmem:[%s5954_s7 + $0x60] sm:$0xf] }
  0x8d   : > { %v2353_v38 = vrot.slane %v2351_v19, 4  ;;  %v798_v46 = vor.u32 %v797_v24, %v6231_v23  ;;  %v2370_v60 = vshll.u32 %v5395_v37, 16  ;;  %v1436_v9 = vrot.slane %v1306_v53, 5  ;;  %v5397_v19 = vld [vmem:[%s5954_s7 + $0x70] sm:$0xf] }
  0x8e   : > { %v1037_v51 = vpack.c.b16 %v1012_v26, %v1011_v25  ;;  %v1534_v52 = vpack.c.b16 %v1509_v28, %v1508_v27  ;;  %v794_v14 = vsel %vm6011_vm6, %v789_v57, %v6231_v23  ;;  %v806_v22 = vshrl.u32 %v586_v10, 16  ;;  %v588_v53 = vld [vmem:[%s5954_s7 + $0x68] sm:$0x1]  ;;  %v1308_v57 = vld [vmem:[%s5954_s7 + $0x64] sm:$0xf] }
  0x8f   : > { %v799_v3 = vrot.slane %v798_v46, 4  ;;  %v2372_v16 = vrot.slane %v2370_v60, 5  ;;  %v809_v24 = vshll.u32 %v586_v10, 16  ;;  %v1437_v27 = vsel %vm6015_vm7, %v1435_v8, %v1436_v9 }
  0x90   : > { %v815_v28 = vshll.u32 %v587_v12, 16  ;;  %v819_v23 = vshrl.u32 %v587_v12, 16  ;;  %v2388_v35 = vshrl.u32 %v5397_v19, 16  ;;  %v1013_v37 = vunpack.c.l.b16 %v794_v14 }
  0x91   : > { %v6148_v39 = vpop.f32.mrf.mxu1  ;;  %v825_v14 = vshll.u32 %v588_v53, 16 }
  0x92   : > { %v6151_v42 = vpop.f32.mrf.mxu0 }
  0x94   : > { %5214 = vmatmul.msk.bf16.gmra.mxu1 %vm388_vm1, %v1035_v29  ;;  %5247 = vmatmul.msk.bf16.gmra.mxu2 %vm388_vm1, %v1532_v34  ;;  %v1533_v34 = vpack.c.b16 %v1507_v15, %v1506_v13  ;;  %v2349_v15 = vsel %vm6011_vm6, %v2344_v59, %v2348_v55  ;;  %v5802_v55 = vld [vmem:[%s5954_s7 + $0x54] sm:$0xff]  ;;  %v5233_v59 = vrot.slane %v1304_v36, 9 }
  0x95   : > { %5360 = vmatmul.msk.bf16.gmra.mxu3 %vm388_vm1, %v5800_v40  ;;  %5425 = vmatmul.msk.bf16.gmra.mxu0 %vm388_vm1, %v2604_v41  ;;  %v5801_v41 = vld [vmem:[%s5954_s7 + $0x48] sm:$0xff] }
  0x97   : > { %v6165_v58 = vpop.f32.mrf.mxu2 }
  0x98   : > { %v6171_v63 = vpop.f32.mrf.mxu3 }
  0x99   : > { %v6177_v6 = vpop.f32.mrf.mxu1 }
  0x9a   : > { %v6179_v11 = vpop.f32.mrf.mxu0 }
  0x9f   : > { %v6188_v29 = vpop.f32.mrf.mxu2 }
  0xa0   : > { %v6190_v33 = vpop.f32.mrf.mxu3 }
  0xa1   : > { %7328 = vst [vmem:[#allocation4_spill] sm:$0xff] %v6190_v33  ;;  %v6194_v40 = vpop.f32.mrf.mxu1 }
  0xa2   : > { %v6199_v47 = vpop.f32.mrf.mxu0 }
  0xa4   : > { %5215 = vmatmul.msk.bf16.gmra.mxu1 %vm388_vm1, %v1036_v30  ;;  %5248 = vmatmul.msk.bf16.gmra.mxu2 %vm388_vm1, %v1533_v34  ;;  %v585_v30 = vld [vmem:[%s5954_s7 + $0x5c] sm:$0x1]  ;;  %v2581_v34 = vunpack.c.l.b16 %v2349_v15  ;;  %v1434_v15 = vsel %vm6015_vm7, %v5233_v59, %v1433_v49  ;;  %v811_v49 = vrot.slane %v809_v24, 5  ;;  %v2377_v59 = vrot.slane %v2375_v31, 4 }
  0xa5   : > { %5361 = vmatmul.msk.bf16.gmra.mxu3 %vm388_vm1, %v5801_v41  ;;  %5426 = vmatmul.msk.bf16.gmra.mxu0 %vm388_vm1, %v2605_v43  ;;  %v2356_v41 = vrot.slane %v2354_v20, 5  ;;  %v6237_v43 = vrot.slane %v2360_v21, 5  ;;  %v801_v48 = vshll.u32 %v585_v30, 16 }
  0xa6   : > { %v2606_v56 = vpack.c.b16 %v2581_v34, %v2580_v32  ;;  %v2378_v32 = vshll.u32 %v5396_v17, 16  ;;  %v2384_v34 = vshll.u32 %v5397_v19, 16  ;;  %v1307_v19 = vld [vmem:[%s5954_s7 + $0x60] sm:$0xe] }
  0xa7   : > { %v6207_v62 = vpop.f32.mrf.mxu2  ;;  %v2357_v1 = vor.u32 %v2356_v41, %v2353_v38  ;;  %v2367_v2 = vor.u32 %v2366_v44, %v6237_v43  ;;  %v803_v4 = vrot.slane %v801_v48, 5  ;;  %v1510_v38 = vunpack.c.l.b16 %v1434_v15 }
  0xa8   : > { %v6211_v7 = vpop.f32.mrf.mxu3  ;;  %v808_v48 = vrot.slane %v806_v22, 4  ;;  %v2380_v60 = vrot.slane %v2378_v32, 5  ;;  %v1440_v15 = vrot.slane %v1308_v57, 5  ;;  %v5400_v57 = vld [vmem:[%s5954_s7 + $0x7c] sm:$0xf] }
  0xa9   : > { %7329 = vst [vmem:[#allocation5_spill] sm:$0xff] %v6211_v7  ;;  %v6222_v13 = vpop.f32.mrf.mxu1  ;;  %v2358_v20 = vrot.slane %v2357_v1, 4  ;;  %v2368_v21 = vrot.slane %v2367_v2, 4  ;;  %v804_v26 = vsel %vm6011_vm6, %v799_v3, %v803_v4  ;;  %v6285_v1 = vrot.slane %v2384_v34, 5  ;;  %v5398_v4 = vld [vmem:[%s5954_s7 + $0x74] sm:$0x1] }
  0xaa   : > { %v6229_v18 = vpop.f32.mrf.mxu0  ;;  %v2390_v2 = vrot.slane %v2388_v35, 4  ;;  %v812_v8 = vor.u32 %v811_v49, %v808_v48  ;;  %v2394_v22 = vshll.u32 %v5398_v4, 16  ;;  %v827_v34 = vrot.slane %v825_v14, 5  ;;  %v595_v7 = vld [vmem:[%s5954_s7 + $0x84] sm:$0xf] }
  0xab   : > { %v2363_v44 = vsel %vm6011_vm6, %v2358_v20, %v6237_v43  ;;  %v2373_v46 = vsel %vm6011_vm6, %v2368_v21, %v2372_v16  ;;  %v2381_v20 = vor.u32 %v2380_v60, %v2377_v59  ;;  %v5234_v35 = vrot.slane %v1307_v19, 9 }
  0xac   : > { %v2582_v43 = vunpack.c.l.b16 %v2363_v44  ;;  %v2583_v3 = vunpack.c.l.b16 %v2373_v46  ;;  %v2391_v21 = vor.u32 %v2390_v2, %v6285_v1  ;;  %v813_v31 = vrot.slane %v812_v8, 4 }
  0xad   : > { %v2382_v46 = vrot.slane %v2381_v20, 4  ;;  %v2396_v49 = vrot.slane %v2394_v22, 5  ;;  %v1441_v2 = vsel %vm6015_vm7, %v5234_v35, %v1440_v15  ;;  %v2408_v19 = vshll.u32 %v5400_v57, 16 }
  0xae   : > { %v2392_v48 = vrot.slane %v2391_v21, 4  ;;  %v2412_v20 = vshrl.u32 %v5400_v57, 16 }
  0xaf   : > { %v6239_v45 = vpop.f32.mrf.mxu2 }
  0xb0   : > { %v6242_v50 = vpop.f32.mrf.mxu3 }
  0xb1   : > { %7330 = vst [vmem:[#allocation6_spill] sm:$0xff] %v6242_v50  ;;  %v6245_v54 = vpop.f32.mrf.mxu1  ;;  %v1315_v50 = vld [vmem:[%s5954_s7 + $0x80] sm:$0x1] }
  0xb2   : > { %v6248_v61 = vpop.f32.mrf.mxu0 }
  0xb4   : > { %5216 = vmatmul.msk.bf16.gmra.mxu1 %vm388_vm1, %v1037_v51  ;;  %5249 = vmatmul.msk.bf16.gmra.mxu2 %vm388_vm1, %v1534_v52  ;;  %v1014_v51 = vunpack.c.l.b16 %v804_v26  ;;  %v1511_v52 = vunpack.c.l.b16 %v1437_v27  ;;  %v5803_v26 = vld [vmem:[%s5954_s7 + $0x60] sm:$0xff]  ;;  %v2607_v27 = vpack.c.b16 %v2583_v3, %v2582_v43 }
  0xb5   : > { %5362 = vmatmul.msk.bf16.gmra.mxu3 %vm388_vm1, %v5802_v55  ;;  %5427 = vmatmul.msk.bf16.gmra.mxu0 %vm388_vm1, %v2606_v56  ;;  %v6282_v55 = vrot.slane %v815_v28, 5  ;;  %v821_v56 = vrot.slane %v819_v23, 4  ;;  %v1309_v28 = vld [vmem:[%s5954_s7 + $0x68] sm:$0x1] }
  0xb6   : > { %v1038_v10 = vpack.c.b16 %v1014_v51, %v1013_v37  ;;  %v1535_v17 = vpack.c.b16 %v1511_v52, %v1510_v38  ;;  %v1442_v37 = vrot.slane %v1440_v15, 4  ;;  %v589_v38 = vld [vmem:[%s5954_s7 + $0x6c] sm:$0xf]  ;;  %v1443_v44 = vrot.slane %v1309_v28, 5  ;;  %v590_v51 = vld [vmem:[%s5954_s7 + $0x70] sm:$0xf] }
  0xb7   : > { %v6264_v25 = vpop.f32.mrf.mxu2  ;;  %v822_v12 = vor.u32 %v821_v56, %v6282_v55  ;;  %v830_v52 = vshrl.u32 %v589_v38, 16  ;;  %v833_v53 = vshll.u32 %v589_v38, 16  ;;  %v5399_v56 = vld [vmem:[%s5954_s7 + $0x78] sm:$0xf]  ;;  %v818_v60 = vsel %vm6011_vm6, %v813_v31, %v6282_v55  ;;  %v591_v38 = vld [vmem:[%s5954_s7 + $0x74] sm:$0x1] }
  0xb8   : > { %v6270_v30 = vpop.f32.mrf.mxu3  ;;  %v839_v43 = vshll.u32 %v590_v51, 16  ;;  %v843_v3 = vshrl.u32 %v590_v51, 16  ;;  %v2397_v55 = vsel %vm6011_vm6, %v2392_v48, %v2396_v49  ;;  %v2399_v15 = vshrl.u32 %v5399_v56, 16 }
  0xb9   : > { %7331 = vst [vmem:[#allocation7_spill] sm:$0xff] %v6270_v30  ;;  %v6272_v36 = vpop.f32.mrf.mxu1  ;;  %v823_v32 = vrot.slane %v822_v12, 4  ;;  %v2387_v12 = vsel %vm6011_vm6, %v2382_v46, %v6285_v1  ;;  %v832_v22 = vrot.slane %v830_v52, 4  ;;  %v1512_v28 = vunpack.c.l.b16 %v1441_v2  ;;  %v5401_v46 = vld [vmem:[%s5954_s7 + $0x80] sm:$0x1] }
  0xba   : > { %v6274_v41 = vpop.f32.mrf.mxu0  ;;  %v6331_v31 = vrot.slane %v839_v43, 5  ;;  %v845_v1 = vrot.slane %v843_v3, 4  ;;  %v2584_v35 = vunpack.c.l.b16 %v2387_v12  ;;  %v2401_v48 = vrot.slane %v2399_v15, 4  ;;  %v5804_v15 = vld [vmem:[%s5954_s7 + $0x6c] sm:$0xff] }
  0xbb   : > { %v828_v8 = vsel %vm6011_vm6, %v823_v32, %v827_v34  ;;  %v6336_v51 = vrot.slane %v2408_v19, 5  ;;  %v2414_v52 = vrot.slane %v2412_v20, 4  ;;  %v2418_v12 = vshll.u32 %v5401_v46, 16  ;;  %v1312_v19 = vld [vmem:[%s5954_s7 + $0x74] sm:$0x1] }
  0xbc   : > { %v1016_v32 = vunpack.c.l.b16 %v828_v8  ;;  %v846_v57 = vor.u32 %v845_v1, %v6331_v31  ;;  %v593_v46 = vld [vmem:[%s5954_s7 + $0x7c] sm:$0xf] }
  0xbf   : > { %v6288_v9 = vpop.f32.mrf.mxu2 }
  0xc0   : > { %v6291_v16 = vpop.f32.mrf.mxu3 }
  0xc1   : > { %7332 = vst [vmem:[#allocation8_spill] sm:$0xff] %v6291_v16  ;;  %v6295_v24 = vpop.f32.mrf.mxu1 }
  0xc2   : > { %v6299_v23 = vpop.f32.mrf.mxu0 }
  0xc4   : > { %5217 = vmatmul.msk.bf16.gmra.mxu1 %vm388_vm1, %v1038_v10  ;;  %5250 = vmatmul.msk.bf16.gmra.mxu2 %vm388_vm1, %v1535_v17  ;;  %v1444_v10 = vsel %vm6015_vm7, %v1442_v37, %v1443_v44  ;;  %v2402_v17 = vshll.u32 %v5399_v56, 16  ;;  %v2585_v37 = vunpack.c.l.b16 %v2397_v55  ;;  %v1311_v44 = vld [vmem:[%s5954_s7 + $0x70] sm:$0xf] }
  0xc5   : > { %5363 = vmatmul.msk.bf16.gmra.mxu3 %vm388_vm1, %v5803_v26  ;;  %5428 = vmatmul.msk.bf16.gmra.mxu0 %vm388_vm1, %v2607_v27  ;;  %v835_v26 = vrot.slane %v833_v53, 5  ;;  %v1015_v27 = vunpack.c.l.b16 %v818_v60  ;;  %v1513_v34 = vunpack.c.l.b16 %v1444_v10  ;;  %v849_v60 = vshll.u32 %v591_v38, 16  ;;  %v1310_v10 = vld [vmem:[%s5954_s7 + $0x6c] sm:$0xe] }
  0xc6   : > { %v2404_v49 = vrot.slane %v2402_v17, 5  ;;  %v1447_v2 = vrot.slane %v1311_v44, 5  ;;  %v2608_v17 = vpack.c.b16 %v2585_v37, %v2584_v35  ;;  %v592_v44 = vld [vmem:[%s5954_s7 + $0x78] sm:$0xf]  ;;  %v1450_v35 = vrot.slane %v1312_v19, 5 }
  0xc7   : > { %v6309_v59 = vpop.f32.mrf.mxu2  ;;  %v836_v53 = vor.u32 %v835_v26, %v832_v22  ;;  %v1039_v3 = vpack.c.b16 %v1016_v32, %v1015_v27  ;;  %v1536_v8 = vpack.c.b16 %v1513_v34, %v1512_v28  ;;  %v2415_v22 = vor.u32 %v2414_v52, %v6336_v51 }
  0xc8   : > { %v6316_v4 = vpop.f32.mrf.mxu3  ;;  %v2405_v20 = vor.u32 %v2404_v49, %v2401_v48  ;;  %v847_v27 = vrot.slane %v846_v57, 4  ;;  %v851_v28 = vrot.slane %v849_v60, 5  ;;  %v5235_v32 = vrot.slane %v1310_v10, 9  ;;  %v5402_v48 = vld [vmem:[%s5954_s7 + $0x84] sm:$0xf] }
  0xc9   : > { %7333 = vst [vmem:[#allocation9_spill] sm:$0xff] %v6316_v4  ;;  %v6327_v14 = vpop.f32.mrf.mxu1  ;;  %v837_v38 = vrot.slane %v836_v53, 4  ;;  %v1449_v34 = vrot.slane %v1447_v2, 4  ;;  %v2420_v37 = vrot.slane %v2418_v12, 5  ;;  %v5403_v49 = vld [vmem:[%s5954_s7 + $0x88] sm:$0xf] }
  0xca   : > { %v6329_v21 = vpop.f32.mrf.mxu0  ;;  %v2416_v52 = vrot.slane %v2415_v22, 4  ;;  %v854_v53 = vshrl.u32 %v592_v44, 16  ;;  %v857_v57 = vshll.u32 %v592_v44, 16  ;;  %v863_v10 = vshll.u32 %v593_v46, 16 }
  0xcb   : > { %v842_v60 = vsel %vm6011_vm6, %v837_v38, %v6331_v31  ;;  %v2426_v19 = vshll.u32 %v5402_v48, 16  ;;  %v2432_v12 = vshll.u32 %v5403_v49, 16  ;;  %v1451_v31 = vsel %vm6015_vm7, %v1449_v34, %v1450_v35  ;;  %v1314_v34 = vld [vmem:[%s5954_s7 + $0x7c] sm:$0xf] }
  0xcc   : > { %v2421_v44 = vsel %vm6011_vm6, %v2416_v52, %v2420_v37  ;;  %v1454_v30 = vrot.slane %v1314_v34, 5 }
  0xcd   : > { %v6377_v16 = vrot.slane %v2432_v12, 5 }
  0xcf   : > { %v6338_v56 = vpop.f32.mrf.mxu2 }
  0xd0   : > { %v6341_v43 = vpop.f32.mrf.mxu3 }
  0xd1   : > { %7334 = vst [vmem:[#allocation10_spill] sm:$0xff] %v6341_v43  ;;  %v1107_v55 = vpop.f32.mrf.mxu1  ;;  %v2436_v43 = vshrl.u32 %v5403_v49, 16  ;;  %v594_v49 = vld [vmem:[%s5954_s7 + $0x80] sm:$0x1] }
  0xd2   : > { %v1219_v26 = vadd.f32 %v1107_v55, %v6151_v42  ;;  %v6348_v1 = vpop.f32.mrf.mxu0  ;;  %v2406_v42 = vrot.slane %v2405_v20, 4  ;;  %v1448_v20 = vsel %vm6015_vm7, %v5235_v32, %v1447_v2  ;;  %v6374_v2 = vrot.slane %v863_v10, 5 }
  0xd3   : > { %v1514_v52 = vunpack.c.l.b16 %v1448_v20  ;;  %v873_v10 = vshll.u32 %v594_v49, 16 }
  0xd4   : > { %5218 = vmatmul.msk.bf16.gmra.mxu1 %vm388_vm1, %v1039_v3  ;;  %5251 = vmatmul.msk.bf16.gmra.mxu2 %vm388_vm1, %v1536_v8  ;;  %v867_v3 = vshrl.u32 %v593_v46, 16  ;;  %v2423_v8 = vshrl.u32 %v5402_v48, 16  ;;  %v2411_v38 = vsel %vm6011_vm6, %v2406_v42, %v6336_v51  ;;  %v859_v46 = vrot.slane %v857_v57, 5  ;;  %v5404_v57 = vld [vmem:[%s5954_s7 + $0x8c] sm:$0x1] }
  0xd5   : > { %5364 = vmatmul.msk.bf16.gmra.mxu3 %vm388_vm1, %v5804_v15  ;;  %5429 = vmatmul.msk.bf16.gmra.mxu0 %vm388_vm1, %v2608_v17  ;;  %v852_v17 = vsel %vm6011_vm6, %v847_v27, %v851_v28  ;;  %v2438_v51 = vrot.slane %v2436_v43, 4  ;;  %v1017_v42 = vunpack.c.l.b16 %v842_v60  ;;  %v2442_v60 = vshll.u32 %v5404_v57, 16 }
  0xd6   : > { %v869_v32 = vrot.slane %v867_v3, 4  ;;  %v2425_v35 = vrot.slane %v2423_v8, 4  ;;  %v1018_v37 = vunpack.c.l.b16 %v852_v17  ;;  %v875_v49 = vrot.slane %v873_v10, 5 }
  0xd7   : > { %v1604_v55 = vpop.f32.mrf.mxu2  ;;  %v2439_v43 = vor.u32 %v2438_v51, %v6377_v16  ;;  %v1456_v51 = vrot.slane %v1454_v30, 4  ;;  %v878_v57 = vshrl.u32 %v595_v7, 16 }
  0xd8   : > { %v1716_v4 = vadd.f32 %v1604_v55, %v1219_v26  ;;  %v1958_v15 = vpop.f32.mrf.mxu3  ;;  %v856_v26 = vrot.slane %v854_v53, 4  ;;  %v2428_v55 = vrot.slane %v2426_v19, 5  ;;  %v1515_v53 = vunpack.c.l.b16 %v1451_v31 }
  0xd9   : > { %v1109_v22 = vpop.f32.mrf.mxu1  ;;  %v870_v3 = vor.u32 %v869_v32, %v6374_v2  ;;  %v1040_v20 = vpack.c.b16 %v1018_v37, %v1017_v42  ;;  %v2440_v37 = vrot.slane %v2439_v43, 4 }
  0xda   : > { %v2070_v48 = vadd.f32 %v1958_v15, %v1716_v4  ;;  %v1220_v27 = vadd.f32 %v1109_v22, %v6179_v11  ;;  %v2678_v28 = vpop.f32.mrf.mxu0  ;;  %v2586_v4 = vunpack.c.l.b16 %v2411_v38  ;;  %v2587_v11 = vunpack.c.l.b16 %v2421_v44  ;;  %v1313_v22 = vld [vmem:[%s5954_s7 + $0x78] sm:$0xe] }
  0xdb   : > { %v860_v15 = vor.u32 %v859_v46, %v856_v26  ;;  %v2429_v19 = vor.u32 %v2428_v55, %v2425_v35  ;;  %v1537_v31 = vpack.c.b16 %v1515_v53, %v1514_v52  ;;  %v5805_v44 = vld [vmem:[%s5954_s7 + $0x78] sm:$0xff]  ;;  %v5236_v32 = vrot.slane %v1313_v22, 9  ;;  %v596_v53 = vld [vmem:[%s5954_s7 + $0x88] sm:$0xf]  ;;  %v5406_v22 = vld [vmem:[%s5954_s7 + $0x94] sm:$0xf] }
  0xdc   : > { %v2609_v26 = vpack.c.b16 %v2587_v11, %v2586_v4  ;;  %v871_v55 = vrot.slane %v870_v3, 4  ;;  %v2444_v52 = vrot.slane %v2442_v60, 5  ;;  %v881_v4 = vshll.u32 %v595_v7, 16  ;;  %v5405_v3 = vld [vmem:[%s5954_s7 + $0x90] sm:$0xf] }
  0xdd   : > { %v861_v46 = vrot.slane %v860_v15, 4  ;;  %v2430_v42 = vrot.slane %v2429_v19, 4  ;;  %v6393_v11 = vadd.f32 %v6348_v1, %v2070_v48  ;;  %v887_v15 = vshll.u32 %v596_v53, 16 }
  0xde   : > { %v891_v10 = vshrl.u32 %v596_v53, 16  ;;  %v876_v7 = vsel %vm6011_vm6, %v871_v55, %v875_v49  ;;  %v1455_v1 = vsel %vm6015_vm7, %v5236_v32, %v1454_v30  ;;  %v2445_v43 = vsel %vm6011_vm6, %v2440_v37, %v2444_v52  ;;  %v1317_v52 = vld [vmem:[%s5954_s7 + $0x88] sm:$0xf] }
  0xdf   : > { %v1606_v8 = vpop.f32.mrf.mxu2  ;;  %v880_v60 = vrot.slane %v878_v57, 4  ;;  %v2456_v30 = vshll.u32 %v5406_v22, 16  ;;  %v6417_v32 = vrot.slane %v887_v15, 5  ;;  %v1516_v55 = vunpack.c.l.b16 %v1455_v1 }
  0xe0   : > { %v1717_v12 = vadd.f32 %v1606_v8, %v1220_v27  ;;  %v1960_v17 = vpop.f32.mrf.mxu3  ;;  %v1457_v27 = vrot.slane %v1315_v50, 5  ;;  %v866_v50 = vsel %vm6011_vm6, %v861_v46, %v6374_v2 }
  0xe1   : > { %v1112_v38 = vpop.f32.mrf.mxu1 }
  0xe2   : > { %v2071_v34 = vadd.f32 %v1960_v17, %v1717_v12  ;;  %v1221_v33 = vadd.f32 %v1112_v38, %v6199_v47  ;;  %v6387_v35 = vpop.f32.mrf.mxu0  ;;  %v1458_v48 = vsel %vm6015_vm7, %v1456_v51, %v1457_v27  ;;  %v883_v12 = vrot.slane %v881_v4, 5 }
  0xe3   : > { %v2450_v38 = vshll.u32 %v5405_v3, 16  ;;  %v1517_v51 = vunpack.c.l.b16 %v1458_v48  ;;  %v6420_v4 = vrot.slane %v2456_v30, 5 }
  0xe4   : > { %5219 = vmatmul.msk.bf16.gmra.mxu1 %vm388_vm1, %v1040_v20  ;;  %5252 = vmatmul.msk.bf16.gmra.mxu2 %vm388_vm1, %v1537_v31  ;;  %v6395_v47 = vadd.f32 %v2678_v28, %v2071_v34  ;;  %v2435_v28 = vsel %vm6011_vm6, %v2430_v42, %v6377_v16  ;;  %v597_v20 = vld [vmem:[%s5954_s7 + $0x8c] sm:$0x1]  ;;  %v2447_v31 = vshrl.u32 %v5405_v3, 16  ;;  %v1019_v16 = vunpack.c.l.b16 %v866_v50 }
  0xe5   : > { %5365 = vmatmul.msk.bf16.gmra.mxu3 %vm388_vm1, %v5805_v44  ;;  %5430 = vmatmul.msk.bf16.gmra.mxu0 %vm388_vm1, %v2609_v26  ;;  %v2460_v44 = vshrl.u32 %v5406_v22, 16  ;;  %v1020_v34 = vunpack.c.l.b16 %v876_v7  ;;  %v2588_v27 = vunpack.c.l.b16 %v2435_v28  ;;  %v2589_v42 = vunpack.c.l.b16 %v2445_v43  ;;  %v5407_v22 = vld [vmem:[%s5954_s7 + $0x98] sm:$0x1] }
  0xe6   : > { %v897_v37 = vshll.u32 %v597_v20, 16  ;;  %v2449_v53 = vrot.slane %v2447_v31, 4  ;;  %v2452_v57 = vrot.slane %v2450_v38, 5  ;;  %v884_v15 = vor.u32 %v883_v12, %v880_v60  ;;  %v1318_v20 = vld [vmem:[%s5954_s7 + $0x8c] sm:$0x1] }
  0xe7   : > { %v1609_v8 = vpop.f32.mrf.mxu2  ;;  %v1538_v7 = vpack.c.b16 %v1517_v51, %v1516_v55  ;;  %v2610_v28 = vpack.c.b16 %v2589_v42, %v2588_v27  ;;  %v2466_v38 = vshll.u32 %v5407_v22, 16  ;;  %v1464_v51 = vrot.slane %v1318_v20, 5  ;;  %v599_v27 = vld [vmem:[%s5954_s7 + $0x94] sm:$0xf]  ;;  %v5408_v42 = vld [vmem:[%s5954_s7 + $0x9c] sm:$0xf] }
  0xe8   : > { %v1718_v2 = vadd.f32 %v1609_v8, %v1221_v33  ;;  %v1963_v19 = vpop.f32.mrf.mxu3  ;;  %v893_v33 = vrot.slane %v891_v10, 4  ;;  %v1316_v10 = vld [vmem:[%s5954_s7 + $0x84] sm:$0xe]  ;;  %v1041_v8 = vpack.c.b16 %v1020_v34, %v1019_v16  ;;  %v2453_v60 = vor.u32 %v2452_v57, %v2449_v53  ;;  %v598_v34 = vld [vmem:[%s5954_s7 + $0x90] sm:$0xf] }
  0xe9   : > { %v1114_v17 = vpop.f32.mrf.mxu1  ;;  %v5237_v31 = vrot.slane %v1316_v10, 9  ;;  %v911_v22 = vshll.u32 %v599_v27, 16 }
  0xea   : > { %v2072_v26 = vadd.f32 %v1963_v19, %v1718_v2  ;;  %v1222_v46 = vadd.f32 %v1114_v17, %v6229_v18  ;;  %v2683_v49 = vpop.f32.mrf.mxu0  ;;  %v2462_v18 = vrot.slane %v2460_v44, 4  ;;  %v894_v3 = vor.u32 %v893_v33, %v6417_v32  ;;  %v5806_v17 = vld [vmem:[%s5954_s7 + $0x84] sm:$0xff] }
  0xeb   : > { %v899_v2 = vrot.slane %v897_v37, 5  ;;  %v1461_v19 = vrot.slane %v1317_v52, 5  ;;  %v2454_v53 = vrot.slane %v2453_v60, 4 }
  0xec   : > { %v2463_v12 = vor.u32 %v2462_v18, %v6420_v4  ;;  %v895_v16 = vrot.slane %v894_v3, 4  ;;  %v6437_v37 = vadd.f32 %v6387_v35, %v2072_v26  ;;  %v2468_v18 = vrot.slane %v2466_v38, 5 }
  0xed   : > { %v1463_v55 = vrot.slane %v1461_v19, 4  ;;  %v902_v26 = vshrl.u32 %v598_v34, 16 }
  0xee   : > { %v2464_v57 = vrot.slane %v2463_v12, 4  ;;  %v900_v35 = vsel %vm6011_vm6, %v895_v16, %v899_v2  ;;  %v2459_v2 = vsel %vm6011_vm6, %v2454_v53, %v6420_v4  ;;  %v6460_v16 = vrot.slane %v911_v22, 5  ;;  %v1319_v22 = vld [vmem:[%s5954_s7 + $0x90] sm:$0xe] }
  0xef   : > { %v1611_v50 = vpop.f32.mrf.mxu2  ;;  %v1022_v20 = vunpack.c.l.b16 %v900_v35 }
  0xf0   : > { %v1719_v1 = vadd.f32 %v1611_v50, %v1222_v46  ;;  %v1965_v48 = vpop.f32.mrf.mxu3  ;;  %v885_v46 = vrot.slane %v884_v15, 4  ;;  %v5409_v15 = vld [vmem:[%s5954_s7 + $0xa0] sm:$0xf]  ;;  %v915_v50 = vshrl.u32 %v599_v27, 16 }
  0xf1   : > { %v1117_v43 = vpop.f32.mrf.mxu1 }
  0xf2   : > { %v2073_v30 = vadd.f32 %v1965_v48, %v1719_v1  ;;  %v1223_v44 = vadd.f32 %v1117_v43, %v6248_v61  ;;  %v6429_v33 = vpop.f32.mrf.mxu0  ;;  %v1462_v61 = vsel %vm6015_vm7, %v5237_v31, %v1461_v19  ;;  %v890_v3 = vsel %vm6011_vm6, %v885_v46, %v6417_v32 }
  0xf3   : > { %v2480_v19 = vshll.u32 %v5409_v15, 16  ;;  %v2484_v43 = vshrl.u32 %v5409_v15, 16  ;;  %v1021_v32 = vunpack.c.l.b16 %v890_v3  ;;  %v2469_v31 = vsel %vm6011_vm6, %v2464_v57, %v2468_v18  ;;  %v5410_v3 = vld [vmem:[%s5954_s7 + $0xa4] sm:$0x1] }
  0xf4   : > { %5220 = vmatmul.msk.bf16.gmra.mxu1 %vm388_vm1, %v1041_v8  ;;  %5253 = vmatmul.msk.bf16.gmra.mxu2 %vm388_vm1, %v1538_v7  ;;  %v6439_v52 = vadd.f32 %v2683_v49, %v2073_v30  ;;  %v905_v49 = vshll.u32 %v598_v34, 16  ;;  %v2471_v8 = vshrl.u32 %v5408_v42, 16  ;;  %v2474_v7 = vshll.u32 %v5408_v42, 16  ;;  %v600_v30 = vld [vmem:[%s5954_s7 + $0x98] sm:$0x1] }
  0xf5   : > { %5366 = vmatmul.msk.bf16.gmra.mxu3 %vm388_vm1, %v5806_v17  ;;  %5431 = vmatmul.msk.bf16.gmra.mxu0 %vm388_vm1, %v2610_v28  ;;  %v1465_v28 = vsel %vm6015_vm7, %v1463_v55, %v1464_v51  ;;  %v917_v34 = vrot.slane %v915_v50, 4  ;;  %v1518_v27 = vunpack.c.l.b16 %v1462_v61  ;;  %v1320_v42 = vld [vmem:[%s5954_s7 + $0x94] sm:$0xf]  ;;  %v6463_v53 = vrot.slane %v2480_v19, 5  ;;  %v1321_v50 = vld [vmem:[%s5954_s7 + $0x98] sm:$0x1] }
  0xf6   : > { %v907_v46 = vrot.slane %v905_v49, 5  ;;  %v2473_v55 = vrot.slane %v2471_v8, 4  ;;  %v2476_v51 = vrot.slane %v2474_v7, 5  ;;  %v1519_v4 = vunpack.c.l.b16 %v1465_v28 }
  0xf7   : > { %v1614_v10 = vpop.f32.mrf.mxu2  ;;  %v2486_v57 = vrot.slane %v2484_v43, 4  ;;  %v2590_v18 = vunpack.c.l.b16 %v2459_v2  ;;  %v921_v15 = vshll.u32 %v600_v30, 16  ;;  %v1042_v35 = vpack.c.b16 %v1022_v20, %v1021_v32 }
  0xf8   : > { %v1720_v1 = vadd.f32 %v1614_v10, %v1223_v44  ;;  %v1968_v48 = vpop.f32.mrf.mxu3  ;;  %v904_v44 = vrot.slane %v902_v26, 4  ;;  %v918_v10 = vor.u32 %v917_v34, %v6460_v16  ;;  %v1468_v8 = vrot.slane %v1320_v42, 5  ;;  %v601_v34 = vld [vmem:[%s5954_s7 + $0x9c] sm:$0xf] }
  0xf9   : > { %v1119_v17 = vpop.f32.mrf.mxu1  ;;  %v2477_v61 = vor.u32 %v2476_v51, %v2473_v55  ;;  %v2487_v28 = vor.u32 %v2486_v57, %v6463_v53  ;;  %v2490_v19 = vshll.u32 %v5410_v3, 16 }
  0xfa   : > { %v2074_v60 = vadd.f32 %v1968_v48, %v1720_v1  ;;  %v1224_v12 = vadd.f32 %v1119_v17, %v6274_v41  ;;  %v2688_v38 = vpop.f32.mrf.mxu0  ;;  %v2591_v41 = vunpack.c.l.b16 %v2469_v31  ;;  %v908_v49 = vor.u32 %v907_v46, %v904_v44  ;;  %v5807_v17 = vld [vmem:[%s5954_s7 + $0x90] sm:$0xff] }
  0xfb   : > { %v1539_v48 = vpack.c.b16 %v1519_v4, %v1518_v27  ;;  %v923_v31 = vrot.slane %v921_v15, 5  ;;  %v5238_v44 = vrot.slane %v1319_v22, 9  ;;  %v1471_v46 = vrot.slane %v1321_v50, 5 }
  0xfc   : > { %v2611_v2 = vpack.c.b16 %v2591_v41, %v2590_v18  ;;  %v909_v55 = vrot.slane %v908_v49, 4  ;;  %v1470_v51 = vrot.slane %v1468_v8, 4  ;;  %v2478_v27 = vrot.slane %v2477_v61, 4  ;;  %v602_v18 = vld [vmem:[%s5954_s7 + $0xa0] sm:$0xf] }
  0xfd   : > { %v2488_v4 = vrot.slane %v2487_v28, 4  ;;  %v2492_v42 = vrot.slane %v2490_v19, 5  ;;  %v926_v41 = vshrl.u32 %v601_v34, 16  ;;  %v929_v15 = vshll.u32 %v601_v34, 16 }
  0xfe   : > { %v1469_v3 = vsel %vm6015_vm7, %v5238_v44, %v1468_v8  ;;  %v914_v49 = vsel %vm6011_vm6, %v909_v55, %v6460_v16  ;;  %v935_v61 = vshll.u32 %v602_v18, 16 }
  0xff   : > { %v1616_v26 = vpop.f32.mrf.mxu2  ;;  %v2493_v8 = vsel %vm6011_vm6, %v2488_v4, %v2492_v42  ;;  %v928_v16 = vrot.slane %v926_v41, 4  ;;  %v1520_v44 = vunpack.c.l.b16 %v1469_v3  ;;  %v1323_v42 = vld [vmem:[%s5954_s7 + $0xa0] sm:$0xf] }
 0x100   : > { %v1721_v7 = vadd.f32 %v1616_v26, %v1224_v12  ;;  %v1970_v1 = vpop.f32.mrf.mxu3  ;;  %v919_v12 = vrot.slane %v918_v10, 4  ;;  %v5412_v10 = vld [vmem:[%s5954_s7 + $0xac] sm:$0xf]  ;;  %v6502_v34 = vrot.slane %v935_v61, 5 }
 0x101   : > { %v1122_v43 = vpop.f32.mrf.mxu1 }
 0x102   : > { %v2075_v32 = vadd.f32 %v1970_v1, %v1721_v7  ;;  %v1225_v20 = vadd.f32 %v1122_v43, %v6299_v23  ;;  %v6472_v30 = vpop.f32.mrf.mxu0  ;;  %v6478_v23 = vadd.f32 %v6429_v33, %v2074_v60  ;;  %v924_v33 = vsel %vm6011_vm6, %v919_v12, %v923_v31 }
 0x103   : > { %v1472_v60 = vsel %vm6015_vm7, %v1470_v51, %v1471_v46  ;;  %v939_v7 = vshrl.u32 %v602_v18, 16  ;;  %v2508_v31 = vshrl.u32 %v5412_v10, 16  ;;  %v2593_v51 = vunpack.c.l.b16 %v2493_v8  ;;  %v1322_v18 = vld [vmem:[%s5954_s7 + $0x9c] sm:$0xe] }
 0x104   : > { %5221 = vmatmul.msk.bf16.gmra.mxu1 %vm388_vm1, %v1042_v35  ;;  %5254 = vmatmul.msk.bf16.gmra.mxu2 %vm388_vm1, %v1539_v48  ;;  %v6480_v57 = vadd.f32 %v2688_v38, %v2075_v32  ;;  %v5411_v35 = vld [vmem:[%s5954_s7 + $0xa8] sm:$0xf]  ;;  %v2483_v38 = vsel %vm6011_vm6, %v2478_v27, %v6463_v53  ;;  %v931_v48 = vrot.slane %v929_v15, 5  ;;  %v1023_v32 = vunpack.c.l.b16 %v914_v49  ;;  %v603_v27 = vld [vmem:[%s5954_s7 + $0xa4] sm:$0x1]  ;;  %v5808_v8 = vld [vmem:[%s5954_s7 + $0x9c] sm:$0xff] }
 0x105   : > { %5367 = vmatmul.msk.bf16.gmra.mxu3 %vm388_vm1, %v5807_v17  ;;  %5432 = vmatmul.msk.bf16.gmra.mxu0 %vm388_vm1, %v2611_v2  ;;  %v2495_v28 = vshrl.u32 %v5411_v35, 16  ;;  %v2498_v19 = vshll.u32 %v5411_v35, 16  ;;  %v2504_v2 = vshll.u32 %v5412_v10, 16  ;;  %v1521_v46 = vunpack.c.l.b16 %v1472_v60  ;;  %v5413_v49 = vld [vmem:[%s5954_s7 + $0xb0] sm:$0x1] }
 0x106   : > { %v941_v55 = vrot.slane %v939_v7, 4  ;;  %v2592_v12 = vunpack.c.l.b16 %v2483_v38  ;;  %v932_v4 = vor.u32 %v931_v48, %v928_v16  ;;  %v2510_v35 = vrot.slane %v2508_v31, 4 }
 0x107   : > { %v1619_v26 = vpop.f32.mrf.mxu2  ;;  %v2497_v41 = vrot.slane %v2495_v28, 4  ;;  %v6507_v15 = vrot.slane %v2504_v2, 5  ;;  %v1540_v10 = vpack.c.b16 %v1521_v46, %v1520_v44  ;;  %v1475_v16 = vrot.slane %v1323_v42, 5  ;;  %v604_v44 = vld [vmem:[%s5954_s7 + $0xa8] sm:$0xf] }
 0x108   : > { %v1722_v22 = vadd.f32 %v1619_v26, %v1225_v20  ;;  %v1973_v50 = vpop.f32.mrf.mxu3  ;;  %v1024_v20 = vunpack.c.l.b16 %v924_v33  ;;  %v942_v38 = vor.u32 %v941_v55, %v6502_v34  ;;  %v2612_v61 = vpack.c.b16 %v2593_v51, %v2592_v12  ;;  %v605_v46 = vld [vmem:[%s5954_s7 + $0xac] sm:$0xf] }
 0x109   : > { %v1124_v1 = vpop.f32.mrf.mxu1  ;;  %v933_v7 = vrot.slane %v932_v4, 4  ;;  %v2514_v31 = vshll.u32 %v5413_v49, 16  ;;  %v1477_v4 = vrot.slane %v1475_v16, 4  ;;  %v959_v49 = vshll.u32 %v605_v46, 16 }
 0x10a   : > { %v2076_v43 = vadd.f32 %v1973_v50, %v1722_v22  ;;  %v1226_v17 = vadd.f32 %v1124_v1, %v6329_v21  ;;  %v2693_v53 = vpop.f32.mrf.mxu0  ;;  %v2500_v21 = vrot.slane %v2498_v19, 5  ;;  %v1043_v3 = vpack.c.b16 %v1024_v20, %v1023_v32  ;;  %v1324_v19 = vld [vmem:[%s5954_s7 + $0xa4] sm:$0x1] }
 0x10b   : > { %v945_v22 = vshll.u32 %v603_v27, 16  ;;  %v5239_v1 = vrot.slane %v1322_v18, 9  ;;  %v943_v32 = vrot.slane %v942_v38, 4  ;;  %v938_v51 = vsel %vm6011_vm6, %v933_v7, %v6502_v34  ;;  %v5414_v18 = vld [vmem:[%s5954_s7 + $0xb4] sm:$0xf] }
 0x10c   : > { %v2501_v2 = vor.u32 %v2500_v21, %v2497_v41  ;;  %v6521_v55 = vadd.f32 %v6472_v30, %v2076_v43  ;;  %v1478_v42 = vrot.slane %v1324_v19, 5  ;;  %v5415_v21 = vld [vmem:[%s5954_s7 + $0xb8] sm:$0xf]  ;;  %v2519_v38 = vshrl.u32 %v5414_v18, 16 }
 0x10d   : > { %v947_v20 = vrot.slane %v945_v22, 5  ;;  %v1476_v27 = vsel %vm6015_vm7, %v5239_v1, %v1475_v16  ;;  %v2522_v22 = vshll.u32 %v5414_v18, 16  ;;  %v2532_v7 = vshrl.u32 %v5415_v21, 16 }
 0x10e   : > { %v2502_v30 = vrot.slane %v2501_v2, 4 }
 0x10f   : > { %v1621_v26 = vpop.f32.mrf.mxu2 }
 0x110   : > { %v1723_v33 = vadd.f32 %v1621_v26, %v1226_v17  ;;  %v1975_v60 = vpop.f32.mrf.mxu3  ;;  %v2511_v17 = vor.u32 %v2510_v35, %v6507_v15  ;;  %v950_v26 = vshrl.u32 %v604_v44, 16  ;;  %v2507_v19 = vsel %vm6011_vm6, %v2502_v30, %v6507_v15 }
 0x111   : > { %v1127_v50 = vpop.f32.mrf.mxu1  ;;  %v2594_v18 = vunpack.c.l.b16 %v2507_v19  ;;  %v2534_v30 = vrot.slane %v2532_v7, 4  ;;  %v5809_v19 = vld [vmem:[%s5954_s7 + $0xa8] sm:$0xff] }
 0x112   : > { %v2077_v48 = vadd.f32 %v1975_v60, %v1723_v33  ;;  %v6512_v28 = vpop.f32.mrf.mxu0  ;;  %v1227_v41 = vadd.f32 %v1127_v50, %v6148_v39  ;;  %v2512_v43 = vrot.slane %v2511_v17, 4  ;;  %v963_v33 = vshrl.u32 %v605_v46, 16  ;;  %v606_v17 = vld [vmem:[%s5954_s7 + $0xb0] sm:$0x1] }
 0x113   : > { %v1479_v39 = vsel %vm6015_vm7, %v1477_v4, %v1478_v42  ;;  %v1522_v50 = vunpack.c.l.b16 %v1476_v27  ;;  %v1326_v4 = vld [vmem:[%s5954_s7 + $0xac] sm:$0xf]  ;;  %v2521_v42 = vrot.slane %v2519_v38, 4 }
 0x114   : > { %5222 = vmatmul.msk.bf16.gmra.mxu1 %vm388_vm1, %v1043_v3  ;;  %5255 = vmatmul.msk.bf16.gmra.mxu2 %vm388_vm1, %v1540_v10  ;;  %v6523_v12 = vadd.f32 %v2693_v53, %v2077_v48  ;;  %v2516_v53 = vrot.slane %v2514_v31, 5  ;;  %v953_v3 = vshll.u32 %v604_v44, 16  ;;  %v948_v10 = vsel %vm6011_vm6, %v943_v32, %v947_v20 }
 0x115   : > { %5368 = vmatmul.msk.bf16.gmra.mxu3 %vm388_vm1, %v5808_v8  ;;  %5433 = vmatmul.msk.bf16.gmra.mxu0 %vm388_vm1, %v2612_v61  ;;  %v2528_v61 = vshll.u32 %v5415_v21, 16  ;;  %v1025_v48 = vunpack.c.l.b16 %v938_v51  ;;  %v952_v31 = vrot.slane %v950_v26, 4  ;;  %v6545_v20 = vrot.slane %v959_v49, 5  ;;  %v5416_v21 = vld [vmem:[%s5954_s7 + $0xbc] sm:$0x1] }
 0x116   : > { %v2517_v2 = vsel %vm6011_vm6, %v2512_v43, %v2516_v53  ;;  %v955_v32 = vrot.slane %v953_v3, 5  ;;  %v965_v44 = vrot.slane %v963_v33, 4  ;;  %v1026_v46 = vunpack.c.l.b16 %v948_v10  ;;  %v1325_v49 = vld [vmem:[%s5954_s7 + $0xa8] sm:$0xe] }
 0x117   : > { %v1624_v35 = vpop.f32.mrf.mxu2  ;;  %v1523_v27 = vunpack.c.l.b16 %v1479_v39  ;;  %v2524_v51 = vrot.slane %v2522_v22, 5  ;;  %v6548_v15 = vrot.slane %v2528_v61, 5  ;;  %v969_v53 = vshll.u32 %v606_v17, 16  ;;  %v1327_v22 = vld [vmem:[%s5954_s7 + $0xb0] sm:$0x1] }
 0x118   : > { %v1724_v60 = vadd.f32 %v1624_v35, %v1227_v41  ;;  %v1978_v34 = vpop.f32.mrf.mxu3  ;;  %v2595_v41 = vunpack.c.l.b16 %v2517_v2  ;;  %v956_v26 = vor.u32 %v955_v32, %v952_v31  ;;  %v966_v3 = vor.u32 %v965_v44, %v6545_v20 }
 0x119   : > { %v1129_v8 = vpop.f32.mrf.mxu1  ;;  %v1482_v33 = vrot.slane %v1326_v4, 5  ;;  %v1044_v10 = vpack.c.b16 %v1026_v46, %v1025_v48  ;;  %v1541_v38 = vpack.c.b16 %v1523_v27, %v1522_v50  ;;  %v2525_v39 = vor.u32 %v2524_v51, %v2521_v42 }
 0x11a   : > { %v2078_v1 = vadd.f32 %v1978_v34, %v1724_v60  ;;  %v2698_v16 = vpop.f32.mrf.mxu0  ;;  %v1228_v43 = vadd.f32 %v1129_v8, %v6177_v6  ;;  %v2613_v7 = vpack.c.b16 %v2595_v41, %v2594_v18  ;;  %v2535_v2 = vor.u32 %v2534_v30, %v6548_v15  ;;  %v607_v18 = vld [vmem:[%s5954_s7 + $0xb4] sm:$0xf]  ;;  %v608_v30 = vld [vmem:[%s5954_s7 + $0xb8] sm:$0xf] }
 0x11b   : > { %v2538_v6 = vshll.u32 %v5416_v21, 16  ;;  %v971_v31 = vrot.slane %v969_v53, 5  ;;  %v5240_v32 = vrot.slane %v1325_v49, 9  ;;  %v957_v44 = vrot.slane %v956_v26, 4  ;;  %v5417_v53 = vld [vmem:[%s5954_s7 + $0xc0] sm:$0xf] }
 0x11c   : > { %v967_v4 = vrot.slane %v966_v3, 4  ;;  %v1485_v48 = vrot.slane %v1327_v22, 5  ;;  %v2526_v50 = vrot.slane %v2525_v39, 4  ;;  %v6560_v46 = vadd.f32 %v6512_v28, %v2078_v1  ;;  %v5418_v26 = vld [vmem:[%s5954_s7 + $0xc4] sm:$0xf] }
 0x11d   : > { %v2536_v42 = vrot.slane %v2535_v2, 4  ;;  %v2540_v51 = vrot.slane %v2538_v6, 5  ;;  %v1483_v1 = vsel %vm6015_vm7, %v5240_v32, %v1482_v33  ;;  %v987_v22 = vshrl.u32 %v608_v30, 16 }
 0x11e   : > { %v972_v28 = vsel %vm6011_vm6, %v967_v4, %v971_v31  ;;  %v2556_v2 = vshrl.u32 %v5418_v26, 16  ;;  %v609_v4 = vld [vmem:[%s5954_s7 + $0xbc] sm:$0x1] }
 0x11f   : > { %v1626_v35 = vpop.f32.mrf.mxu2 }
 0x120   : > { %v1725_v60 = vadd.f32 %v1626_v35, %v1228_v43  ;;  %v1980_v34 = vpop.f32.mrf.mxu3  ;;  %v1484_v43 = vrot.slane %v1482_v33, 4  ;;  %v962_v35 = vsel %vm6011_vm6, %v957_v44, %v6545_v20  ;;  %v2541_v20 = vsel %vm6011_vm6, %v2536_v42, %v2540_v51  ;;  %v1329_v51 = vld [vmem:[%s5954_s7 + $0xb8] sm:$0xf] }
 0x121   : > { %v1132_v61 = vpop.f32.mrf.mxu1  ;;  %v2543_v33 = vshrl.u32 %v5417_v53, 16  ;;  %v1027_v6 = vunpack.c.l.b16 %v962_v35  ;;  %v2597_v44 = vunpack.c.l.b16 %v2541_v20  ;;  %v989_v42 = vrot.slane %v987_v22, 4 }
 0x122   : > { %v2079_v8 = vadd.f32 %v1980_v34, %v1725_v60  ;;  %v2701_v17 = vpop.f32.mrf.mxu0  ;;  %v1229_v41 = vadd.f32 %v1132_v61, %v6194_v40  ;;  %v2531_v40 = vsel %vm6011_vm6, %v2526_v50, %v6548_v15  ;;  %v974_v60 = vshrl.u32 %v607_v18, 16 }
 0x123   : > { %v977_v34 = vshll.u32 %v607_v18, 16  ;;  %v1524_v15 = vunpack.c.l.b16 %v1483_v1  ;;  %v2596_v32 = vunpack.c.l.b16 %v2531_v40  ;;  %v2545_v18 = vrot.slane %v2543_v33, 4 }
 0x124   : > { %5223 = vmatmul.msk.bf16.gmra.mxu1 %vm388_vm1, %v1044_v10  ;;  %5256 = vmatmul.msk.bf16.gmra.mxu2 %vm388_vm1, %v1541_v38  ;;  %v6562_v27 = vadd.f32 %v2698_v16, %v2079_v8  ;;  %v1486_v16 = vsel %vm6015_vm7, %v1484_v43, %v1485_v48  ;;  %v983_v38 = vshll.u32 %v608_v30, 16  ;;  %v1028_v8 = vunpack.c.l.b16 %v972_v28 }
 0x125   : > { %5369 = vmatmul.msk.bf16.gmra.mxu3 %vm388_vm1, %v5809_v19  ;;  %5434 = vmatmul.msk.bf16.gmra.mxu0 %vm388_vm1, %v2613_v7  ;;  %v2546_v19 = vshll.u32 %v5417_v53, 16  ;;  %v2552_v7 = vshll.u32 %v5418_v26, 16  ;;  %v1525_v31 = vunpack.c.l.b16 %v1486_v16  ;;  %v976_v43 = vrot.slane %v974_v60, 4  ;;  %v1328_v53 = vld [vmem:[%s5954_s7 + $0xb4] sm:$0xe] }
 0x126   : > { %v979_v48 = vrot.slane %v977_v34, 5  ;;  %v6586_v50 = vrot.slane %v983_v38, 5  ;;  %v2558_v28 = vrot.slane %v2556_v2, 4  ;;  %v1045_v16 = vpack.c.b16 %v1028_v8, %v1027_v6  ;;  %v5419_v26 = vld [vmem:[%s5954_s7 + $0xc8] sm:$0x1] }
 0x127   : > { %v1629_v21 = vpop.f32.mrf.mxu2  ;;  %v6593_v35 = vrot.slane %v2552_v7, 5  ;;  %v1542_v40 = vpack.c.b16 %v1525_v31, %v1524_v15  ;;  %v2614_v60 = vpack.c.b16 %v2597_v44, %v2596_v32  ;;  %v993_v34 = vshll.u32 %v609_v4, 16  ;;  %v5631_v31 = vld [vmem:[%s5954_s7 + $0x18] sm:$0xf]  ;;  %v5632_v32 = vld [vmem:[%s5954_s7 + $0x1c] sm:$0xf] }
 0x128   : > { %v1726_v3 = vadd.f32 %v1629_v21, %v1229_v41  ;;  %v1983_v49 = vpop.f32.mrf.mxu3  ;;  %v2548_v21 = vrot.slane %v2546_v19, 5  ;;  %v980_v38 = vor.u32 %v979_v48, %v976_v43  ;;  %v5241_v22 = vrot.slane %v1328_v53, 9 }
 0x129   : > { %v1134_v10 = vpop.f32.mrf.mxu1  ;;  %v1489_v33 = vrot.slane %v1329_v51, 5  ;;  %v2559_v2 = vor.u32 %v2558_v28, %v6593_v35  ;;  %v2562_v6 = vshll.u32 %v5419_v26, 16  ;;  %v995_v8 = vrot.slane %v993_v34, 5 }
 0x12a   : > { %v2080_v39 = vadd.f32 %v1983_v49, %v1726_v3  ;;  %v2703_v61 = vpop.f32.mrf.mxu0  ;;  %v1230_v30 = vadd.f32 %v1134_v10, %v6222_v13  ;;  %v990_v13 = vor.u32 %v989_v42, %v6586_v50  ;;  %v1330_v10 = vld [vmem:[%s5954_s7 + $0xbc] sm:$0x1]  ;;  %v2549_v7 = vor.u32 %v2548_v21, %v2545_v18 }
 0x12b   : > { %v1492_v15 = vrot.slane %v1330_v10, 5  ;;  %v981_v4 = vrot.slane %v980_v38, 4  ;;  %v1490_v48 = vsel %vm6015_vm7, %v5241_v22, %v1489_v33  ;;  %v1491_v42 = vrot.slane %v1489_v33, 4  ;;  %v5438_v10 = vld [vmem:[%s5954_s7 + $0x10] sm:$0xf] }
 0x12c   : > { %v6589_v41 = vadd.f32 %v2701_v17, %v2080_v39  ;;  %v5810_v17 = vld [vmem:[%s5954_s7 + $0xb4] sm:$0xff]  ;;  %v991_v43 = vrot.slane %v990_v13, 4  ;;  %v2550_v18 = vrot.slane %v2549_v7, 4  ;;  %v2564_v53 = vrot.slane %v2562_v6, 5 }
 0x12d   : > { %v3749_v28 = vshrl.u32 %v5631_v31, 16 }
 0x12e   : > { %v2555_v38 = vsel %vm6011_vm6, %v2550_v18, %v6593_v35  ;;  %v5697_v35 = vld [vmem:[%s5954_s7 + $0x1c] sm:$0xf] }
 0x12f   : > { %v1631_v1 = vpop.f32.mrf.mxu2 }
 0x130   : > { %v1727_v3 = vadd.f32 %v1631_v1, %v1230_v30  ;;  %v1985_v49 = vpop.f32.mrf.mxu3  ;;  %v2560_v30 = vrot.slane %v2559_v2, 4  ;;  %v3758_v1 = vshll.u32 %v5632_v32, 16 }
 0x131   : > { %v1137_v20 = vpop.f32.mrf.mxu1 }
 0x132   : > { %v2081_v39 = vadd.f32 %v1985_v49, %v1727_v3  ;;  %v2706_v19 = vpop.f32.mrf.mxu0  ;;  %v1231_v51 = vadd.f32 %v1137_v20, %v6245_v54  ;;  %v996_v54 = vsel %vm6011_vm6, %v991_v43, %v995_v8  ;;  %v2565_v13 = vsel %vm6011_vm6, %v2560_v30, %v2564_v53  ;;  %v5633_v8 = vld [vmem:[%s5954_s7 + $0x20] sm:$0x1] }
 0x133   : > { %v6624_v33 = vrot.slane %v3758_v1, 5  ;;  %v1030_v2 = vunpack.c.l.b16 %v996_v54  ;;  %v2950_v43 = vrot.slane %v5438_v10, 5  ;;  %v3768_v30 = vshll.u32 %v5633_v8, 16  ;;  %v5635_v8 = vld [vmem:[%s5954_s7 + $0x28] sm:$0xf] }
 0x134   : > { %5224 = vmatmul.msk.bf16.gmra.mxu1 %vm388_vm1, %v1045_v16  ;;  %5257 = vmatmul.msk.bf16.gmra.mxu2 %vm388_vm1, %v1542_v40  ;;  %v6604_v44 = vadd.f32 %v2703_v61, %v2081_v39  ;;  %v3752_v61 = vshll.u32 %v5631_v31, 16  ;;  %v3762_v16 = vshrl.u32 %v5632_v32, 16  ;;  %v986_v40 = vsel %vm6011_vm6, %v981_v4, %v6586_v50 }
 0x135   : > { %5370 = vmatmul.msk.bf16.gmra.mxu3 %vm388_vm1, %v5810_v17  ;;  %5435 = vmatmul.msk.bf16.gmra.mxu0 %vm388_vm1, %v2614_v60  ;;  %v1493_v60 = vsel %vm6015_vm7, %v1491_v42, %v1492_v15  ;;  %v1526_v17 = vunpack.c.l.b16 %v1490_v48  ;;  %v3751_v50 = vrot.slane %v3749_v28, 4  ;;  %v1029_v7 = vunpack.c.l.b16 %v986_v40  ;;  %v5437_v42 = vld [vmem:[%s5954_s7 + $0xc] sm:$0xe]  ;;  %v5696_v40 = vld [vmem:[%s5954_s7 + $0x18] sm:$0xe] }
 0x136   : > { %v3754_v22 = vrot.slane %v3752_v61, 5  ;;  %v3764_v39 = vrot.slane %v3762_v16, 4  ;;  %v1527_v6 = vunpack.c.l.b16 %v1493_v60  ;;  %v2598_v31 = vunpack.c.l.b16 %v2555_v38  ;;  %v5439_v61 = vld [vmem:[%s5954_s7 + $0x14] sm:$0x1] }
 0x137   : > { %v1634_v21 = vpop.f32.mrf.mxu2  ;;  %v2599_v32 = vunpack.c.l.b16 %v2565_v13  ;;  %v1046_v28 = vpack.c.b16 %v1030_v2, %v1029_v7  ;;  %v4516_v1 = vrot.slane %v5697_v35, 5  ;;  %v5485_v60 = vrot.slane %v5437_v42, 9 }
 0x138   : > { %v1728_v26 = vadd.f32 %v1634_v21, %v1231_v51  ;;  %v1988_v3 = vpop.f32.mrf.mxu3  ;;  %v3755_v51 = vor.u32 %v3754_v22, %v3751_v50  ;;  %v3765_v18 = vor.u32 %v3764_v39, %v6624_v33  ;;  %v2953_v38 = vrot.slane %v5439_v61, 5 }
 0x139   : > { %v1139_v49 = vpop.f32.mrf.mxu1  ;;  %v3770_v50 = vrot.slane %v3768_v30, 5  ;;  %v4518_v22 = vrot.slane %v4516_v1, 4 }
 0x13a   : > { %v2082_v34 = vadd.f32 %v1988_v3, %v1728_v26  ;;  %v2708_v20 = vpop.f32.mrf.mxu0  ;;  %v1232_v4 = vadd.f32 %v1139_v49, %v6272_v36  ;;  %v5811_v26 = vld [vmem:[%s5954_s7 + $0xc0] sm:$0xff]  ;;  %v2615_v3 = vpack.c.b16 %v2599_v32, %v2598_v31  ;;  %v3756_v13 = vrot.slane %v3755_v51, 4 }
 0x13b   : > { %v5698_v36 = vld [vmem:[%s5954_s7 + $0x20] sm:$0x1]  ;;  %v3766_v10 = vrot.slane %v3765_v18, 4  ;;  %v2951_v32 = vsel %vm6015_vm7, %v5485_v60, %v2950_v43 }
 0x13c   : > { %v6627_v15 = vadd.f32 %v2706_v19, %v2082_v34  ;;  %v1543_v19 = vpack.c.b16 %v1527_v6, %v1526_v17  ;;  %v2952_v34 = vrot.slane %v2950_v43, 4  ;;  %v5744_v17 = vrot.slane %v5696_v40, 9  ;;  %v5634_v6 = vld [vmem:[%s5954_s7 + $0x24] sm:$0xf] }
 0x13d   : > { %v4519_v39 = vrot.slane %v5698_v36, 5  ;;  %v3771_v42 = vsel %vm6011_vm6, %v3766_v10, %v3770_v50  ;;  %v3773_v18 = vshrl.u32 %v5634_v6, 16  ;;  %v3776_v30 = vshll.u32 %v5634_v6, 16  ;;  %v5441_v36 = vld [vmem:[%s5954_s7 + $0x1c] sm:$0xf] }
 0x13e   : > { %v2954_v35 = vsel %vm6015_vm7, %v2952_v34, %v2953_v38  ;;  %v5636_v10 = vld [vmem:[%s5954_s7 + $0x2c] sm:$0x1] }
 0x13f   : > { %v1636_v48 = vpop.f32.mrf.mxu2  ;;  %v4520_v51 = vsel %vm6015_vm7, %v4518_v22, %v4519_v39  ;;  %v3063_v61 = vunpack.c.l.b16 %v2954_v35  ;;  %v3778_v60 = vrot.slane %v3776_v30, 5  ;;  %v5440_v35 = vld [vmem:[%s5954_s7 + $0x18] sm:$0xe] }
 0x140   : > { %v1729_v53 = vadd.f32 %v1636_v48, %v1232_v4  ;;  %v1990_v21 = vpop.f32.mrf.mxu3  ;;  %v5486_v30 = vrot.slane %v5440_v35, 9 }
 0x141   : > { %v1142_v16 = vpop.f32.mrf.mxu1 }
 0x142   : > { %v2083_v49 = vadd.f32 %v1990_v21, %v1729_v53  ;;  %v2711_v54 = vpop.f32.mrf.mxu0  ;;  %v1233_v2 = vadd.f32 %v1142_v16, %v6295_v24  ;;  %v4517_v24 = vsel %vm6015_vm7, %v5744_v17, %v4516_v1  ;;  %v3782_v53 = vshll.u32 %v5635_v8, 16  ;;  %v5700_v17 = vld [vmem:[%s5954_s7 + $0x28] sm:$0xf] }
 0x143   : > { %v3786_v21 = vshrl.u32 %v5635_v8, 16  ;;  %v4629_v1 = vunpack.c.l.b16 %v4520_v51  ;;  %v2957_v8 = vrot.slane %v5441_v36, 5  ;;  %v4523_v51 = vrot.slane %v5700_v17, 5 }
 0x144   : > { %5225 = vmatmul.msk.bf16.gmra.mxu1 %vm388_vm1, %v1046_v28  ;;  %5258 = vmatmul.msk.bf16.gmra.mxu2 %vm388_vm1, %v1543_v19  ;;  %v6639_v7 = vadd.f32 %v2708_v20, %v2083_v49  ;;  %v3761_v20 = vsel %vm6011_vm6, %v3756_v13, %v6624_v33  ;;  %v3062_v19 = vunpack.c.l.b16 %v2951_v32  ;;  %v3775_v49 = vrot.slane %v3773_v18, 4  ;;  %v5701_v18 = vld [vmem:[%s5954_s7 + $0x2c] sm:$0x1] }
 0x145   : > { %5371 = vmatmul.msk.bf16.gmra.mxu3 %vm388_vm1, %v5811_v26  ;;  %5436 = vmatmul.msk.bf16.gmra.mxu0 %vm388_vm1, %v2615_v3  ;;  %v4134_v16 = vunpack.c.l.b16 %v3761_v20  ;;  %v4135_v26 = vunpack.c.l.b16 %v3771_v42  ;;  %v4628_v3 = vunpack.c.l.b16 %v4517_v24  ;;  %v6662_v34 = vrot.slane %v3782_v53, 5  ;;  %v5442_v24 = vld [vmem:[%s5954_s7 + $0x20] sm:$0x1] }
 0x146   : > { %v3788_v38 = vrot.slane %v3786_v21, 4  ;;  %v3779_v20 = vor.u32 %v3778_v60, %v3775_v49  ;;  %v2959_v53 = vrot.slane %v2957_v8, 4  ;;  %v5637_v21 = vld [vmem:[%s5954_s7 + $0x30] sm:$0xf]  ;;  %v4525_v49 = vrot.slane %v4523_v51, 4 }
 0x147   : > { %v1639_v31 = vpop.f32.mrf.mxu2  ;;  %v4166_v6 = vpack.c.b16 %v4135_v26, %v4134_v16  ;;  %v4660_v32 = vpack.c.b16 %v4629_v1, %v4628_v3  ;;  %v4526_v60 = vrot.slane %v5701_v18, 5  ;;  %v5639_v18 = vld [vmem:[%s5954_s7 + $0x38] sm:$0x1] }
 0x148   : > { %v1730_v4 = vadd.f32 %v1639_v31, %v1233_v2  ;;  %v1993_v48 = vpop.f32.mrf.mxu3  ;;  %v3094_v2 = vpack.c.b16 %v3063_v61, %v3062_v19  ;;  %v2960_v61 = vrot.slane %v5442_v24, 5  ;;  %v3780_v16 = vrot.slane %v3779_v20, 4 }
 0x149   : > { %v1144_v43 = vpop.f32.mrf.mxu1  ;;  %v4527_v20 = vsel %vm6015_vm7, %v4525_v49, %v4526_v60  ;;  %v3816_v60 = vshll.u32 %v5639_v18, 16 }
 0x14a   : > { %v2084_v28 = vadd.f32 %v1993_v48, %v1730_v4  ;;  %v2713_v33 = vpop.f32.mrf.mxu0  ;;  %v1234_v13 = vadd.f32 %v1144_v43, %v6327_v14  ;;  %v3789_v14 = vor.u32 %v3788_v38, %v6662_v34  ;;  %v3792_v4 = vshll.u32 %v5636_v10, 16  ;;  %v5699_v43 = vld [vmem:[%s5954_s7 + $0x24] sm:$0xe] }
 0x14b   : > { %v5745_v36 = vrot.slane %v5699_v43, 9  ;;  %v3800_v10 = vshll.u32 %v5637_v21, 16 }
 0x14c   : > { %v6659_v40 = vadd.f32 %v2711_v54, %v2084_v28  ;;  %v5812_v54 = vld [vmem:[%s5954_s7 + $0x18] sm:$0xff]  ;;  %v5638_v28 = vld [vmem:[%s5954_s7 + $0x34] sm:$0xf]  ;;  %v3790_v26 = vrot.slane %v3789_v14, 4  ;;  %v3794_v3 = vrot.slane %v3792_v4, 5 }
 0x14d   : > { %v4524_v35 = vsel %vm6015_vm7, %v5745_v36, %v4523_v51  ;;  %v3802_v4 = vrot.slane %v3800_v10, 5  ;;  %v5813_v10 = vld [vmem:[%s5954_s7 + $0x24] sm:$0xff] }
 0x14e   : > { %v4630_v51 = vunpack.c.l.b16 %v4524_v35 }
 0x14f   : > { %v1641_v50 = vpop.f32.mrf.mxu2 }
 0x150   : > { %v1731_v22 = vadd.f32 %v1641_v50, %v1234_v13  ;;  %v1995_v39 = vpop.f32.mrf.mxu3  ;;  %v3797_v13 = vshrl.u32 %v5637_v21, 16  ;;  %v3806_v50 = vshll.u32 %v5638_v28, 16 }
 0x151   : > { %v1147_v31 = vpop.f32.mrf.mxu1 }
 0x152   : > { %v2085_v48 = vadd.f32 %v1995_v39, %v1731_v22  ;;  %v2716_v42 = vpop.f32.mrf.mxu0  ;;  %v1235_v1 = vadd.f32 %v1147_v31, %v6165_v58  ;;  %v3785_v58 = vsel %vm6011_vm6, %v3780_v16, %v6662_v34  ;;  %v3799_v14 = vrot.slane %v3797_v13, 4 }
 0x154   : > { %5502 = vmatmul.msk.bf16.vlgmr.msra.gmra.mxu1 %vm388_vm1, %v3094_v2  ;;  %5615 = vmatmul.msk.bf16.vlgmr.msra.gmra.mxu2 %vm388_vm1, %v5812_v54  ;;  %v6677_v19 = vadd.f32 %v2713_v33, %v2085_v48  ;;  %v3810_v33 = vshrl.u32 %v5638_v28, 16  ;;  %v2958_v2 = vsel %vm6015_vm7, %v5486_v30, %v2957_v8  ;;  %v2961_v54 = vsel %vm6015_vm7, %v2959_v53, %v2960_v61  ;;  %v5444_v8 = vld [vmem:[%s5954_s7 + $0x28] sm:$0xf]  ;;  %v5703_v61 = vld [vmem:[%s5954_s7 + $0x34] sm:$0xf] }
 0x155   : > { %5680 = vmatmul.msk.bf16.vlgmr.msra.gmra.mxu3 %vm388_vm1, %v4166_v6  ;;  %5761 = vmatmul.msk.bf16.vlgmr.msra.gmra.mxu0 %vm388_vm1, %v4660_v32  ;;  %v3795_v32 = vsel %vm6011_vm6, %v3790_v26, %v3794_v3  ;;  %v6696_v48 = vrot.slane %v3806_v50, 5  ;;  %v3064_v34 = vunpack.c.l.b16 %v2958_v2  ;;  %v3065_v43 = vunpack.c.l.b16 %v2961_v54  ;;  %v5445_v50 = vld [vmem:[%s5954_s7 + $0x2c] sm:$0x1]  ;;  %v5702_v54 = vld [vmem:[%s5954_s7 + $0x30] sm:$0xe] }
 0x156   : > { %v3812_v24 = vrot.slane %v3810_v33, 4  ;;  %v4136_v53 = vunpack.c.l.b16 %v3785_v58  ;;  %v4137_v21 = vunpack.c.l.b16 %v3795_v32  ;;  %v4631_v28 = vunpack.c.l.b16 %v4527_v20 }
 0x157   : > { %v1644_v38 = vpop.f32.mrf.mxu2  ;;  %v2964_v26 = vrot.slane %v5444_v8, 5  ;;  %v3803_v36 = vor.u32 %v3802_v4, %v3799_v14  ;;  %v3095_v13 = vpack.c.b16 %v3065_v43, %v3064_v34  ;;  %v4530_v33 = vrot.slane %v5703_v61, 5 }
 0x158   : > { %v1732_v17 = vadd.f32 %v1644_v38, %v1235_v1  ;;  %v1998_v22 = vpop.f32.mrf.mxu3  ;;  %v5443_v1 = vld [vmem:[%s5954_s7 + $0x24] sm:$0xe]  ;;  %v3813_v49 = vor.u32 %v3812_v24, %v6696_v48  ;;  %v4661_v2 = vpack.c.b16 %v4631_v28, %v4630_v51  ;;  %v2967_v35 = vrot.slane %v5445_v50, 5 }
 0x159   : > { %v1149_v39 = vpop.f32.mrf.mxu1  ;;  %v2966_v32 = vrot.slane %v2964_v26, 4  ;;  %v3804_v20 = vrot.slane %v3803_v36, 4  ;;  %v3818_v14 = vrot.slane %v3816_v60, 5  ;;  %v5746_v4 = vrot.slane %v5702_v54, 9 }
 0x15a   : > { %v2086_v6 = vadd.f32 %v1998_v22, %v1732_v17  ;;  %v2718_v31 = vpop.f32.mrf.mxu0  ;;  %v1236_v16 = vadd.f32 %v1149_v39, %v6188_v29  ;;  %v4167_v22 = vpack.c.b16 %v4137_v21, %v4136_v53  ;;  %v5704_v29 = vld [vmem:[%s5954_s7 + $0x38] sm:$0x1]  ;;  %v3814_v8 = vrot.slane %v3813_v49, 4  ;;  %v5640_v53 = vld [vmem:[%s5954_s7 + $0x3c] sm:$0xf] }
 0x15b   : > { %v4532_v24 = vrot.slane %v4530_v33, 4  ;;  %v4533_v34 = vrot.slane %v5704_v29, 5  ;;  %v5641_v21 = vld [vmem:[%s5954_s7 + $0x40] sm:$0xf]  ;;  %v2968_v61 = vsel %vm6015_vm7, %v2966_v32, %v2967_v35  ;;  %v3821_v49 = vshrl.u32 %v5640_v53, 16 }
 0x15c   : > { %v6699_v30 = vadd.f32 %v2716_v42, %v2086_v6  ;;  %v5487_v6 = vrot.slane %v5443_v1, 9  ;;  %v3819_v1 = vsel %vm6011_vm6, %v3814_v8, %v3818_v14  ;;  %v3824_v60 = vshll.u32 %v5640_v53, 16  ;;  %v5447_v29 = vld [vmem:[%s5954_s7 + $0x34] sm:$0xf]  ;;  %v5642_v8 = vld [vmem:[%s5954_s7 + $0x44] sm:$0x1] }
 0x15d   : > { %v4534_v36 = vsel %vm6015_vm7, %v4532_v24, %v4533_v34  ;;  %v3067_v50 = vunpack.c.l.b16 %v2968_v61  ;;  %v5446_v61 = vld [vmem:[%s5954_s7 + $0x30] sm:$0xe] }
 0x15e   : > { %v2965_v28 = vsel %vm6015_vm7, %v5487_v6, %v2964_v26  ;;  %v3826_v6 = vrot.slane %v3824_v60, 5  ;;  %v5488_v60 = vrot.slane %v5446_v61, 9 }
 0x15f   : > { %v1646_v3 = vpop.f32.mrf.mxu2 }
 0x160   : > { %v1733_v42 = vadd.f32 %v1646_v3, %v1236_v16  ;;  %v2000_v38 = vpop.f32.mrf.mxu3 }
 0x161   : > { %v1152_v17 = vpop.f32.mrf.mxu1 }
 0x162   : > { %v2087_v39 = vadd.f32 %v2000_v38, %v1733_v42  ;;  %v2721_v58 = vpop.f32.mrf.mxu0  ;;  %v1237_v18 = vadd.f32 %v1152_v17, %v6207_v62  ;;  %v4531_v62 = vsel %vm6015_vm7, %v5746_v4, %v4530_v33  ;;  %v3830_v42 = vshll.u32 %v5641_v21, 16  ;;  %v5706_v4 = vld [vmem:[%s5954_s7 + $0x40] sm:$0xf] }
 0x163   : > { %v3834_v38 = vshrl.u32 %v5641_v21, 16  ;;  %v4633_v33 = vunpack.c.l.b16 %v4534_v36  ;;  %v2971_v21 = vrot.slane %v5447_v29, 5  ;;  %v4537_v36 = vrot.slane %v5706_v4, 5 }
 0x164   : > { %5503 = vmatmul.msk.bf16.gmra.mxu1 %vm388_vm1, %v3095_v13  ;;  %5616 = vmatmul.msk.bf16.gmra.mxu2 %vm388_vm1, %v5813_v10  ;;  %v6711_v43 = vadd.f32 %v2718_v31, %v2087_v39  ;;  %v3809_v31 = vsel %vm6011_vm6, %v3804_v20, %v6696_v48  ;;  %v3066_v10 = vunpack.c.l.b16 %v2965_v28  ;;  %v3823_v39 = vrot.slane %v3821_v49, 4  ;;  %v5707_v49 = vld [vmem:[%s5954_s7 + $0x44] sm:$0x1] }
 0x165   : > { %5681 = vmatmul.msk.bf16.gmra.mxu3 %vm388_vm1, %v4167_v22  ;;  %5762 = vmatmul.msk.bf16.gmra.mxu0 %vm388_vm1, %v4661_v2  ;;  %v4138_v17 = vunpack.c.l.b16 %v3809_v31  ;;  %v4139_v22 = vunpack.c.l.b16 %v3819_v1  ;;  %v4632_v2 = vunpack.c.l.b16 %v4531_v62  ;;  %v6734_v32 = vrot.slane %v3830_v42, 5  ;;  %v5448_v62 = vld [vmem:[%s5954_s7 + $0x38] sm:$0x1] }
 0x166   : > { %v3836_v35 = vrot.slane %v3834_v38, 4  ;;  %v3827_v31 = vor.u32 %v3826_v6, %v3823_v39  ;;  %v2973_v42 = vrot.slane %v2971_v21, 4  ;;  %v5643_v38 = vld [vmem:[%s5954_s7 + $0x48] sm:$0xf]  ;;  %v4539_v39 = vrot.slane %v4537_v36, 4 }
 0x167   : > { %v1649_v51 = vpop.f32.mrf.mxu2  ;;  %v4168_v53 = vpack.c.b16 %v4139_v22, %v4138_v17  ;;  %v4662_v28 = vpack.c.b16 %v4633_v33, %v4632_v2  ;;  %v4540_v6 = vrot.slane %v5707_v49, 5  ;;  %v5645_v49 = vld [vmem:[%s5954_s7 + $0x50] sm:$0x1] }
 0x168   : > { %v1734_v16 = vadd.f32 %v1649_v51, %v1237_v18  ;;  %v2003_v3 = vpop.f32.mrf.mxu3  ;;  %v3096_v18 = vpack.c.b16 %v3067_v50, %v3066_v10  ;;  %v2974_v50 = vrot.slane %v5448_v62, 5  ;;  %v3828_v17 = vrot.slane %v3827_v31, 4 }
 0x169   : > { %v1154_v26 = vpop.f32.mrf.mxu1  ;;  %v4541_v31 = vsel %vm6015_vm7, %v4539_v39, %v4540_v6  ;;  %v3864_v6 = vshll.u32 %v5645_v49, 16 }
 0x16a   : > { %v2088_v13 = vadd.f32 %v2003_v3, %v1734_v16  ;;  %v2723_v48 = vpop.f32.mrf.mxu0  ;;  %v1238_v20 = vadd.f32 %v1154_v26, %v6239_v45  ;;  %v3837_v45 = vor.u32 %v3836_v35, %v6734_v32  ;;  %v3840_v16 = vshll.u32 %v5642_v8, 16  ;;  %v5705_v26 = vld [vmem:[%s5954_s7 + $0x3c] sm:$0xe] }
 0x16b   : > { %v5747_v29 = vrot.slane %v5705_v26, 9  ;;  %v3848_v8 = vshll.u32 %v5643_v38, 16 }
 0x16c   : > { %v6731_v54 = vadd.f32 %v2721_v58, %v2088_v13  ;;  %v5814_v58 = vld [vmem:[%s5954_s7 + $0x30] sm:$0xff]  ;;  %v5644_v13 = vld [vmem:[%s5954_s7 + $0x4c] sm:$0xf]  ;;  %v3838_v22 = vrot.slane %v3837_v45, 4  ;;  %v3842_v2 = vrot.slane %v3840_v16, 5 }
 0x16d   : > { %v4538_v61 = vsel %vm6015_vm7, %v5747_v29, %v4537_v36  ;;  %v3850_v16 = vrot.slane %v3848_v8, 5  ;;  %v5815_v8 = vld [vmem:[%s5954_s7 + $0x3c] sm:$0xff] }
 0x16e   : > { %v4634_v36 = vunpack.c.l.b16 %v4538_v61 }
 0x16f   : > { %v1651_v14 = vpop.f32.mrf.mxu2 }
 0x170   : > { %v1735_v24 = vadd.f32 %v1651_v14, %v1238_v20  ;;  %v2005_v34 = vpop.f32.mrf.mxu3  ;;  %v3845_v20 = vshrl.u32 %v5643_v38, 16  ;;  %v3854_v14 = vshll.u32 %v5644_v13, 16 }
 0x171   : > { %v1157_v51 = vpop.f32.mrf.mxu1 }
 0x172   : > { %v2089_v3 = vadd.f32 %v2005_v34, %v1735_v24  ;;  %v2726_v1 = vpop.f32.mrf.mxu0  ;;  %v1239_v33 = vadd.f32 %v1157_v51, %v6264_v25  ;;  %v3833_v25 = vsel %vm6011_vm6, %v3828_v17, %v6734_v32  ;;  %v3847_v45 = vrot.slane %v3845_v20, 4 }
 0x174   : > { %5504 = vmatmul.msk.bf16.gmra.mxu1 %vm388_vm1, %v3096_v18  ;;  %5617 = vmatmul.msk.bf16.gmra.mxu2 %vm388_vm1, %v5814_v58  ;;  %v6749_v10 = vadd.f32 %v2723_v48, %v2089_v3  ;;  %v3858_v48 = vshrl.u32 %v5644_v13, 16  ;;  %v2972_v18 = vsel %vm6015_vm7, %v5488_v60, %v2971_v21  ;;  %v2975_v58 = vsel %vm6015_vm7, %v2973_v42, %v2974_v50  ;;  %v5450_v21 = vld [vmem:[%s5954_s7 + $0x40] sm:$0xf]  ;;  %v5709_v50 = vld [vmem:[%s5954_s7 + $0x4c] sm:$0xf] }
 0x175   : > { %5682 = vmatmul.msk.bf16.gmra.mxu3 %vm388_vm1, %v4168_v53  ;;  %5763 = vmatmul.msk.bf16.gmra.mxu0 %vm388_vm1, %v4662_v28  ;;  %v3843_v28 = vsel %vm6011_vm6, %v3838_v22, %v3842_v2  ;;  %v6768_v3 = vrot.slane %v3854_v14, 5  ;;  %v3068_v32 = vunpack.c.l.b16 %v2972_v18  ;;  %v3069_v26 = vunpack.c.l.b16 %v2975_v58  ;;  %v5451_v14 = vld [vmem:[%s5954_s7 + $0x44] sm:$0x1]  ;;  %v5708_v58 = vld [vmem:[%s5954_s7 + $0x48] sm:$0xe] }
 0x176   : > { %v3860_v62 = vrot.slane %v3858_v48, 4  ;;  %v4140_v42 = vunpack.c.l.b16 %v3833_v25  ;;  %v4141_v38 = vunpack.c.l.b16 %v3843_v28  ;;  %v4635_v13 = vunpack.c.l.b16 %v4541_v31 }
 0x177   : > { %v1654_v35 = vpop.f32.mrf.mxu2  ;;  %v2978_v22 = vrot.slane %v5450_v21, 5  ;;  %v3851_v29 = vor.u32 %v3850_v16, %v3847_v45  ;;  %v3097_v20 = vpack.c.b16 %v3069_v26, %v3068_v32  ;;  %v4544_v48 = vrot.slane %v5709_v50, 5 }
 0x178   : > { %v1736_v4 = vadd.f32 %v1654_v35, %v1239_v33  ;;  %v2008_v24 = vpop.f32.mrf.mxu3  ;;  %v5449_v33 = vld [vmem:[%s5954_s7 + $0x3c] sm:$0xe]  ;;  %v3861_v39 = vor.u32 %v3860_v62, %v6768_v3  ;;  %v4663_v18 = vpack.c.b16 %v4635_v13, %v4634_v36  ;;  %v2981_v61 = vrot.slane %v5451_v14, 5 }
 0x179   : > { %v1159_v34 = vpop.f32.mrf.mxu1  ;;  %v2980_v28 = vrot.slane %v2978_v22, 4  ;;  %v3852_v31 = vrot.slane %v3851_v29, 4  ;;  %v3866_v45 = vrot.slane %v3864_v6, 5  ;;  %v5748_v16 = vrot.slane %v5708_v58, 9 }
 0x17a   : > { %v2090_v53 = vadd.f32 %v2008_v24, %v1736_v4  ;;  %v2728_v51 = vpop.f32.mrf.mxu0  ;;  %v1240_v17 = vadd.f32 %v1159_v34, %v6288_v9  ;;  %v4169_v24 = vpack.c.b16 %v4141_v38, %v4140_v42  ;;  %v5710_v9 = vld [vmem:[%s5954_s7 + $0x50] sm:$0x1]  ;;  %v3862_v21 = vrot.slane %v3861_v39, 4  ;;  %v5646_v42 = vld [vmem:[%s5954_s7 + $0x54] sm:$0xf] }
 0x17b   : > { %v4546_v62 = vrot.slane %v4544_v48, 4  ;;  %v4547_v32 = vrot.slane %v5710_v9, 5  ;;  %v5647_v38 = vld [vmem:[%s5954_s7 + $0x58] sm:$0xf]  ;;  %v2982_v50 = vsel %vm6015_vm7, %v2980_v28, %v2981_v61  ;;  %v3869_v39 = vshrl.u32 %v5646_v42, 16 }
 0x17c   : > { %v6771_v60 = vadd.f32 %v2726_v1, %v2090_v53  ;;  %v5489_v53 = vrot.slane %v5449_v33, 9  ;;  %v3867_v33 = vsel %vm6011_vm6, %v3862_v21, %v3866_v45  ;;  %v3872_v6 = vshll.u32 %v5646_v42, 16  ;;  %v5453_v9 = vld [vmem:[%s5954_s7 + $0x4c] sm:$0xf]  ;;  %v5648_v21 = vld [vmem:[%s5954_s7 + $0x5c] sm:$0x1] }
 0x17d   : > { %v4548_v29 = vsel %vm6015_vm7, %v4546_v62, %v4547_v32  ;;  %v3071_v14 = vunpack.c.l.b16 %v2982_v50  ;;  %v5452_v50 = vld [vmem:[%s5954_s7 + $0x48] sm:$0xe] }
 0x17e   : > { %v2979_v13 = vsel %vm6015_vm7, %v5489_v53, %v2978_v22  ;;  %v3874_v53 = vrot.slane %v3872_v6, 5  ;;  %v5490_v6 = vrot.slane %v5452_v50, 9 }
 0x17f   : > { %v1656_v2 = vpop.f32.mrf.mxu2 }
 0x180   : > { %v1737_v1 = vadd.f32 %v1656_v2, %v1240_v17  ;;  %v2010_v35 = vpop.f32.mrf.mxu3 }
 0x181   : > { %v1162_v4 = vpop.f32.mrf.mxu1 }
 0x182   : > { %v2091_v34 = vadd.f32 %v2010_v35, %v1737_v1  ;;  %v2731_v25 = vpop.f32.mrf.mxu0  ;;  %v1241_v49 = vadd.f32 %v1162_v4, %v6309_v59  ;;  %v4545_v59 = vsel %vm6015_vm7, %v5748_v16, %v4544_v48  ;;  %v3878_v1 = vshll.u32 %v5647_v38, 16  ;;  %v5712_v16 = vld [vmem:[%s5954_s7 + $0x58] sm:$0xf] }
 0x183   : > { %v3882_v35 = vshrl.u32 %v5647_v38, 16  ;;  %v4637_v48 = vunpack.c.l.b16 %v4548_v29  ;;  %v2985_v38 = vrot.slane %v5453_v9, 5  ;;  %v4551_v29 = vrot.slane %v5712_v16, 5 }
 0x184   : > { %5505 = vmatmul.msk.bf16.gmra.mxu1 %vm388_vm1, %v3097_v20  ;;  %5618 = vmatmul.msk.bf16.gmra.mxu2 %vm388_vm1, %v5815_v8  ;;  %v6783_v26 = vadd.f32 %v2728_v51, %v2091_v34  ;;  %v3857_v51 = vsel %vm6011_vm6, %v3852_v31, %v6768_v3  ;;  %v3070_v8 = vunpack.c.l.b16 %v2979_v13  ;;  %v3871_v34 = vrot.slane %v3869_v39, 4  ;;  %v5713_v39 = vld [vmem:[%s5954_s7 + $0x5c] sm:$0x1] }
 0x185   : > { %5683 = vmatmul.msk.bf16.gmra.mxu3 %vm388_vm1, %v4169_v24  ;;  %5764 = vmatmul.msk.bf16.gmra.mxu0 %vm388_vm1, %v4663_v18  ;;  %v4142_v4 = vunpack.c.l.b16 %v3857_v51  ;;  %v4143_v24 = vunpack.c.l.b16 %v3867_v33  ;;  %v4636_v18 = vunpack.c.l.b16 %v4545_v59  ;;  %v6806_v28 = vrot.slane %v3878_v1, 5  ;;  %v5454_v59 = vld [vmem:[%s5954_s7 + $0x50] sm:$0x1] }
 0x186   : > { %v3884_v61 = vrot.slane %v3882_v35, 4  ;;  %v3875_v51 = vor.u32 %v3874_v53, %v3871_v34  ;;  %v2987_v1 = vrot.slane %v2985_v38, 4  ;;  %v5649_v35 = vld [vmem:[%s5954_s7 + $0x60] sm:$0xf]  ;;  %v4553_v34 = vrot.slane %v4551_v29, 4 }
 0x187   : > { %v1659_v36 = vpop.f32.mrf.mxu2  ;;  %v4170_v42 = vpack.c.b16 %v4143_v24, %v4142_v4  ;;  %v4664_v13 = vpack.c.b16 %v4637_v48, %v4636_v18  ;;  %v4554_v53 = vrot.slane %v5713_v39, 5  ;;  %v5651_v39 = vld [vmem:[%s5954_s7 + $0x68] sm:$0x1] }
 0x188   : > { %v1738_v17 = vadd.f32 %v1659_v36, %v1241_v49  ;;  %v2013_v2 = vpop.f32.mrf.mxu3  ;;  %v3098_v49 = vpack.c.b16 %v3071_v14, %v3070_v8  ;;  %v2988_v14 = vrot.slane %v5454_v59, 5  ;;  %v3876_v4 = vrot.slane %v3875_v51, 4 }
 0x189   : > { %v1164_v22 = vpop.f32.mrf.mxu1  ;;  %v4555_v51 = vsel %vm6015_vm7, %v4553_v34, %v4554_v53 }
 0x18a   : > { %v2092_v20 = vadd.f32 %v2013_v2, %v1738_v17  ;;  %v2733_v3 = vpop.f32.mrf.mxu0  ;;  %v1242_v31 = vadd.f32 %v1164_v22, %v6338_v56  ;;  %v3885_v56 = vor.u32 %v3884_v61, %v6806_v28  ;;  %v3888_v17 = vshll.u32 %v5648_v21, 16  ;;  %v5711_v22 = vld [vmem:[%s5954_s7 + $0x54] sm:$0xe] }
 0x18b   : > { %v5749_v9 = vrot.slane %v5711_v22, 9  ;;  %v3896_v21 = vshll.u32 %v5649_v35, 16 }
 0x18c   : > { %v6803_v58 = vadd.f32 %v2731_v25, %v2092_v20  ;;  %v5816_v25 = vld [vmem:[%s5954_s7 + $0x48] sm:$0xff]  ;;  %v5650_v20 = vld [vmem:[%s5954_s7 + $0x64] sm:$0xf]  ;;  %v3886_v24 = vrot.slane %v3885_v56, 4  ;;  %v3890_v18 = vrot.slane %v3888_v17, 5 }
 0x18d   : > { %v4552_v50 = vsel %vm6015_vm7, %v5749_v9, %v4551_v29  ;;  %v3898_v17 = vrot.slane %v3896_v21, 5  ;;  %v5455_v9 = vld [vmem:[%s5954_s7 + $0x54] sm:$0xe] }
 0x18e   : > { %v4638_v29 = vunpack.c.l.b16 %v4552_v50  ;;  %v5491_v50 = vrot.slane %v5455_v9, 9 }
 0x18f   : > { %v1661_v45 = vpop.f32.mrf.mxu2 }
 0x190   : > { %v1739_v62 = vadd.f32 %v1661_v45, %v1242_v31  ;;  %v2015_v32 = vpop.f32.mrf.mxu3  ;;  %v3893_v31 = vshrl.u32 %v5649_v35, 16  ;;  %v3902_v45 = vshll.u32 %v5650_v20, 16 }
 0x191   : > { %v1167_v36 = vpop.f32.mrf.mxu1 }
 0x192   : > { %v2093_v2 = vadd.f32 %v2015_v32, %v1739_v62  ;;  %v2736_v33 = vpop.f32.mrf.mxu0  ;;  %v1243_v48 = vadd.f32 %v1167_v36, %v6171_v63  ;;  %v3881_v63 = vsel %vm6011_vm6, %v3876_v4, %v6806_v28  ;;  %v3895_v56 = vrot.slane %v3893_v31, 4  ;;  %v7335_v4 = vld [vmem:[#allocation4_spill] sm:$0xff] }
 0x194   : > { %5506 = vmatmul.msk.bf16.gmra.mxu1 %vm388_vm1, %v3098_v49  ;;  %5619 = vmatmul.msk.bf16.gmra.mxu2 %vm388_vm1, %v5816_v25  ;;  %v6821_v8 = vadd.f32 %v2733_v3, %v2093_v2  ;;  %v3906_v3 = vshrl.u32 %v5650_v20, 16  ;;  %v2986_v49 = vsel %vm6015_vm7, %v5490_v6, %v2985_v38  ;;  %v2989_v25 = vsel %vm6015_vm7, %v2987_v1, %v2988_v14  ;;  %v5456_v38 = vld [vmem:[%s5954_s7 + $0x58] sm:$0xf]  ;;  %v5715_v14 = vld [vmem:[%s5954_s7 + $0x64] sm:$0xf] }
 0x195   : > { %5684 = vmatmul.msk.bf16.gmra.mxu3 %vm388_vm1, %v4170_v42  ;;  %5765 = vmatmul.msk.bf16.gmra.mxu0 %vm388_vm1, %v4664_v13  ;;  %v3891_v13 = vsel %vm6011_vm6, %v3886_v24, %v3890_v18  ;;  %v6840_v2 = vrot.slane %v3902_v45, 5  ;;  %v3072_v28 = vunpack.c.l.b16 %v2986_v49  ;;  %v3073_v22 = vunpack.c.l.b16 %v2989_v25  ;;  %v5817_v45 = vld [vmem:[%s5954_s7 + $0x54] sm:$0xff] }
 0x196   : > { %v3908_v59 = vrot.slane %v3906_v3, 4  ;;  %v4144_v1 = vunpack.c.l.b16 %v3881_v63  ;;  %v4145_v35 = vunpack.c.l.b16 %v3891_v13  ;;  %v4639_v20 = vunpack.c.l.b16 %v4555_v51  ;;  %v5457_v3 = vld [vmem:[%s5954_s7 + $0x5c] sm:$0x1]  ;;  %v5714_v63 = vld [vmem:[%s5954_s7 + $0x60] sm:$0xe] }
 0x197   : > { %v1664_v61 = vpop.f32.mrf.mxu2  ;;  %v2992_v18 = vrot.slane %v5456_v38, 5  ;;  %v3899_v34 = vor.u32 %v3898_v17, %v3895_v56  ;;  %v3099_v21 = vpack.c.b16 %v3073_v22, %v3072_v28  ;;  %v2995_v38 = vrot.slane %v5457_v3, 5 }
 0x198   : > { %v1740_v16 = vadd.f32 %v1664_v61, %v1243_v48  ;;  %v2018_v62 = vpop.f32.mrf.mxu3  ;;  %v3909_v53 = vor.u32 %v3908_v59, %v6840_v2  ;;  %v3912_v61 = vshll.u32 %v5651_v39, 16  ;;  %v4171_v49 = vpack.c.b16 %v4145_v35, %v4144_v1  ;;  %v7336_v35 = vld [vmem:[#allocation5_spill] sm:$0xff] }
 0x199   : > { %v1169_v32 = vpop.f32.mrf.mxu1  ;;  %v4665_v25 = vpack.c.b16 %v4639_v20, %v4638_v29  ;;  %v2994_v51 = vrot.slane %v2992_v18, 4  ;;  %v3900_v56 = vrot.slane %v3899_v34, 4  ;;  %v5750_v28 = vrot.slane %v5714_v63, 9  ;;  %v5652_v20 = vld [vmem:[%s5954_s7 + $0x6c] sm:$0xf] }
 0x19a   : > { %v2094_v42 = vadd.f32 %v2018_v62, %v1740_v16  ;;  %v2738_v36 = vpop.f32.mrf.mxu0  ;;  %v1244_v24 = vadd.f32 %v1169_v32, %v7335_v4  ;;  %v4558_v16 = vrot.slane %v5715_v14, 5  ;;  %v5716_v32 = vld [vmem:[%s5954_s7 + $0x68] sm:$0x1]  ;;  %v3910_v17 = vrot.slane %v3909_v53, 4  ;;  %v5653_v14 = vld [vmem:[%s5954_s7 + $0x70] sm:$0xf] }
 0x19b   : > { %v3914_v59 = vrot.slane %v3912_v61, 5  ;;  %v4561_v39 = vrot.slane %v5716_v32, 5  ;;  %v3930_v3 = vshrl.u32 %v5653_v14, 16 }
 0x19c   : > { %v6843_v6 = vadd.f32 %v2736_v33, %v2094_v42  ;;  %v4560_v22 = vrot.slane %v4558_v16, 4  ;;  %v4559_v61 = vsel %vm6015_vm7, %v5750_v28, %v4558_v16  ;;  %v7337_v28 = vld [vmem:[#allocation6_spill] sm:$0xff] }
 0x19d   : > { %v3915_v53 = vsel %vm6011_vm6, %v3910_v17, %v3914_v59  ;;  %v3932_v59 = vrot.slane %v3930_v3, 4  ;;  %v5717_v3 = vld [vmem:[%s5954_s7 + $0x6c] sm:$0xe] }
 0x19e   : > { %v4147_v32 = vunpack.c.l.b16 %v3915_v53 }
 0x19f   : > { %v1666_v48 = vpop.f32.mrf.mxu2 }
 0x1a0   : > { %v1741_v33 = vadd.f32 %v1666_v48, %v1244_v24  ;;  %v2020_v31 = vpop.f32.mrf.mxu3  ;;  %v2993_v24 = vsel %vm6015_vm7, %v5491_v50, %v2992_v18  ;;  %v2996_v48 = vsel %vm6015_vm7, %v2994_v51, %v2995_v38  ;;  %v5459_v51 = vld [vmem:[%s5954_s7 + $0x64] sm:$0xf] }
 0x1a1   : > { %v1172_v62 = vpop.f32.mrf.mxu1 }
 0x1a2   : > { %v2095_v42 = vadd.f32 %v2020_v31, %v1741_v33  ;;  %v2741_v13 = vpop.f32.mrf.mxu0  ;;  %v1245_v29 = vadd.f32 %v1172_v62, %v7336_v35  ;;  %v4562_v33 = vsel %vm6015_vm7, %v4560_v22, %v4561_v39  ;;  %v3917_v31 = vshrl.u32 %v5652_v20, 16  ;;  %v5654_v39 = vld [vmem:[%s5954_s7 + $0x74] sm:$0x1] }
 0x1a3   : > { %v4641_v16 = vunpack.c.l.b16 %v4562_v33  ;;  %v3936_v33 = vshll.u32 %v5654_v39, 16 }
 0x1a4   : > { %5507 = vmatmul.msk.bf16.gmra.mxu1 %vm388_vm1, %v3099_v21  ;;  %5620 = vmatmul.msk.bf16.gmra.mxu2 %vm388_vm1, %v5817_v45  ;;  %v6855_v1 = vadd.f32 %v2738_v36, %v2095_v42  ;;  %v3905_v36 = vsel %vm6011_vm6, %v3900_v56, %v6840_v2  ;;  %v3920_v21 = vshll.u32 %v5652_v20, 16  ;;  %v3926_v45 = vshll.u32 %v5653_v14, 16 }
 0x1a5   : > { %5685 = vmatmul.msk.bf16.gmra.mxu3 %vm388_vm1, %v4171_v49  ;;  %5766 = vmatmul.msk.bf16.gmra.mxu0 %vm388_vm1, %v4665_v25  ;;  %v3074_v49 = vunpack.c.l.b16 %v2993_v24  ;;  %v3075_v25 = vunpack.c.l.b16 %v2996_v48  ;;  %v4146_v63 = vunpack.c.l.b16 %v3905_v36  ;;  %v4640_v42 = vunpack.c.l.b16 %v4559_v61 }
 0x1a6   : > { %v3919_v38 = vrot.slane %v3917_v31, 4  ;;  %v3922_v56 = vrot.slane %v3920_v21, 5  ;;  %v6878_v17 = vrot.slane %v3926_v45, 5  ;;  %v2999_v48 = vrot.slane %v5459_v51, 5  ;;  %v5460_v21 = vld [vmem:[%s5954_s7 + $0x68] sm:$0x1] }
 0x1a7   : > { %v1669_v4 = vpop.f32.mrf.mxu2  ;;  %v4172_v24 = vpack.c.b16 %v4147_v32, %v4146_v63  ;;  %v5655_v63 = vld [vmem:[%s5954_s7 + $0x78] sm:$0xf]  ;;  %v5656_v32 = vld [vmem:[%s5954_s7 + $0x7c] sm:$0xf] }
 0x1a8   : > { %v1742_v9 = vadd.f32 %v1669_v4, %v1245_v29  ;;  %v2023_v34 = vpop.f32.mrf.mxu3  ;;  %v5718_v29 = vld [vmem:[%s5954_s7 + $0x70] sm:$0xf]  ;;  %v3100_v4 = vpack.c.b16 %v3075_v25, %v3074_v49  ;;  %v3923_v53 = vor.u32 %v3922_v56, %v3919_v38  ;;  %v3933_v61 = vor.u32 %v3932_v59, %v6878_v17  ;;  %v7339_v59 = vld [vmem:[#allocation7_spill] sm:$0xff] }
 0x1a9   : > { %v1174_v18 = vpop.f32.mrf.mxu1  ;;  %v4565_v45 = vrot.slane %v5718_v29, 5  ;;  %v3001_v25 = vrot.slane %v2999_v48, 4  ;;  %v3938_v56 = vrot.slane %v3936_v33, 5 }
 0x1aa   : > { %v2096_v62 = vadd.f32 %v2023_v34, %v1742_v9  ;;  %v2743_v2 = vpop.f32.mrf.mxu0  ;;  %v1246_v22 = vadd.f32 %v1174_v18, %v7337_v28  ;;  %v4666_v9 = vpack.c.b16 %v4641_v16, %v4640_v42  ;;  %v5458_v34 = vld [vmem:[%s5954_s7 + $0x60] sm:$0xe]  ;;  %v3002_v16 = vrot.slane %v5460_v21, 5 }
 0x1ab   : > { %v5492_v49 = vrot.slane %v5458_v34, 9  ;;  %v3924_v51 = vrot.slane %v3923_v53, 4  ;;  %v3934_v38 = vrot.slane %v3933_v61, 4  ;;  %v4567_v39 = vrot.slane %v4565_v45, 4 }
 0x1ac   : > { %v6875_v50 = vadd.f32 %v2741_v13, %v2096_v62  ;;  %v5818_v13 = vld [vmem:[%s5954_s7 + $0x60] sm:$0xff]  ;;  %v5719_v62 = vld [vmem:[%s5954_s7 + $0x74] sm:$0x1]  ;;  %v3003_v53 = vsel %vm6015_vm7, %v3001_v25, %v3002_v16 }
 0x1ad   : > { %v5657_v16 = vld [vmem:[%s5954_s7 + $0x80] sm:$0x1] }
 0x1af   : > { %v1671_v35 = vpop.f32.mrf.mxu2 }
 0x1b0   : > { %v1743_v20 = vadd.f32 %v1671_v35, %v1246_v22  ;;  %v2025_v14 = vpop.f32.mrf.mxu3  ;;  %v5751_v22 = vrot.slane %v5717_v3, 9  ;;  %v4568_v35 = vrot.slane %v5719_v62, 5 }
 0x1b1   : > { %v1177_v36 = vpop.f32.mrf.mxu1 }
 0x1b2   : > { %v2097_v18 = vadd.f32 %v2025_v14, %v1743_v20  ;;  %v2746_v31 = vpop.f32.mrf.mxu0  ;;  %v1247_v28 = vadd.f32 %v1177_v36, %v7339_v59  ;;  %v3941_v20 = vshrl.u32 %v5655_v63, 16  ;;  %v3944_v14 = vshll.u32 %v5655_v63, 16 }
 0x1b3   : > { %v3929_v36 = vsel %vm6011_vm6, %v3924_v51, %v6878_v17  ;;  %v4566_v21 = vsel %vm6015_vm7, %v5751_v22, %v4565_v45  ;;  %v4569_v3 = vsel %vm6015_vm7, %v4567_v39, %v4568_v35  ;;  %v3077_v63 = vunpack.c.l.b16 %v3003_v53  ;;  %v7341_v22 = vld [vmem:[#allocation8_spill] sm:$0xff]  ;;  %v5819_v53 = vld [vmem:[%s5954_s7 + $0x6c] sm:$0xff] }
 0x1b4   : > { %5508 = vmatmul.msk.bf16.gmra.mxu1 %vm388_vm1, %v3100_v4  ;;  %5621 = vmatmul.msk.bf16.gmra.mxu2 %vm388_vm1, %v5818_v13  ;;  %v6893_v42 = vadd.f32 %v2743_v2, %v2097_v18  ;;  %v3950_v4 = vshll.u32 %v5656_v32, 16  ;;  %v3954_v13 = vshrl.u32 %v5656_v32, 16  ;;  %v3939_v18 = vsel %vm6011_vm6, %v3934_v38, %v3938_v56  ;;  %v5462_v32 = vld [vmem:[%s5954_s7 + $0x70] sm:$0xf] }
 0x1b5   : > { %5686 = vmatmul.msk.bf16.gmra.mxu3 %vm388_vm1, %v4172_v24  ;;  %5767 = vmatmul.msk.bf16.gmra.mxu0 %vm388_vm1, %v4666_v9  ;;  %v3000_v9 = vsel %vm6015_vm7, %v5492_v49, %v2999_v48  ;;  %v3943_v48 = vrot.slane %v3941_v20, 4  ;;  %v3946_v62 = vrot.slane %v3944_v14, 5  ;;  %v4148_v38 = vunpack.c.l.b16 %v3929_v36  ;;  %v5463_v20 = vld [vmem:[%s5954_s7 + $0x74] sm:$0x1] }
 0x1b6   : > { %7338 = vst [vmem:[#allocation4_spill] sm:$0xff] %v6893_v42  ;;  %v6911_v49 = vrot.slane %v3950_v4, 5  ;;  %v3956_v25 = vrot.slane %v3954_v13, 4  ;;  %v3076_v17 = vunpack.c.l.b16 %v3000_v9  ;;  %v4149_v56 = vunpack.c.l.b16 %v3939_v18 }
 0x1b7   : > { %v1674_v29 = vpop.f32.mrf.mxu2  ;;  %v4642_v45 = vunpack.c.l.b16 %v4566_v21  ;;  %v4643_v59 = vunpack.c.l.b16 %v4569_v3  ;;  %v3006_v14 = vrot.slane %v5462_v32, 5  ;;  %v3947_v4 = vor.u32 %v3946_v62, %v3943_v48  ;;  %v5720_v3 = vld [vmem:[%s5954_s7 + $0x78] sm:$0xe] }
 0x1b8   : > { %v1744_v2 = vadd.f32 %v1674_v29, %v1247_v28  ;;  %v2028_v34 = vpop.f32.mrf.mxu3  ;;  %v5721_v28 = vld [vmem:[%s5954_s7 + $0x7c] sm:$0xf]  ;;  %v5461_v29 = vld [vmem:[%s5954_s7 + $0x6c] sm:$0xe]  ;;  %v3957_v13 = vor.u32 %v3956_v25, %v6911_v49  ;;  %v3101_v9 = vpack.c.b16 %v3077_v63, %v3076_v17  ;;  %v4173_v18 = vpack.c.b16 %v4149_v56, %v4148_v38 }
 0x1b9   : > { %v1179_v24 = vpop.f32.mrf.mxu1  ;;  %v4572_v36 = vrot.slane %v5721_v28, 5  ;;  %v4667_v21 = vpack.c.b16 %v4643_v59, %v4642_v45  ;;  %v5493_v42 = vrot.slane %v5461_v29, 9  ;;  %v3009_v32 = vrot.slane %v5463_v20, 5  ;;  %v7343_v45 = vld [vmem:[#allocation9_spill] sm:$0xff]  ;;  %v5658_v28 = vld [vmem:[%s5954_s7 + $0x84] sm:$0xf] }
 0x1ba   : > { %v2098_v61 = vadd.f32 %v2028_v34, %v1744_v2  ;;  %v2748_v33 = vpop.f32.mrf.mxu0  ;;  %v1248_v39 = vadd.f32 %v1179_v24, %v7341_v22  ;;  %v3960_v2 = vshll.u32 %v5657_v16, 16  ;;  %v5722_v24 = vld [vmem:[%s5954_s7 + $0x80] sm:$0x1]  ;;  %v3008_v48 = vrot.slane %v3006_v14, 4 }
 0x1bb   : > { %v3948_v62 = vrot.slane %v3947_v4, 4  ;;  %v3958_v25 = vrot.slane %v3957_v13, 4  ;;  %v5752_v17 = vrot.slane %v5720_v3, 9  ;;  %v4574_v63 = vrot.slane %v4572_v36, 4 }
 0x1bc   : > { %v6915_v51 = vadd.f32 %v2746_v31, %v2098_v61  ;;  %v3962_v16 = vrot.slane %v3960_v2, 5  ;;  %v4575_v38 = vrot.slane %v5722_v24, 5  ;;  %v3007_v29 = vsel %vm6015_vm7, %v5493_v42, %v3006_v14 }
 0x1bd   : > { %v3010_v20 = vsel %vm6015_vm7, %v3008_v48, %v3009_v32  ;;  %v3965_v14 = vshrl.u32 %v5658_v28, 16 }
 0x1be   : > { %7340 = vst [vmem:[#allocation5_spill] sm:$0xff] %v6915_v51  ;;  %v3963_v2 = vsel %vm6011_vm6, %v3958_v25, %v3962_v16  ;;  %v3079_v3 = vunpack.c.l.b16 %v3010_v20 }
 0x1bf   : > { %v1676_v35 = vpop.f32.mrf.mxu2  ;;  %v3967_v25 = vrot.slane %v3965_v14, 4 }
 0x1c0   : > { %v1745_v31 = vadd.f32 %v1676_v35, %v1248_v39  ;;  %v2030_v34 = vpop.f32.mrf.mxu3  ;;  %v5659_v39 = vld [vmem:[%s5954_s7 + $0x88] sm:$0xf] }
 0x1c1   : > { %v1182_v61 = vpop.f32.mrf.mxu1 }
 0x1c2   : > { %v2099_v22 = vadd.f32 %v2030_v34, %v1745_v31  ;;  %v2751_v51 = vpop.f32.mrf.mxu0  ;;  %v1249_v59 = vadd.f32 %v1182_v61, %v7343_v45  ;;  %v4573_v31 = vsel %vm6015_vm7, %v5752_v17, %v4572_v36  ;;  %v4576_v34 = vsel %vm6015_vm7, %v4574_v63, %v4575_v38  ;;  %v7345_v38 = vld [vmem:[#allocation10_spill] sm:$0xff] }
 0x1c3   : > { %v3978_v61 = vshrl.u32 %v5659_v39, 16  ;;  %v4644_v32 = vunpack.c.l.b16 %v4573_v31  ;;  %v4645_v36 = vunpack.c.l.b16 %v4576_v34  ;;  %v5464_v31 = vld [vmem:[%s5954_s7 + $0x78] sm:$0xe] }
 0x1c4   : > { %5509 = vmatmul.msk.bf16.gmra.mxu1 %vm388_vm1, %v3101_v9  ;;  %5622 = vmatmul.msk.bf16.gmra.mxu2 %vm388_vm1, %v5819_v53  ;;  %v6927_v56 = vadd.f32 %v2748_v33, %v2099_v22  ;;  %v3953_v33 = vsel %vm6011_vm6, %v3948_v62, %v6911_v49  ;;  %v3968_v9 = vshll.u32 %v5658_v28, 16  ;;  %v3974_v53 = vshll.u32 %v5659_v39, 16  ;;  %v5465_v62 = vld [vmem:[%s5954_s7 + $0x7c] sm:$0xf]  ;;  %v5724_v39 = vld [vmem:[%s5954_s7 + $0x88] sm:$0xf] }
 0x1c5   : > { %5687 = vmatmul.msk.bf16.gmra.mxu3 %vm388_vm1, %v4173_v18  ;;  %5768 = vmatmul.msk.bf16.gmra.mxu0 %vm388_vm1, %v4667_v21  ;;  %v3078_v21 = vunpack.c.l.b16 %v3007_v29  ;;  %v4150_v24 = vunpack.c.l.b16 %v3953_v33  ;;  %v4151_v22 = vunpack.c.l.b16 %v3963_v2  ;;  %v3980_v63 = vrot.slane %v3978_v61, 4  ;;  %v5466_v61 = vld [vmem:[%s5954_s7 + $0x80] sm:$0x1] }
 0x1c6   : > { %7342 = vst [vmem:[#allocation6_spill] sm:$0xff] %v6927_v56  ;;  %v3970_v16 = vrot.slane %v3968_v9, 5  ;;  %v6950_v17 = vrot.slane %v3974_v53, 5  ;;  %v4668_v2 = vpack.c.b16 %v4645_v36, %v4644_v32  ;;  %v5661_v32 = vld [vmem:[%s5954_s7 + $0x90] sm:$0xf] }
 0x1c7   : > { %v1679_v35 = vpop.f32.mrf.mxu2  ;;  %v3102_v20 = vpack.c.b16 %v3079_v3, %v3078_v21  ;;  %v4174_v33 = vpack.c.b16 %v4151_v22, %v4150_v24  ;;  %v5723_v21 = vld [vmem:[%s5954_s7 + $0x84] sm:$0xe]  ;;  %v5725_v3 = vld [vmem:[%s5954_s7 + $0x8c] sm:$0x1]  ;;  %v5494_v24 = vrot.slane %v5464_v31, 9 }
 0x1c8   : > { %v1746_v4 = vadd.f32 %v1679_v35, %v1249_v59  ;;  %v2033_v13 = vpop.f32.mrf.mxu3  ;;  %v5660_v59 = vld [vmem:[%s5954_s7 + $0x8c] sm:$0x1]  ;;  %v3971_v34 = vor.u32 %v3970_v16, %v3967_v25  ;;  %v5662_v36 = vld [vmem:[%s5954_s7 + $0x94] sm:$0xf]  ;;  %v3016_v25 = vrot.slane %v5466_v61, 5 }
 0x1c9   : > { %v1184_v42 = vpop.f32.mrf.mxu1  ;;  %v3984_v14 = vshll.u32 %v5660_v59, 16  ;;  %v5753_v59 = vrot.slane %v5723_v21, 9 }
 0x1ca   : > { %v2100_v18 = vadd.f32 %v2033_v13, %v1746_v4  ;;  %v2753_v49 = vpop.f32.mrf.mxu0  ;;  %v1250_v45 = vadd.f32 %v1184_v42, %v7345_v38  ;;  %v3013_v4 = vrot.slane %v5465_v62, 5  ;;  %v3981_v42 = vor.u32 %v3980_v63, %v6950_v17 }
 0x1cb   : > { %v3972_v16 = vrot.slane %v3971_v34, 4  ;;  %v3986_v38 = vrot.slane %v3984_v14, 5 }
 0x1cc   : > { %v6947_v48 = vadd.f32 %v2751_v51, %v2100_v18  ;;  %v5820_v51 = vld [vmem:[%s5954_s7 + $0x78] sm:$0xff]  ;;  %v4579_v18 = vrot.slane %v5724_v39, 5  ;;  %v3015_v22 = vrot.slane %v3013_v4, 4  ;;  %v3982_v63 = vrot.slane %v3981_v42, 4 }
 0x1cd   : > { %v4582_v39 = vrot.slane %v5725_v3, 5  ;;  %v3014_v34 = vsel %vm6015_vm7, %v5494_v24, %v3013_v4  ;;  %v5468_v4 = vld [vmem:[%s5954_s7 + $0x88] sm:$0xf] }
 0x1ce   : > { %7344 = vst [vmem:[#allocation7_spill] sm:$0xff] %v6947_v48  ;;  %v3987_v61 = vsel %vm6011_vm6, %v3982_v63, %v3986_v38  ;;  %v4580_v21 = vsel %vm6015_vm7, %v5753_v59, %v4579_v18  ;;  %v5663_v63 = vld [vmem:[%s5954_s7 + $0x98] sm:$0x1] }
 0x1cf   : > { %v1681_v28 = vpop.f32.mrf.mxu2  ;;  %v4646_v59 = vunpack.c.l.b16 %v4580_v21 }
 0x1d0   : > { %v1747_v35 = vadd.f32 %v1681_v28, %v1250_v45  ;;  %v2035_v29 = vpop.f32.mrf.mxu3  ;;  %v4581_v28 = vrot.slane %v4579_v18, 4 }
 0x1d1   : > { %v3170_v13 = vpop.f32.mrf.mxu1 }
 0x1d2   : > { %v2101_v9 = vadd.f32 %v2035_v29, %v1747_v35  ;;  %v4736_v53 = vpop.f32.mrf.mxu0  ;;  %v3282_v45 = vadd.f32 %v3170_v13, %v6393_v11  ;;  %v3989_v29 = vshrl.u32 %v5661_v32, 16  ;;  %v3017_v11 = vsel %vm6015_vm7, %v3015_v22, %v3016_v25  ;;  %v6995_v25 = vld [vmem:[%s7322_s3] ss:$0 sm:$0xff] }
 0x1d3   : > { %v3977_v13 = vsel %vm6011_vm6, %v3972_v16, %v6950_v17  ;;  %v4583_v3 = vsel %vm6015_vm7, %v4581_v28, %v4582_v39  ;;  %v3080_v16 = vunpack.c.l.b16 %v3014_v34  ;;  %v3081_v18 = vunpack.c.l.b16 %v3017_v11  ;;  %v5727_v39 = vld [vmem:[%s5954_s7 + $0x94] sm:$0xf] }
 0x1d4   : > { %5510 = vmatmul.msk.bf16.gmra.mxu1 %vm388_vm1, %v3102_v20  ;;  %5623 = vmatmul.msk.bf16.gmra.mxu2 %vm388_vm1, %v5820_v51  ;;  %v6967_v62 = vadd.f32 %v2753_v49, %v2101_v9  ;;  %v3992_v20 = vshll.u32 %v5661_v32, 16  ;;  %v3998_v49 = vshll.u32 %v5662_v36, 16  ;;  %v4002_v51 = vshrl.u32 %v5662_v36, 16 }
 0x1d5   : > { %5688 = vmatmul.msk.bf16.gmra.mxu3 %vm388_vm1, %v4174_v33  ;;  %5769 = vmatmul.msk.bf16.gmra.mxu0 %vm388_vm1, %v4668_v2  ;;  %v6973_v2 = vstv %s6956_s16  ;;  %v3991_v24 = vrot.slane %v3989_v29, 4  ;;  %v4152_v38 = vunpack.c.l.b16 %v3977_v13  ;;  %v4647_v28 = vunpack.c.l.b16 %v4583_v3 }
 0x1d6   : > { %7346 = vst [vmem:[#allocation8_spill] sm:$0xff] %v6967_v62  ;;  %v3994_v22 = vrot.slane %v3992_v20, 5  ;;  %v6989_v32 = vrot.slane %v3998_v49, 5  ;;  %v4004_v36 = vrot.slane %v4002_v51, 4  ;;  %v5467_v49 = vld [vmem:[%s5954_s7 + $0x84] sm:$0xe] }
 0x1d7   : > { %v3524_v35 = vpop.f32.mrf.mxu2  ;;  %v5728_v62 = vld [vmem:[%s5954_s7 + $0x98] sm:$0x1] }
 0x1d8   : > { %v3636_v31 = vadd.f32 %v3524_v35, %v3282_v45  ;;  %v4242_v33 = vpop.f32.mrf.mxu3  ;;  %v4153_v45 = vunpack.c.l.b16 %v3987_v61  ;;  %v3995_v51 = vor.u32 %v3994_v22, %v3991_v24  ;;  %v4586_v61 = vrot.slane %v5727_v39, 5  ;;  %v5664_v39 = vld [vmem:[%s5954_s7 + $0x9c] sm:$0xf] }
 0x1d9   : > { %v3172_v9 = vpop.f32.mrf.mxu1  ;;  %v5495_v24 = vrot.slane %v5467_v49, 9 }
 0x1da   : > { %v4354_v42 = vadd.f32 %v4242_v33, %v3636_v31  ;;  %v4738_v14 = vpop.f32.mrf.mxu0  ;;  %v3283_v29 = vadd.f32 %v3172_v9, %v6395_v47  ;;  %v4005_v31 = vor.u32 %v4004_v36, %v6989_v32  ;;  %v4008_v33 = vshll.u32 %v5663_v63, 16  ;;  %v5821_v9 = vld [vmem:[%s5954_s7 + $0x84] sm:$0xff] }
 0x1db   : > { %v3103_v47 = vpack.c.b16 %v3081_v18, %v3080_v16  ;;  %v4175_v3 = vpack.c.b16 %v4153_v45, %v4152_v38  ;;  %v3996_v63 = vrot.slane %v3995_v51, 4  ;;  %v4588_v38 = vrot.slane %v4586_v61, 4 }
 0x1dc   : > { %v4848_v17 = vadd.f32 %v4736_v53, %v4354_v42  ;;  %v3020_v53 = vrot.slane %v5468_v4, 5  ;;  %v5469_v42 = vld [vmem:[%s5954_s7 + $0x8c] sm:$0x1]  ;;  %v4669_v4 = vpack.c.b16 %v4647_v28, %v4646_v59  ;;  %v4589_v45 = vrot.slane %v5728_v62, 5 }
 0x1dd   : > { %v3023_v36 = vrot.slane %v5469_v42, 5  ;;  %v4001_v62 = vsel %vm6011_vm6, %v3996_v63, %v6989_v32  ;;  %v5471_v63 = vld [vmem:[%s5954_s7 + $0x94] sm:$0xf] }
 0x1de   : > { %v4882_v35 = vmul.f32 %v6973_v2, %v4848_v17  ;;  %v5726_v17 = vld [vmem:[%s5954_s7 + $0x90] sm:$0xe]  ;;  %v3022_v22 = vrot.slane %v3020_v53, 4 }
 0x1df   : > { %v3526_v20 = vpop.f32.mrf.mxu2  ;;  %v5754_v18 = vrot.slane %v5726_v17, 9  ;;  %v4154_v17 = vunpack.c.l.b16 %v4001_v62 }
 0x1e0   : > { %v4918_v34 = vadd.f32 %v6995_v25, %v4882_v35  ;;  %v3637_v11 = vadd.f32 %v3526_v20, %v3283_v29  ;;  %v4244_v13 = vpop.f32.mrf.mxu3  ;;  %v4006_v35 = vrot.slane %v4005_v31, 4  ;;  %v4010_v29 = vrot.slane %v4008_v33, 5  ;;  %v5665_v20 = vld [vmem:[%s5954_s7 + $0xa0] sm:$0xf] }
 0x1e1   : > { %v3175_v21 = vpop.f32.mrf.mxu1  ;;  %v4026_v42 = vshrl.u32 %v5665_v20, 16 }
 0x1e2   : > { %4950 = vst [vmem:[%s7004_s24] sm:$0xff] %v4918_v34  ;;  %v4355_v48 = vadd.f32 %v4244_v13, %v3637_v11  ;;  %v4741_v56 = vpop.f32.mrf.mxu0  ;;  %v3284_v28 = vadd.f32 %v3175_v21, %v6437_v37  ;;  %v4011_v51 = vsel %vm6011_vm6, %v4006_v35, %v4010_v29  ;;  %v4587_v34 = vsel %vm6015_vm7, %v5754_v18, %v4586_v61 }
 0x1e3   : > { %v4013_v13 = vshrl.u32 %v5664_v39, 16  ;;  %v4648_v61 = vunpack.c.l.b16 %v4587_v34  ;;  %v4028_v18 = vrot.slane %v4026_v42, 4  ;;  %v5472_v34 = vld [vmem:[%s5954_s7 + $0x98] sm:$0x1] }
 0x1e4   : > { %v4849_v16 = vadd.f32 %v4738_v14, %v4355_v48  ;;  %5511 = vmatmul.msk.bf16.gmra.mxu1 %vm388_vm1, %v3103_v47  ;;  %5624 = vmatmul.msk.bf16.gmra.mxu2 %vm388_vm1, %v5821_v9  ;;  %v3021_v48 = vsel %vm6015_vm7, %v5495_v24, %v3020_v53  ;;  %v3024_v14 = vsel %vm6015_vm7, %v3022_v22, %v3023_v36  ;;  %v4016_v47 = vshll.u32 %v5664_v39, 16  ;;  %v5730_v39 = vld [vmem:[%s5954_s7 + $0xa0] sm:$0xf] }
 0x1e5   : > { %5689 = vmatmul.msk.bf16.gmra.mxu3 %vm388_vm1, %v4175_v3  ;;  %5770 = vmatmul.msk.bf16.gmra.mxu0 %vm388_vm1, %v4669_v4  ;;  %v4590_v53 = vsel %vm6015_vm7, %v4588_v38, %v4589_v45  ;;  %v4022_v9 = vshll.u32 %v5665_v20, 16  ;;  %v3082_v3 = vunpack.c.l.b16 %v3021_v48  ;;  %v3083_v4 = vunpack.c.l.b16 %v3024_v14  ;;  %v5822_v14 = vld [vmem:[%s5954_s7 + $0x90] sm:$0xff] }
 0x1e6   : > { %v4883_v59 = vmul.f32 %v6973_v2, %v4849_v16  ;;  %v4155_v22 = vunpack.c.l.b16 %v4011_v51  ;;  %v4649_v36 = vunpack.c.l.b16 %v4590_v53  ;;  %v4015_v35 = vrot.slane %v4013_v13, 4  ;;  %v5470_v51 = vld [vmem:[%s5954_s7 + $0x90] sm:$0xe] }
 0x1e7   : > { %v3529_v49 = vpop.f32.mrf.mxu2  ;;  %v4018_v29 = vrot.slane %v4016_v47, 5  ;;  %v7038_v16 = vrot.slane %v4022_v9, 5  ;;  %v5729_v9 = vld [vmem:[%s5954_s7 + $0x9c] sm:$0xe]  ;;  %v4593_v42 = vrot.slane %v5730_v39, 5 }
 0x1e8   : > { %v4919_v31 = vadd.f32 %v6995_v25, %v4883_v59  ;;  %v3638_v37 = vadd.f32 %v3529_v49, %v3284_v28  ;;  %v4247_v33 = vpop.f32.mrf.mxu3  ;;  %v5666_v59 = vld [vmem:[%s5954_s7 + $0xa4] sm:$0x1]  ;;  %v4176_v62 = vpack.c.b16 %v4155_v22, %v4154_v17  ;;  %v5667_v22 = vld [vmem:[%s5954_s7 + $0xa8] sm:$0xf] }
 0x1e9   : > { %v3177_v11 = vpop.f32.mrf.mxu1  ;;  %v4029_v53 = vor.u32 %v4028_v18, %v7038_v16 }
 0x1ea   : > { %4951 = vst [vmem:[%s7004_s24 + $0x8] sm:$0xff] %v4919_v31  ;;  %v4356_v32 = vadd.f32 %v4247_v33, %v3638_v37  ;;  %v4743_v21 = vpop.f32.mrf.mxu0  ;;  %v3285_v45 = vadd.f32 %v3177_v11, %v6439_v52  ;;  %v3027_v31 = vrot.slane %v5471_v63, 5  ;;  %v4670_v33 = vpack.c.b16 %v4649_v36, %v4648_v61  ;;  %v5668_v61 = vld [vmem:[%s5954_s7 + $0xac] sm:$0xf] }
 0x1eb   : > { %v4019_v52 = vor.u32 %v4018_v29, %v4015_v35  ;;  %v4032_v11 = vshll.u32 %v5666_v59, 16  ;;  %v4030_v63 = vrot.slane %v4029_v53, 4  ;;  %v5755_v29 = vrot.slane %v5729_v9, 9 }
 0x1ec   : > { %v4850_v24 = vadd.f32 %v4741_v56, %v4356_v32  ;;  %v3104_v56 = vpack.c.b16 %v3083_v4, %v3082_v3  ;;  %v5496_v32 = vrot.slane %v5470_v51, 9  ;;  %v5731_v3 = vld [vmem:[%s5954_s7 + $0xa4] sm:$0x1]  ;;  %v3029_v17 = vrot.slane %v3027_v31, 4 }
 0x1ed   : > { %v4020_v36 = vrot.slane %v4019_v52, 4  ;;  %v4034_v35 = vrot.slane %v4032_v11, 5  ;;  %v4046_v39 = vshll.u32 %v5668_v61, 16  ;;  %v4594_v53 = vsel %vm6015_vm7, %v5755_v29, %v4593_v42  ;;  %v5474_v11 = vld [vmem:[%s5954_s7 + $0xa0] sm:$0xf] }
 0x1ee   : > { %v4884_v38 = vmul.f32 %v6973_v2, %v4850_v24  ;;  %v3030_v24 = vrot.slane %v5472_v34, 5  ;;  %v3028_v51 = vsel %vm6015_vm7, %v5496_v32, %v3027_v31 }
 0x1ef   : > { %v3531_v28 = vpop.f32.mrf.mxu2  ;;  %v4035_v52 = vsel %vm6011_vm6, %v4030_v63, %v4034_v35  ;;  %v7076_v32 = vrot.slane %v4046_v39, 5  ;;  %v5733_v63 = vld [vmem:[%s5954_s7 + $0xac] sm:$0xf] }
 0x1f0   : > { %v4920_v20 = vadd.f32 %v6995_v25, %v4884_v38  ;;  %v3639_v49 = vadd.f32 %v3531_v28, %v3285_v45  ;;  %v4249_v48 = vpop.f32.mrf.mxu3  ;;  %v4595_v38 = vrot.slane %v4593_v42, 4  ;;  %v4596_v45 = vrot.slane %v5731_v3, 5 }
 0x1f1   : > { %v3180_v37 = vpop.f32.mrf.mxu1  ;;  %v4037_v28 = vshrl.u32 %v5667_v22, 16 }
 0x1f2   : > { %4952 = vst [vmem:[%s7004_s24 + $0x10] sm:$0xff] %v4920_v20  ;;  %v4357_v13 = vadd.f32 %v4249_v48, %v3639_v49  ;;  %v4746_v47 = vpop.f32.mrf.mxu0  ;;  %v4050_v20 = vshrl.u32 %v5668_v61, 16  ;;  %v4597_v31 = vsel %vm6015_vm7, %v4595_v38, %v4596_v45  ;;  %v4157_v61 = vunpack.c.l.b16 %v4035_v52  ;;  %v5473_v38 = vld [vmem:[%s5954_s7 + $0x9c] sm:$0xe] }
 0x1f3   : > { %v4651_v42 = vunpack.c.l.b16 %v4597_v31 }
 0x1f4   : > { %v4851_v4 = vadd.f32 %v4743_v21, %v4357_v13  ;;  %5512 = vmatmul.msk.bf16.gmra.mxu1 %vm388_vm1, %v3104_v56  ;;  %5625 = vmatmul.msk.bf16.gmra.mxu2 %vm388_vm1, %v5822_v14  ;;  %v3286_v21 = vadd.f32 %v3180_v37, %v6478_v23  ;;  %v4040_v56 = vshll.u32 %v5667_v22, 16  ;;  %v4025_v23 = vsel %vm6011_vm6, %v4020_v36, %v7038_v16 }
 0x1f5   : > { %5690 = vmatmul.msk.bf16.gmra.mxu3 %vm388_vm1, %v4176_v62  ;;  %5771 = vmatmul.msk.bf16.gmra.mxu0 %vm388_vm1, %v4670_v33  ;;  %v3031_v33 = vsel %vm6015_vm7, %v3029_v17, %v3030_v24  ;;  %v4039_v13 = vrot.slane %v4037_v28, 4  ;;  %v4052_v16 = vrot.slane %v4050_v20, 4  ;;  %v5669_v24 = vld [vmem:[%s5954_s7 + $0xb0] sm:$0x1]  ;;  %v4156_v22 = vunpack.c.l.b16 %v4025_v23 }
 0x1f6   : > { %v4885_v18 = vmul.f32 %v6973_v2, %v4851_v4  ;;  %v4042_v9 = vrot.slane %v4040_v56, 5  ;;  %v3084_v4 = vunpack.c.l.b16 %v3028_v51  ;;  %v3085_v17 = vunpack.c.l.b16 %v3031_v33  ;;  %v5732_v33 = vld [vmem:[%s5954_s7 + $0xa8] sm:$0xe]  ;;  %v5734_v23 = vld [vmem:[%s5954_s7 + $0xb0] sm:$0x1] }
 0x1f7   : > { %v3534_v59 = vpop.f32.mrf.mxu2  ;;  %v4650_v36 = vunpack.c.l.b16 %v4594_v53  ;;  %v4053_v45 = vor.u32 %v4052_v16, %v7076_v32  ;;  %v5497_v53 = vrot.slane %v5473_v38, 9 }
 0x1f8   : > { %v4921_v49 = vadd.f32 %v6995_v25, %v4885_v18  ;;  %v3640_v48 = vadd.f32 %v3534_v59, %v3286_v21  ;;  %v4252_v14 = vpop.f32.mrf.mxu3  ;;  %v3034_v18 = vrot.slane %v5474_v11, 5  ;;  %v4056_v59 = vshll.u32 %v5669_v24, 16 }
 0x1f9   : > { %v3182_v62 = vpop.f32.mrf.mxu1  ;;  %v3105_v20 = vpack.c.b16 %v3085_v17, %v3084_v4  ;;  %v5756_v4 = vrot.slane %v5732_v33, 9  ;;  %v4603_v24 = vrot.slane %v5734_v23, 5 }
 0x1fa   : > { %4953 = vst [vmem:[%s7004_s24 + $0x18] sm:$0xff] %v4921_v49  ;;  %v4358_v37 = vadd.f32 %v4252_v14, %v3640_v48  ;;  %v4748_v34 = vpop.f32.mrf.mxu0  ;;  %v3287_v29 = vadd.f32 %v3182_v62, %v6480_v57  ;;  %v5823_v49 = vld [vmem:[%s5954_s7 + $0x9c] sm:$0xff]  ;;  %v5475_v48 = vld [vmem:[%s5954_s7 + $0xa4] sm:$0x1]  ;;  %v4600_v14 = vrot.slane %v5733_v63, 5  ;;  %v4177_v57 = vpack.c.b16 %v4157_v61, %v4156_v22 }
 0x1fb   : > { %v4671_v62 = vpack.c.b16 %v4651_v42, %v4650_v36  ;;  %v3036_v31 = vrot.slane %v3034_v18, 4  ;;  %v3037_v11 = vrot.slane %v5475_v48, 5  ;;  %v4058_v16 = vrot.slane %v4056_v59, 5  ;;  %v5670_v36 = vld [vmem:[%s5954_s7 + $0xb4] sm:$0xf] }
 0x1fc   : > { %v4852_v3 = vadd.f32 %v4746_v47, %v4358_v37  ;;  %v4043_v47 = vor.u32 %v4042_v9, %v4039_v13  ;;  %v4054_v9 = vrot.slane %v4053_v45, 4  ;;  %v4602_v17 = vrot.slane %v4600_v14, 4  ;;  %v5671_v42 = vld [vmem:[%s5954_s7 + $0xb8] sm:$0xf] }
 0x1fd   : > { %v4601_v45 = vsel %vm6015_vm7, %v5756_v4, %v4600_v14 }
 0x1fe   : > { %v4886_v35 = vmul.f32 %v6973_v2, %v4852_v3  ;;  %v4044_v13 = vrot.slane %v4043_v47, 4  ;;  %v4652_v14 = vunpack.c.l.b16 %v4601_v45 }
 0x1ff   : > { %v3536_v21 = vpop.f32.mrf.mxu2 }
 0x200   : > { %v4922_v28 = vadd.f32 %v6995_v25, %v4886_v35  ;;  %v3641_v56 = vadd.f32 %v3536_v21, %v3287_v29  ;;  %v4254_v39 = vpop.f32.mrf.mxu3  ;;  %v3038_v35 = vsel %vm6015_vm7, %v3036_v31, %v3037_v11  ;;  %v4049_v29 = vsel %vm6011_vm6, %v4044_v13, %v7076_v32 }
 0x201   : > { %v3185_v51 = vpop.f32.mrf.mxu1  ;;  %v4059_v21 = vsel %vm6011_vm6, %v4054_v9, %v4058_v16 }
 0x202   : > { %4954 = vst [vmem:[%s7004_s24 + $0x20] sm:$0xff] %v4922_v28  ;;  %v4359_v37 = vadd.f32 %v4254_v39, %v3641_v56  ;;  %v4751_v52 = vpop.f32.mrf.mxu0  ;;  %v3288_v61 = vadd.f32 %v3185_v51, %v6521_v55  ;;  %v4061_v28 = vshrl.u32 %v5670_v36, 16  ;;  %v4064_v56 = vshll.u32 %v5670_v36, 16  ;;  %v5824_v36 = vld [vmem:[%s5954_s7 + $0xa8] sm:$0xff] }
 0x203   : > { %v4070_v39 = vshll.u32 %v5671_v42, 16  ;;  %v3087_v51 = vunpack.c.l.b16 %v3038_v35  ;;  %v4159_v33 = vunpack.c.l.b16 %v4059_v21  ;;  %v5478_v21 = vld [vmem:[%s5954_s7 + $0xb0] sm:$0x1] }
 0x204   : > { %v4853_v3 = vadd.f32 %v4748_v34, %v4359_v37  ;;  %5513 = vmatmul.msk.bf16.gmra.mxu1 %vm388_vm1, %v3105_v20  ;;  %5626 = vmatmul.msk.bf16.gmra.mxu2 %vm388_vm1, %v5823_v49  ;;  %v3035_v34 = vsel %vm6015_vm7, %v5497_v53, %v3034_v18  ;;  %v4604_v18 = vsel %vm6015_vm7, %v4602_v17, %v4603_v24  ;;  %v4074_v20 = vshrl.u32 %v5671_v42, 16  ;;  %v5477_v37 = vld [vmem:[%s5954_s7 + $0xac] sm:$0xf]  ;;  %v5736_v17 = vld [vmem:[%s5954_s7 + $0xb8] sm:$0xf] }
 0x205   : > { %5691 = vmatmul.msk.bf16.gmra.mxu3 %vm388_vm1, %v4177_v57  ;;  %5772 = vmatmul.msk.bf16.gmra.mxu0 %vm388_vm1, %v4671_v62  ;;  %v3086_v48 = vunpack.c.l.b16 %v3035_v34  ;;  %v4158_v57 = vunpack.c.l.b16 %v4049_v29  ;;  %v4653_v23 = vunpack.c.l.b16 %v4604_v18  ;;  %v4063_v53 = vrot.slane %v4061_v28, 4  ;;  %v5735_v18 = vld [vmem:[%s5954_s7 + $0xb4] sm:$0xe] }
 0x206   : > { %v4887_v22 = vmul.f32 %v6973_v2, %v4853_v3  ;;  %v4066_v31 = vrot.slane %v4064_v56, 5  ;;  %v7114_v11 = vrot.slane %v4070_v39, 5  ;;  %v4076_v13 = vrot.slane %v4074_v20, 4  ;;  %v5672_v3 = vld [vmem:[%s5954_s7 + $0xbc] sm:$0x1] }
 0x207   : > { %v3539_v63 = vpop.f32.mrf.mxu2  ;;  %v4178_v42 = vpack.c.b16 %v4159_v33, %v4158_v57  ;;  %v3041_v34 = vrot.slane %v5477_v37, 5  ;;  %v4672_v29 = vpack.c.b16 %v4653_v23, %v4652_v14  ;;  %v5737_v56 = vld [vmem:[%s5954_s7 + $0xbc] sm:$0x1]  ;;  %v5757_v14 = vrot.slane %v5735_v18, 9 }
 0x208   : > { %v4923_v38 = vadd.f32 %v6995_v25, %v4887_v22  ;;  %v3642_v55 = vadd.f32 %v3539_v63, %v3288_v61  ;;  %v4257_v47 = vpop.f32.mrf.mxu3  ;;  %v5476_v63 = vld [vmem:[%s5954_s7 + $0xa8] sm:$0xe] }
 0x209   : > { %v3187_v59 = vpop.f32.mrf.mxu1  ;;  %v5498_v28 = vrot.slane %v5476_v63, 9  ;;  %v3043_v20 = vrot.slane %v3041_v34, 4 }
 0x20a   : > { %4955 = vst [vmem:[%s7004_s24 + $0x28] sm:$0xff] %v4923_v38  ;;  %v4360_v32 = vadd.f32 %v4257_v47, %v3642_v55  ;;  %v4753_v49 = vpop.f32.mrf.mxu0  ;;  %v3289_v16 = vadd.f32 %v3187_v59, %v6523_v12  ;;  %v4067_v12 = vor.u32 %v4066_v31, %v4063_v53  ;;  %v4077_v38 = vor.u32 %v4076_v13, %v7114_v11 }
 0x20b   : > { %v4080_v55 = vshll.u32 %v5672_v3, 16  ;;  %v4607_v59 = vrot.slane %v5736_v17, 5  ;;  %v4610_v53 = vrot.slane %v5737_v56, 5 }
 0x20c   : > { %v4854_v62 = vadd.f32 %v4751_v52, %v4360_v32  ;;  %v3106_v52 = vpack.c.b16 %v3087_v51, %v3086_v48  ;;  %v3044_v32 = vrot.slane %v5478_v21, 5  ;;  %v5673_v48 = vld [vmem:[%s5954_s7 + $0xc0] sm:$0xf]  ;;  %v5674_v51 = vld [vmem:[%s5954_s7 + $0xc4] sm:$0xf]  ;;  %v4068_v57 = vrot.slane %v4067_v12, 4 }
 0x20d   : > { %v4082_v33 = vrot.slane %v4080_v55, 5  ;;  %v4609_v37 = vrot.slane %v4607_v59, 4  ;;  %v4085_v13 = vshrl.u32 %v5673_v48, 16  ;;  %v4098_v3 = vshrl.u32 %v5674_v51, 16 }
 0x20e   : > { %v4888_v9 = vmul.f32 %v6973_v2, %v4854_v62  ;;  %v4078_v62 = vrot.slane %v4077_v38, 4 }
 0x20f   : > { %v3541_v4 = vpop.f32.mrf.mxu2  ;;  %v4087_v21 = vrot.slane %v4085_v13, 4  ;;  %v5825_v13 = vld [vmem:[%s5954_s7 + $0xb4] sm:$0xff] }
 0x210   : > { %v4924_v24 = vadd.f32 %v6995_v25, %v4888_v9  ;;  %v3643_v22 = vadd.f32 %v3541_v4, %v3289_v16  ;;  %v4259_v61 = vpop.f32.mrf.mxu3  ;;  %v4088_v9 = vshll.u32 %v5673_v48, 16  ;;  %v4094_v16 = vshll.u32 %v5674_v51, 16 }
 0x211   : > { %v3190_v35 = vpop.f32.mrf.mxu1  ;;  %v4083_v63 = vsel %vm6011_vm6, %v4078_v62, %v4082_v33  ;;  %v5479_v33 = vld [vmem:[%s5954_s7 + $0xb4] sm:$0xe] }
 0x212   : > { %4956 = vst [vmem:[%s7004_s24 + $0x30] sm:$0xff] %v4924_v24  ;;  %v4361_v47 = vadd.f32 %v4259_v61, %v3643_v22  ;;  %v4756_v45 = vpop.f32.mrf.mxu0  ;;  %v3042_v22 = vsel %vm6015_vm7, %v5498_v28, %v3041_v34  ;;  %v3045_v61 = vsel %vm6015_vm7, %v3043_v20, %v3044_v32  ;;  %v4611_v34 = vsel %vm6015_vm7, %v4609_v37, %v4610_v53  ;;  %v5675_v28 = vld [vmem:[%s5954_s7 + $0xc8] sm:$0x1]  ;;  %v5739_v32 = vld [vmem:[%s5954_s7 + $0xc4] sm:$0xf] }
 0x213   : > { %v4090_v12 = vrot.slane %v4088_v9, 5  ;;  %v7152_v38 = vrot.slane %v4094_v16, 5  ;;  %v3089_v18 = vunpack.c.l.b16 %v3045_v61  ;;  %v5481_v9 = vld [vmem:[%s5954_s7 + $0xbc] sm:$0x1]  ;;  %v4614_v16 = vrot.slane %v5739_v32, 5 }
 0x214   : > { %v4855_v39 = vadd.f32 %v4753_v49, %v4361_v47  ;;  %5514 = vmatmul.msk.bf16.gmra.mxu1 %vm388_vm1, %v3106_v52  ;;  %5627 = vmatmul.msk.bf16.gmra.mxu2 %vm388_vm1, %v5824_v36  ;;  %v3290_v49 = vadd.f32 %v3190_v35, %v6560_v46  ;;  %v4073_v46 = vsel %vm6011_vm6, %v4068_v57, %v7114_v11  ;;  %v4100_v11 = vrot.slane %v4098_v3, 4 }
 0x215   : > { %5692 = vmatmul.msk.bf16.gmra.mxu3 %vm388_vm1, %v4178_v42  ;;  %5773 = vmatmul.msk.bf16.gmra.mxu0 %vm388_vm1, %v4672_v29  ;;  %v4608_v35 = vsel %vm6015_vm7, %v5757_v14, %v4607_v59  ;;  %v5480_v29 = vld [vmem:[%s5954_s7 + $0xb8] sm:$0xf]  ;;  %v3088_v47 = vunpack.c.l.b16 %v3042_v22  ;;  %v4160_v56 = vunpack.c.l.b16 %v4073_v46  ;;  %v4655_v59 = vunpack.c.l.b16 %v4611_v34 }
 0x216   : > { %v4889_v23 = vmul.f32 %v6973_v2, %v4855_v39  ;;  %v4161_v39 = vunpack.c.l.b16 %v4083_v63  ;;  %v4654_v20 = vunpack.c.l.b16 %v4608_v35  ;;  %v3048_v57 = vrot.slane %v5480_v29, 5 }
 0x217   : > { %v3544_v31 = vpop.f32.mrf.mxu2  ;;  %v4101_v14 = vor.u32 %v4100_v11, %v7152_v38  ;;  %v5499_v61 = vrot.slane %v5479_v33, 9 }
 0x218   : > { %v4925_v4 = vadd.f32 %v6995_v25, %v4889_v23  ;;  %v3644_v52 = vadd.f32 %v3544_v31, %v3290_v49  ;;  %v4262_v17 = vpop.f32.mrf.mxu3  ;;  %v4104_v23 = vshll.u32 %v5675_v28, 16  ;;  %v3107_v31 = vpack.c.b16 %v3089_v18, %v3088_v47  ;;  %v5676_v18 = vld [vmem:[%s5954_s7 + $0xcc] sm:$0xf]  ;;  %v5677_v28 = vld [vmem:[%s5954_s7 + $0xd0] sm:$0xf] }
 0x219   : > { %v3192_v24 = vpop.f32.mrf.mxu1  ;;  %v3050_v46 = vrot.slane %v3048_v57, 4  ;;  %v4102_v35 = vrot.slane %v4101_v14, 4  ;;  %v4109_v33 = vshrl.u32 %v5676_v18, 16  ;;  %v4118_v14 = vshll.u32 %v5677_v28, 16 }
 0x21a   : > { %4957 = vst [vmem:[%s7004_s24 + $0x38] sm:$0xff] %v4925_v4  ;;  %v4362_v36 = vadd.f32 %v4262_v17, %v3644_v52  ;;  %v4758_v42 = vpop.f32.mrf.mxu0  ;;  %v3291_v51 = vadd.f32 %v3192_v24, %v6562_v27  ;;  %v4179_v27 = vpack.c.b16 %v4161_v39, %v4160_v56  ;;  %v4673_v4 = vpack.c.b16 %v4655_v59, %v4654_v20  ;;  %v5738_v52 = vld [vmem:[%s5954_s7 + $0xc0] sm:$0xe]  ;;  %v5740_v17 = vld [vmem:[%s5954_s7 + $0xc8] sm:$0x1] }
 0x21b   : > { %v4106_v34 = vrot.slane %v4104_v23, 5  ;;  %v4617_v11 = vrot.slane %v5740_v17, 5  ;;  %v4122_v23 = vshrl.u32 %v5677_v28, 16  ;;  %v4120_v17 = vrot.slane %v4118_v14, 5  ;;  %v5482_v28 = vld [vmem:[%s5954_s7 + $0xc0] sm:$0xe] }
 0x21c   : > { %v4856_v55 = vadd.f32 %v4756_v45, %v4362_v36  ;;  %v4091_v45 = vor.u32 %v4090_v12, %v4087_v21  ;;  %v3051_v36 = vrot.slane %v5481_v9, 5  ;;  %v5758_v21 = vrot.slane %v5738_v52, 9 }
 0x21d   : > { %v4616_v12 = vrot.slane %v4614_v16, 4  ;;  %v4107_v59 = vsel %vm6011_vm6, %v4102_v35, %v4106_v34 }
 0x21e   : > { %v4890_v48 = vmul.f32 %v6973_v2, %v4856_v55  ;;  %v4092_v63 = vrot.slane %v4091_v45, 4  ;;  %v3052_v39 = vsel %vm6015_vm7, %v3050_v46, %v3051_v36  ;;  %v4112_v45 = vshll.u32 %v5676_v18, 16  ;;  %v5678_v36 = vld [vmem:[%s5954_s7 + $0xd4] sm:$0x1] }
 0x21f   : > { %v3546_v62 = vpop.f32.mrf.mxu2  ;;  %v4163_v9 = vunpack.c.l.b16 %v4107_v59 }
 0x220   : > { %v4926_v49 = vadd.f32 %v6995_v25, %v4890_v48  ;;  %v3645_v37 = vadd.f32 %v3546_v62, %v3291_v51  ;;  %v4264_v53 = vpop.f32.mrf.mxu3  ;;  %v4097_v20 = vsel %vm6011_vm6, %v4092_v63, %v7152_v38  ;;  %v4615_v51 = vsel %vm6015_vm7, %v5758_v21, %v4614_v16 }
 0x221   : > { %v3195_v3 = vpop.f32.mrf.mxu1  ;;  %v4656_v16 = vunpack.c.l.b16 %v4615_v51  ;;  %v4114_v52 = vrot.slane %v4112_v45, 5 }
 0x222   : > { %4958 = vst [vmem:[%s7004_s24 + $0x40] sm:$0xff] %v4926_v49  ;;  %v4363_v24 = vadd.f32 %v4264_v53, %v3645_v37  ;;  %v4761_v22 = vpop.f32.mrf.mxu0  ;;  %v3292_v47 = vadd.f32 %v3195_v3, %v6589_v41  ;;  %v3091_v53 = vunpack.c.l.b16 %v3052_v39  ;;  %v4128_v39 = vshll.u32 %v5678_v36, 16 }
 0x224   : > { %v4857_v29 = vadd.f32 %v4758_v42, %v4363_v24  ;;  %5515 = vmatmul.msk.bf16.gmra.mxu1 %vm388_vm1, %v3107_v31  ;;  %5628 = vmatmul.msk.bf16.gmra.mxu2 %vm388_vm1, %v5825_v13  ;;  %v3049_v42 = vsel %vm6015_vm7, %v5499_v61, %v3048_v57  ;;  %v4618_v57 = vsel %vm6015_vm7, %v4616_v12, %v4617_v11  ;;  %v4162_v31 = vunpack.c.l.b16 %v4097_v20  ;;  %v5826_v12 = vld [vmem:[%s5954_s7 + $0xc0] sm:$0xff] }
 0x225   : > { %5693 = vmatmul.msk.bf16.gmra.mxu3 %vm388_vm1, %v4179_v27  ;;  %5774 = vmatmul.msk.bf16.gmra.mxu0 %vm388_vm1, %v4673_v4  ;;  %v3090_v37 = vunpack.c.l.b16 %v3049_v42  ;;  %v4657_v3 = vunpack.c.l.b16 %v4618_v57  ;;  %v5483_v27 = vld [vmem:[%s5954_s7 + $0xc4] sm:$0xf]  ;;  %v4111_v4 = vrot.slane %v4109_v33, 4  ;;  %v4124_v24 = vrot.slane %v4122_v23, 4 }
 0x226   : > { %v4891_v55 = vmul.f32 %v6973_v2, %v4857_v29  ;;  %v4180_v11 = vpack.c.b16 %v4163_v9, %v4162_v31  ;;  %v5500_v57 = vrot.slane %v5482_v28, 9  ;;  %v4130_v23 = vrot.slane %v4128_v39, 5 }
 0x227   : > { %v3549_v56 = vpop.f32.mrf.mxu2  ;;  %v3108_v35 = vpack.c.b16 %v3091_v53, %v3090_v37  ;;  %v4674_v18 = vpack.c.b16 %v4657_v3, %v4656_v16  ;;  %v4115_v42 = vor.u32 %v4114_v52, %v4111_v4 }
 0x228   : > { %v4927_v32 = vadd.f32 %v6995_v25, %v4891_v55  ;;  %v3646_v41 = vadd.f32 %v3549_v56, %v3292_v47  ;;  %v4267_v48 = vpop.f32.mrf.mxu3  ;;  %v3055_v55 = vrot.slane %v5483_v27, 5  ;;  %v5484_v56 = vld [vmem:[%s5954_s7 + $0xc8] sm:$0x1] }
 0x229   : > { %v3197_v62 = vpop.f32.mrf.mxu1  ;;  %v3058_v33 = vrot.slane %v5484_v56, 5  ;;  %v4116_v45 = vrot.slane %v4115_v42, 4  ;;  %v5827_v56 = vld [vmem:[%s5954_s7 + $0xcc] sm:$0xff] }
 0x22a   : > { %4959 = vst [vmem:[%s7004_s24 + $0x48] sm:$0xff] %v4927_v32  ;;  %v4364_v38 = vadd.f32 %v4267_v48, %v3646_v41  ;;  %v4763_v49 = vpop.f32.mrf.mxu0  ;;  %v3293_v46 = vadd.f32 %v3197_v62, %v6604_v44  ;;  %v4125_v44 = vor.u32 %v4124_v24, %v4120_v17  ;;  %v5741_v32 = vld [vmem:[%s5954_s7 + $0xcc] sm:$0xe]  ;;  %v5743_v48 = vld [vmem:[%s5954_s7 + $0xd4] sm:$0x1]  ;;  %v3057_v62 = vrot.slane %v3055_v55, 4 }
 0x22b   : > { %v4624_v31 = vrot.slane %v5743_v48, 5  ;;  %v3056_v4 = vsel %vm6015_vm7, %v5500_v57, %v3055_v55  ;;  %v4121_v24 = vsel %vm6011_vm6, %v4116_v45, %v4120_v17 }
 0x22c   : > { %v4858_v13 = vadd.f32 %v4761_v22, %v4364_v38  ;;  %v5742_v22 = vld [vmem:[%s5954_s7 + $0xd0] sm:$0xf]  ;;  %v4126_v14 = vrot.slane %v4125_v44, 4  ;;  %v5759_v38 = vrot.slane %v5741_v32, 9  ;;  %v3059_v52 = vsel %vm6015_vm7, %v3057_v62, %v3058_v33 }
 0x22d   : > { %v4621_v41 = vrot.slane %v5742_v22, 5  ;;  %v3092_v22 = vunpack.c.l.b16 %v3056_v4 }
 0x22e   : > { %v4892_v61 = vmul.f32 %v6973_v2, %v4858_v13 }
 0x22f   : > { %v3551_v63 = vpop.f32.mrf.mxu2  ;;  %v4623_v53 = vrot.slane %v4621_v41, 4  ;;  %v4622_v36 = vsel %vm6015_vm7, %v5759_v38, %v4621_v41 }
 0x230   : > { %v4928_v34 = vadd.f32 %v6995_v25, %v4892_v61  ;;  %v3647_v29 = vadd.f32 %v3551_v63, %v3293_v46  ;;  %v4269_v21 = vpop.f32.mrf.mxu3  ;;  %v4131_v46 = vsel %vm6011_vm6, %v4126_v14, %v4130_v23  ;;  %v4658_v17 = vunpack.c.l.b16 %v4622_v36 }
 0x231   : > { %v3200_v47 = vpop.f32.mrf.mxu1  ;;  %v4625_v63 = vsel %vm6015_vm7, %v4623_v53, %v4624_v31 }
 0x232   : > { %4960 = vst [vmem:[%s7004_s24 + $0x50] sm:$0xff] %v4928_v34  ;;  %v4365_v20 = vadd.f32 %v4269_v21, %v3647_v29  ;;  %v4766_v59 = vpop.f32.mrf.mxu0  ;;  %v3093_v34 = vunpack.c.l.b16 %v3059_v52  ;;  %v4164_v29 = vunpack.c.l.b16 %v4121_v24  ;;  %v4165_v21 = vunpack.c.l.b16 %v4131_v46 }
 0x234   : > { %v4859_v51 = vadd.f32 %v4763_v49, %v4365_v20  ;;  %5516 = vmatmul.msk.bf16.gmra.mxu1 %vm388_vm1, %v3108_v35  ;;  %5629 = vmatmul.msk.bf16.gmra.mxu2 %vm388_vm1, %v5826_v12  ;;  %v3294_v49 = vadd.f32 %v3200_v47, %v6627_v15  ;;  %v4659_v12 = vunpack.c.l.b16 %v4625_v63  ;;  %v3109_v5 = vpack.c.b16 %v3093_v34, %v3092_v22 }
 0x235   : > { %5694 = vmatmul.msk.bf16.gmra.mxu3 %vm388_vm1, %v4180_v11  ;;  %5775 = vmatmul.msk.bf16.gmra.mxu0 %vm388_vm1, %v4674_v18  ;;  %v4181_v44 = vpack.c.b16 %v4165_v21, %v4164_v29 }
 0x236   : > { %v4893_v37 = vmul.f32 %v6973_v2, %v4859_v51  ;;  %v4675_v39 = vpack.c.b16 %v4659_v12, %v4658_v17 }
 0x237   : > { %v3554_v13 = vpop.f32.mrf.mxu2 }
 0x238   : > { %v4929_v9 = vadd.f32 %v6995_v25, %v4893_v37  ;;  %v3648_v16 = vadd.f32 %v3554_v13, %v3294_v49  ;;  %v4272_v3 = vpop.f32.mrf.mxu3 }
 0x239   : > { %v3202_v27 = vpop.f32.mrf.mxu1 }
 0x23a   : > { %4961 = vst [vmem:[%s7004_s24 + $0x58] sm:$0xff] %v4929_v9  ;;  %v4366_v61 = vadd.f32 %v4272_v3, %v3648_v16  ;;  %v4768_v15 = vpop.f32.mrf.mxu0  ;;  %v3295_v0 = vadd.f32 %v3202_v27, %v6639_v7 }
 0x23c   : > { %v4860_v35 = vadd.f32 %v4766_v59, %v4366_v61 }
 0x23e   : > { %v4894_v11 = vmul.f32 %v6973_v2, %v4860_v35 }
 0x23f   : > { %v3556_v55 = vpop.f32.mrf.mxu2 }
 0x240   : > { %v4930_v47 = vadd.f32 %v6995_v25, %v4894_v11  ;;  %v3649_v18 = vadd.f32 %v3556_v55, %v3295_v0  ;;  %v4274_v28 = vpop.f32.mrf.mxu3 }
 0x241   : > { %v3205_v42 = vpop.f32.mrf.mxu1 }
 0x242   : > { %4962 = vst [vmem:[%s7004_s24 + $0x60] sm:$0xff] %v4930_v47  ;;  %v4367_v20 = vadd.f32 %v4274_v28, %v3649_v18  ;;  %v4771_v59 = vpop.f32.mrf.mxu0  ;;  %v3296_v41 = vadd.f32 %v3205_v42, %v6659_v40 }
 0x244   : > { %v4861_v32 = vadd.f32 %v4768_v15, %v4367_v20  ;;  %5517 = vmatmul.msk.bf16.gmra.mxu1 %vm388_vm1, %v3109_v5  ;;  %5630 = vmatmul.msk.bf16.gmra.mxu2 %vm388_vm1, %v5827_v56 }
 0x245   : > { %5695 = vmatmul.msk.bf16.gmra.mxu3 %vm388_vm1, %v4181_v44  ;;  %5776 = vmatmul.msk.bf16.gmra.mxu0 %vm388_vm1, %v4675_v39 }
 0x246   : > { %v4895_v7 = vmul.f32 %v6973_v2, %v4861_v32 }
 0x247   : > { %v3559_v48 = vpop.f32.mrf.mxu2 }
 0x248   : > { %v4931_v51 = vadd.f32 %v6995_v25, %v4895_v7  ;;  %v3650_v57 = vadd.f32 %v3559_v48, %v3296_v41  ;;  %v4277_v62 = vpop.f32.mrf.mxu3 }
 0x249   : > { %v3207_v33 = vpop.f32.mrf.mxu1 }
 0x24a   : > { %4963 = vst [vmem:[%s7004_s24 + $0x68] sm:$0xff] %v4931_v51  ;;  %v4368_v45 = vadd.f32 %v4277_v62, %v3650_v57  ;;  %v4773_v14 = vpop.f32.mrf.mxu0  ;;  %v3297_v37 = vadd.f32 %v3207_v33, %v6677_v19 }
 0x24c   : > { %v4862_v23 = vadd.f32 %v4771_v59, %v4368_v45 }
 0x24e   : > { %v4896_v38 = vmul.f32 %v6973_v2, %v4862_v23 }
 0x24f   : > { %v3561_v49 = vpop.f32.mrf.mxu2 }
 0x250   : > { %v4932_v53 = vadd.f32 %v6995_v25, %v4896_v38  ;;  %v3651_v40 = vadd.f32 %v3561_v49, %v3297_v37  ;;  %v4279_v31 = vpop.f32.mrf.mxu3 }
 0x251   : > { %v3210_v13 = vpop.f32.mrf.mxu1 }
 0x252   : > { %4964 = vst [vmem:[%s7004_s24 + $0x70] sm:$0xff] %v4932_v53  ;;  %v4369_v9 = vadd.f32 %v4279_v31, %v3651_v40  ;;  %v4776_v16 = vpop.f32.mrf.mxu0  ;;  %v3298_v4 = vadd.f32 %v3210_v13, %v6699_v30 }
 0x254   : > { %v4863_v3 = vadd.f32 %v4773_v14, %v4369_v9 }
 0x256   : > { %v4897_v27 = vmul.f32 %v6973_v2, %v4863_v3 }
 0x257   : > { %v3564_v52 = vpop.f32.mrf.mxu2 }
 0x258   : > { %v4933_v24 = vadd.f32 %v6995_v25, %v4897_v27  ;;  %v3652_v19 = vadd.f32 %v3564_v52, %v3298_v4  ;;  %v4282_v61 = vpop.f32.mrf.mxu3 }
 0x259   : > { %v3212_v15 = vpop.f32.mrf.mxu1 }
 0x25a   : > { %4965 = vst [vmem:[%s7004_s24 + $0x78] sm:$0xff] %v4933_v24  ;;  %v4370_v46 = vadd.f32 %v4282_v61, %v3652_v19  ;;  %v4778_v36 = vpop.f32.mrf.mxu0  ;;  %v3299_v22 = vadd.f32 %v3212_v15, %v6711_v43 }
 0x25c   : > { %v4864_v63 = vadd.f32 %v4776_v16, %v4370_v46 }
 0x25e   : > { %v4898_v35 = vmul.f32 %v6973_v2, %v4864_v63 }
 0x25f   : > { %v3566_v34 = vpop.f32.mrf.mxu2 }
 0x260   : > { %v4934_v29 = vadd.f32 %v6995_v25, %v4898_v35  ;;  %v3653_v30 = vadd.f32 %v3566_v34, %v3299_v22  ;;  %v4284_v21 = vpop.f32.mrf.mxu3 }
 0x261   : > { %v3215_v17 = vpop.f32.mrf.mxu1 }
 0x262   : > { %4966 = vst [vmem:[%s7004_s24 + $0x80] sm:$0xff] %v4934_v29  ;;  %v4371_v12 = vadd.f32 %v4284_v21, %v3653_v30  ;;  %v4781_v11 = vpop.f32.mrf.mxu0  ;;  %v3300_v47 = vadd.f32 %v3215_v17, %v6731_v54  ;;  %v7255_v54 = vld [vmem:[%s7322_s3] ss:$0 sm:$0xff] }
 0x264   : > { %v4865_v0 = vadd.f32 %v4778_v36, %v4371_v12 }
 0x266   : > { %v4899_v55 = vmul.f32 %v6973_v2, %v4865_v0 }
 0x267   : > { %v3569_v18 = vpop.f32.mrf.mxu2 }
 0x268   : > { %v4935_v28 = vadd.f32 %v6995_v25, %v4899_v55  ;;  %v3654_v43 = vadd.f32 %v3569_v18, %v3300_v47  ;;  %v4287_v5 = vpop.f32.mrf.mxu3 }
 0x269   : > { %v3217_v56 = vpop.f32.mrf.mxu1 }
 0x26a   : > { %4967 = vst [vmem:[%s7004_s24 + $0x88] sm:$0xff] %v4935_v28  ;;  %v4372_v42 = vadd.f32 %v4287_v5, %v3654_v43  ;;  %v4783_v44 = vpop.f32.mrf.mxu0  ;;  %v3301_v59 = vadd.f32 %v3217_v56, %v6749_v10 }
 0x26c   : > { %v4866_v39 = vadd.f32 %v4781_v11, %v4372_v42 }
 0x26e   : > { %v4900_v20 = vmul.f32 %v6973_v2, %v4866_v39 }
 0x26f   : > { %v3571_v32 = vpop.f32.mrf.mxu2 }
 0x270   : > { %v4936_v25 = vadd.f32 %v7255_v54, %v4900_v20  ;;  %v3655_v7 = vadd.f32 %v3571_v32, %v3301_v59  ;;  %v4289_v41 = vpop.f32.mrf.mxu3 }
 0x271   : > { %v3220_v48 = vpop.f32.mrf.mxu1 }
 0x272   : > { %4968 = vst [vmem:[%s7004_s24 + $0x90] sm:$0xff] %v4936_v25  ;;  %v4373_v51 = vadd.f32 %v4289_v41, %v3655_v7  ;;  %v4786_v57 = vpop.f32.mrf.mxu0  ;;  %v3302_v10 = vadd.f32 %v3220_v48, %v6771_v60 }
 0x274   : > { %v4867_v62 = vadd.f32 %v4783_v44, %v4373_v51 }
 0x276   : > { %v4901_v33 = vmul.f32 %v6973_v2, %v4867_v62 }
 0x277   : > { %v3574_v45 = vpop.f32.mrf.mxu2 }
 0x278   : > { %v4937_v14 = vadd.f32 %v7255_v54, %v4901_v33  ;;  %v3656_v23 = vadd.f32 %v3574_v45, %v3302_v10  ;;  %v4292_v38 = vpop.f32.mrf.mxu3 }
 0x279   : > { %v3222_v37 = vpop.f32.mrf.mxu1 }
 0x27a   : > { %4969 = vst [vmem:[%s7004_s24 + $0x98] sm:$0xff] %v4937_v14  ;;  %v4374_v49 = vadd.f32 %v4292_v38, %v3656_v23  ;;  %v4788_v53 = vpop.f32.mrf.mxu0  ;;  %v3303_v13 = vadd.f32 %v3222_v37, %v6783_v26 }
 0x27c   : > { %v4868_v40 = vadd.f32 %v4786_v57, %v4374_v49 }
 0x27e   : > { %v4902_v31 = vmul.f32 %v6973_v2, %v4868_v40 }
 0x27f   : > { %v3576_v9 = vpop.f32.mrf.mxu2 }
 0x280   : > { %v4938_v16 = vadd.f32 %v7255_v54, %v4902_v31  ;;  %v3657_v60 = vadd.f32 %v3576_v9, %v3303_v13  ;;  %v4294_v3 = vpop.f32.mrf.mxu3  ;;  %v7347_v31 = vld [vmem:[#allocation4_spill] sm:$0xff] }
 0x281   : > { %v3225_v27 = vpop.f32.mrf.mxu1 }
 0x282   : > { %4970 = vst [vmem:[%s7004_s24 + $0xa0] sm:$0xff] %v4938_v16  ;;  %v4375_v4 = vadd.f32 %v4294_v3, %v3657_v60  ;;  %v4791_v52 = vpop.f32.mrf.mxu0  ;;  %v3304_v61 = vadd.f32 %v3225_v27, %v6803_v58 }
 0x284   : > { %v4869_v24 = vadd.f32 %v4788_v53, %v4375_v4 }
 0x286   : > { %v4903_v19 = vmul.f32 %v6973_v2, %v4869_v24 }
 0x287   : > { %v3579_v15 = vpop.f32.mrf.mxu2 }
 0x288   : > { %v4939_v46 = vadd.f32 %v7255_v54, %v4903_v19  ;;  %v3658_v26 = vadd.f32 %v3579_v15, %v3304_v61  ;;  %v4297_v36 = vpop.f32.mrf.mxu3  ;;  %v7348_v19 = vld [vmem:[#allocation5_spill] sm:$0xff] }
 0x289   : > { %v3227_v63 = vpop.f32.mrf.mxu1 }
 0x28a   : > { %4971 = vst [vmem:[%s7004_s24 + $0xa8] sm:$0xff] %v4939_v46  ;;  %v4376_v35 = vadd.f32 %v4297_v36, %v3658_v26  ;;  %v4793_v22 = vpop.f32.mrf.mxu0  ;;  %v3305_v30 = vadd.f32 %v3227_v63, %v6821_v8 }
 0x28c   : > { %v4870_v34 = vadd.f32 %v4791_v52, %v4376_v35 }
 0x28e   : > { %v4904_v29 = vmul.f32 %v6973_v2, %v4870_v34 }
 0x28f   : > { %v3581_v21 = vpop.f32.mrf.mxu2 }
 0x290   : > { %v4940_v17 = vadd.f32 %v7255_v54, %v4904_v29  ;;  %v3659_v58 = vadd.f32 %v3581_v21, %v3305_v30  ;;  %v4299_v12 = vpop.f32.mrf.mxu3  ;;  %v7349_v29 = vld [vmem:[#allocation6_spill] sm:$0xff] }
 0x291   : > { %v3230_v11 = vpop.f32.mrf.mxu1 }
 0x292   : > { %4972 = vst [vmem:[%s7004_s24 + $0xb0] sm:$0xff] %v4940_v17  ;;  %v4377_v0 = vadd.f32 %v4299_v12, %v3659_v58  ;;  %v4796_v55 = vpop.f32.mrf.mxu0  ;;  %v3306_v28 = vadd.f32 %v3230_v11, %v6843_v6 }
 0x294   : > { %v4871_v47 = vadd.f32 %v4793_v22, %v4377_v0 }
 0x296   : > { %v4905_v18 = vmul.f32 %v6973_v2, %v4871_v47 }
 0x297   : > { %v3584_v43 = vpop.f32.mrf.mxu2 }
 0x298   : > { %v4941_v5 = vadd.f32 %v7255_v54, %v4905_v18  ;;  %v3660_v8 = vadd.f32 %v3584_v43, %v3306_v28  ;;  %v4302_v56 = vpop.f32.mrf.mxu3  ;;  %v7350_v28 = vld [vmem:[#allocation7_spill] sm:$0xff] }
 0x299   : > { %v3232_v42 = vpop.f32.mrf.mxu1 }
 0x29a   : > { %4973 = vst [vmem:[%s7004_s24 + $0xb8] sm:$0xff] %v4941_v5  ;;  %v4378_v44 = vadd.f32 %v4302_v56, %v3660_v8  ;;  %v4798_v39 = vpop.f32.mrf.mxu0  ;;  %v3307_v32 = vadd.f32 %v3232_v42, %v6855_v1 }
 0x29c   : > { %v4872_v20 = vadd.f32 %v4796_v55, %v4378_v44 }
 0x29e   : > { %v4906_v59 = vmul.f32 %v6973_v2, %v4872_v20 }
 0x29f   : > { %v3586_v25 = vpop.f32.mrf.mxu2 }
 0x2a0   : > { %v4942_v7 = vadd.f32 %v7255_v54, %v4906_v59  ;;  %v3661_v6 = vadd.f32 %v3586_v25, %v3307_v32  ;;  %v4304_v41 = vpop.f32.mrf.mxu3  ;;  %v7351_v25 = vld [vmem:[#allocation8_spill] sm:$0xff] }
 0x2a1   : > { %v3235_v48 = vpop.f32.mrf.mxu1 }
 0x2a2   : > { %4974 = vst [vmem:[%s7004_s24 + $0xc0] sm:$0xff] %v4942_v7  ;;  %v4379_v51 = vadd.f32 %v4304_v41, %v3661_v6  ;;  %v4801_v57 = vpop.f32.mrf.mxu0  ;;  %v3308_v10 = vadd.f32 %v3235_v48, %v6875_v50 }
 0x2a4   : > { %v4873_v62 = vadd.f32 %v4798_v39, %v4379_v51 }
 0x2a6   : > { %v4907_v33 = vmul.f32 %v6973_v2, %v4873_v62 }
 0x2a7   : > { %v3589_v45 = vpop.f32.mrf.mxu2 }
 0x2a8   : > { %v4943_v14 = vadd.f32 %v7255_v54, %v4907_v33  ;;  %v3662_v1 = vadd.f32 %v3589_v45, %v3308_v10  ;;  %v4307_v23 = vpop.f32.mrf.mxu3 }
 0x2a9   : > { %v3237_v38 = vpop.f32.mrf.mxu1 }
 0x2aa   : > { %4975 = vst [vmem:[%s7004_s24 + $0xc8] sm:$0xff] %v4943_v14  ;;  %v4380_v37 = vadd.f32 %v4307_v23, %v3662_v1  ;;  %v4803_v49 = vpop.f32.mrf.mxu0  ;;  %v3309_v13 = vadd.f32 %v3237_v38, %v7347_v31 }
 0x2ac   : > { %v4874_v53 = vadd.f32 %v4801_v57, %v4380_v37 }
 0x2ae   : > { %v4908_v40 = vmul.f32 %v6973_v2, %v4874_v53 }
 0x2af   : > { %v3591_v9 = vpop.f32.mrf.mxu2 }
 0x2b0   : > { %v4944_v16 = vadd.f32 %v7255_v54, %v4908_v40  ;;  %v3663_v50 = vadd.f32 %v3591_v9, %v3309_v13  ;;  %v4309_v60 = vpop.f32.mrf.mxu3 }
 0x2b1   : > { %v3240_v3 = vpop.f32.mrf.mxu1 }
 0x2b2   : > { %4976 = vst [vmem:[%s7004_s24 + $0xd0] sm:$0xff] %v4944_v16  ;;  %v4381_v27 = vadd.f32 %v4309_v60, %v3663_v50  ;;  %v4806_v52 = vpop.f32.mrf.mxu0  ;;  %v3310_v61 = vadd.f32 %v3240_v3, %v7348_v19 }
 0x2b4   : > { %v4875_v4 = vadd.f32 %v4803_v49, %v4381_v27 }
 0x2b6   : > { %v4909_v24 = vmul.f32 %v6973_v2, %v4875_v4 }
 0x2b7   : > { %v3594_v15 = vpop.f32.mrf.mxu2 }
 0x2b8   : > { %v4945_v46 = vadd.f32 %v7255_v54, %v4909_v24  ;;  %v3664_v26 = vadd.f32 %v3594_v15, %v3310_v61  ;;  %v4312_v36 = vpop.f32.mrf.mxu3 }
 0x2b9   : > { %v3242_v63 = vpop.f32.mrf.mxu1 }
 0x2ba   : > { %4977 = vst [vmem:[%s7004_s24 + $0xd8] sm:$0xff] %v4945_v46  ;;  %v4382_v35 = vadd.f32 %v4312_v36, %v3664_v26  ;;  %v3311_v30 = vadd.f32 %v3242_v63, %v7349_v29  ;;  %v4808_v21 = vpop.f32.mrf.mxu0 }
 0x2bc   : > { %v4876_v22 = vadd.f32 %v4806_v52, %v4382_v35 }
 0x2be   : > { %v4910_v34 = vmul.f32 %v6973_v2, %v4876_v22 }
 0x2bf   : > { %v3596_v17 = vpop.f32.mrf.mxu2 }
 0x2c0   : > { %v4946_v58 = vadd.f32 %v7255_v54, %v4910_v34  ;;  %v3665_v12 = vadd.f32 %v3596_v17, %v3311_v30  ;;  %v4314_v11 = vpop.f32.mrf.mxu3 }
 0x2c1   : > { %v3245_v0 = vpop.f32.mrf.mxu1 }
 0x2c2   : > { %4978 = vst [vmem:[%s7004_s24 + $0xe0] sm:$0xff] %v4946_v58  ;;  %v4383_v55 = vadd.f32 %v4314_v11, %v3665_v12  ;;  %v3312_v43 = vadd.f32 %v3245_v0, %v7350_v28  ;;  %v4811_v44 = vpop.f32.mrf.mxu0 }
 0x2c4   : > { %v4877_v47 = vadd.f32 %v4808_v21, %v4383_v55 }
 0x2c6   : > { %v4911_v18 = vmul.f32 %v6973_v2, %v4877_v47 }
 0x2c7   : > { %v3599_v5 = vpop.f32.mrf.mxu2 }
 0x2c8   : > { %v4947_v8 = vadd.f32 %v7255_v54, %v4911_v18  ;;  %v3666_v56 = vadd.f32 %v3599_v5, %v3312_v43  ;;  %v4317_v42 = vpop.f32.mrf.mxu3 }
 0x2c9   : > { %v3247_v20 = vpop.f32.mrf.mxu1 }
 0x2ca   : > { %4979 = vst [vmem:[%s7004_s24 + $0xe8] sm:$0xff] %v4947_v8  ;;  %v4384_v39 = vadd.f32 %v4317_v42, %v3666_v56  ;;  %v3313_v7 = vadd.f32 %v3247_v20, %v7351_v25  ;;  %v4813_v62 = vpop.f32.mrf.mxu0 }
 0x2cc   : > { %v4878_v59 = vadd.f32 %v4811_v44, %v4384_v39 }
 0x2ce   : > { %v4912_v32 = vmul.f32 %v6973_v2, %v4878_v59 }
 0x2cf   : > { %v3601_v6 = vpop.f32.mrf.mxu2 }
 0x2d0   : > { %v4948_v41 = vadd.f32 %v7255_v54, %v4912_v32  ;;  %v3667_v48 = vadd.f32 %v3601_v6, %v3313_v7  ;;  %v4319_v51 = vpop.f32.mrf.mxu3 }
 0x2d2   : > { %4980 = vst [vmem:[%s7004_s24 + $0xf0] sm:$0xff] %v4948_v41  ;;  %v4385_v57 = vadd.f32 %v4319_v51, %v3667_v48 }
 0x2d4   : > { %v4879_v33 = vadd.f32 %v4813_v62, %v4385_v57 }
 0x2d6   : > { %v4913_v10 = vmul.f32 %v6973_v2, %v4879_v33 }
 0x2d8   : > { %v4949_v45 = vadd.f32 %v7255_v54, %v4913_v10 }
 0x2da   : > { %4981 = vst [vmem:[%s7004_s24 + $0xf8] sm:$0xff] %v4949_v45 }
 0x2db PF: > { %s15_s19 = sadd.s32 1, %s5880_s19   ;;  %s7352_s17 = smov %s5876_s18 }
 0x2dc   : > { %p12_p5 = scmp.ge.s32.totalorder %s15_s19, 4   ;;  %s7353_s18 = smov %s7355_s0 }
 0x2de   :  { %14 = sbr.rel (!%p12_p5) target bundleno = 2 (0x2), region = 83 }

</bundles_post_ra>
